<compile_context>
chip_gen: v7x
topology: tpu7x:2x2x1
jax: 0.10.0
libtpu: 0.0.40
codegen_flags: <defaults>
</compile_context>

<pallas_src>
from functools import partial

import jax
import jax.numpy as jnp
from jax import lax
from jax.experimental import pallas as pl
from jax.experimental.pallas import tpu as pltpu


# ----------------------------- kernel helpers ------------------------------

def _layernorm(x, gamma, beta, eps=1e-5):
    # two-pass form (var = E[(x - mu)^2]) for numerical robustness across depth
    mu = jnp.mean(x, axis=-1, keepdims=True)
    xc = x - mu
    var = jnp.mean(xc * xc, axis=-1, keepdims=True)
    return xc * lax.rsqrt(var + eps) * gamma + beta


# ------------------------------- the kernel --------------------------------

def encoder_layer_kernel(x_ref,
                         g1_ref, b1_ref,
                         wqkv_ref,
                         wo_ref, bo_ref,
                         g2_ref, b2_ref,
                         w1_ref, bb1_ref,
                         w2_ref, bb2_ref,
                         o_ref,
                         acc_ref,
                         *, heads, dim_head):
    d_idx = pl.program_id(1)
    bb, n_seq, dmodel = x_ref.shape
    rows = bb * n_seq
    inner = heads * dim_head

    # Load the input activation into the persistent carry at the first layer.
    @pl.when(d_idx == 0)
    def _():
        acc_ref[...] = x_ref[...].reshape(rows, dmodel).astype(jnp.float32)

    x = acc_ref[...]                                       # [Bb*N, D] f32

    # ---- Multi-head self-attention (pre-norm) ----
    xn = _layernorm(x, g1_ref[0], b1_ref[0])               # [Bb*N, D] f32
    qkv = jnp.dot(xn.astype(jnp.bfloat16), wqkv_ref[0],
                  preferred_element_type=jnp.float32)      # [Bb*N, 3*inner]

    # scale (dim_head**-0.5) was folded into the q-columns of Wqkv host-side
    q = qkv[:, 0 * inner:1 * inner].astype(jnp.bfloat16)
    k = qkv[:, 1 * inner:2 * inner].astype(jnp.bfloat16)
    v = qkv[:, 2 * inner:3 * inner].astype(jnp.bfloat16)

    def to_heads(t):
        # [Bb*N, inner] -> [Bb*H, N, dh]  (batched heads, no per-head loop)
        return (t.reshape(bb, n_seq, heads, dim_head)
                 .transpose(0, 2, 1, 3)
                 .reshape(bb * heads, n_seq, dim_head))

    qh, kh, vh = to_heads(q), to_heads(k), to_heads(v)

    s = jnp.einsum('hqd,hkd->hqk', qh, kh,
                   preferred_element_type=jnp.float32)     # [Bb*H, N, N] f32
    s = s - jnp.max(s, axis=-1, keepdims=True)
    e = jnp.exp(s)
    denom = jnp.sum(e, axis=-1, keepdims=True)
    p = e * pl.reciprocal(denom, approx=True)              # softmax, EUP recip

    ctx = jnp.einsum('hqk,hkd->hqd', p.astype(jnp.bfloat16), vh,
                     preferred_element_type=jnp.float32)   # [Bb*H, N, dh]
    ctx = (ctx.reshape(bb, heads, n_seq, dim_head)
              .transpose(0, 2, 1, 3)
              .reshape(rows, inner))                       # [Bb*N, inner]

    attn_out = jnp.dot(ctx.astype(jnp.bfloat16), wo_ref[0],
                       preferred_element_type=jnp.float32) + bo_ref[0]
    x = x + attn_out                                       # residual 1

    # ---- Feed-forward (pre-norm) ----
    xn2 = _layernorm(x, g2_ref[0], b2_ref[0])
    h = jnp.dot(xn2.astype(jnp.bfloat16), w1_ref[0],
                preferred_element_type=jnp.float32) + bb1_ref[0]
    # tanh-approx GELU (EUP) -- tiny deviation from nn.GELU's exact erf
    h = jax.nn.gelu(h, approximate=True)
    y = jnp.dot(h.astype(jnp.bfloat16), w2_ref[0],
                preferred_element_type=jnp.float32) + bb2_ref[0]
    x = x + y                                              # residual 2

    acc_ref[...] = x                                       # carry to next layer

    @pl.when(d_idx == pl.num_programs(1) - 1)
    def _():
        o_ref[...] = x.reshape(bb, n_seq, dmodel).astype(o_ref.dtype)


# ------------------------------ encoder wrapper -----------------------------

def _choose_batch_block(B, N, target_rows=256):
    """Largest divisor of B with Bb*N <= target_rows, keeping >=2 batch blocks
    when possible (so both v7x TensorCores get work)."""
    divisors = [d for d in range(1, B + 1) if B % d == 0]
    candidates = [d for d in divisors if d * N <= target_rows] or [1]
    bb = max(candidates)
    if B // bb < 2:
        smaller = [d for d in candidates if B // d >= 2]
        if smaller:
            bb = max(smaller)
    return bb


def _vmem_limit_bytes():
    """Generation-aware scoped-VMEM limit with headroom (v5e/v6e: 128 MiB,
    v7x: 64 MiB physical)."""
    cap = 128 * 1024 * 1024
    try:
        cap = int(pltpu.get_tpu_info().vmem_capacity_bytes)
    except Exception:
        pass
    return min(int(cap * 3 // 4), 100 * 1024 * 1024)


def transformer_encoder(x, params, *, heads, dim_head, batch_block=None):
    """Full encoder (all layers, all batch blocks) in a single pallas_call.

    x: [B, N, D] float32; params: dict of [depth, ...]-stacked tensors (bf16
    matmul weights, f32 LN params/biases, scale folded into Wqkv q-columns).
    """
    B, N, D = x.shape
    depth = params["wqkv"].shape[0]
    inner = heads * dim_head
    mlp_dim = params["w1"].shape[-1]

    Bb = batch_block or _choose_batch_block(B, N)
    assert B % Bb == 0, "batch block must divide batch"

    def wspec(arr):
        # per-layer parameter, stacked as [depth, ...]; select layer d only.
        tail = arr.shape[1:]
        zeros = (0,) * len(tail)
        return pl.BlockSpec((1,) + tail, lambda b, d, _z=zeros: (d,) + _z)

    in_specs = [
        pl.BlockSpec((Bb, N, D), lambda b, d: (b, 0, 0)),  # x
        wspec(params["g1"]), wspec(params["b1"]),          # ln1 gamma, beta
        wspec(params["wqkv"]),                             # Wqkv (scale folded)
        wspec(params["wo"]), wspec(params["bo"]),          # Wo, bo
        wspec(params["g2"]), wspec(params["b2"]),          # ln2 gamma, beta
        wspec(params["w1"]), wspec(params["bb1"]),         # W1, b1
        wspec(params["w2"]), wspec(params["bb2"]),         # W2, b2
    ]

    # Advisory cost estimate so XLA schedules around the custom call sensibly.
    flops_per_layer = B * (
        2 * N * D * 3 * inner            # qkv projection
        + 2 * heads * N * N * dim_head   # q @ k^T
        + 2 * heads * N * N * dim_head   # attn @ v
        + 2 * N * inner * D              # output projection
        + 2 * N * D * mlp_dim            # ffn up
        + 2 * N * mlp_dim * D)           # ffn down
    transc_per_layer = B * (heads * N * N + N * mlp_dim + 2 * N + heads * N)
    weight_bytes = sum(int(v.size) * v.dtype.itemsize for v in params.values())
    cost = pl.CostEstimate(
        flops=depth * flops_per_layer,
        transcendentals=depth * transc_per_layer,
        # weights are streamed once per (batch-block, layer)
        bytes_accessed=2 * B * N * D * 4 + (B // Bb) * weight_bytes)

    kernel = partial(encoder_layer_kernel, heads=heads, dim_head=dim_head)

    return pl.pallas_call(
        kernel,
        out_shape=jax.ShapeDtypeStruct((B, N, D), x.dtype),
        grid=(B // Bb, depth),
        in_specs=in_specs,
        out_specs=pl.BlockSpec((Bb, N, D), lambda b, d: (b, 0, 0)),
        scratch_shapes=[pltpu.VMEM((Bb * N, D), jnp.float32)],  # activation carry
        compiler_params=pltpu.CompilerParams(
            dimension_semantics=("parallel", "arbitrary"),
            vmem_limit_bytes=_vmem_limit_bytes()),
        cost_estimate=cost,
    )(x,
      params["g1"], params["b1"],
      params["wqkv"],
      params["wo"], params["bo"],
      params["g2"], params["b2"],
      params["w1"], params["bb1"],
      params["w2"], params["bb2"])


# --------------------------- pure-JAX reference ------------------------------

def encoder_reference(x, params, *, heads, dim_head):
    """f32 reference with exact-erf GELU (nn.GELU default). Uses the same
    (bf16-stored, scale-folded) weights as the kernel, upcast to f32."""
    depth = params["wqkv"].shape[0]
    inner = heads * dim_head

    def ln(t, g, b, eps=1e-5):
        mu = jnp.mean(t, -1, keepdims=True)
        var = jnp.mean((t - mu) ** 2, -1, keepdims=True)
        return (t - mu) / jnp.sqrt(var + eps) * g + b

    B, N, D = x.shape
    for l in range(depth):
        g1, b1 = params["g1"][l, 0], params["b1"][l, 0]
        wqkv = params["wqkv"][l].astype(jnp.float32)       # scale folded
        wo, bo = params["wo"][l].astype(jnp.float32), params["bo"][l, 0]
        g2, b2 = params["g2"][l, 0], params["b2"][l, 0]
        w1, bb1 = params["w1"][l].astype(jnp.float32), params["bb1"][l, 0]
        w2, bb2 = params["w2"][l].astype(jnp.float32), params["bb2"][l, 0]

        xn = ln(x, g1, b1)
        qkv = xn @ wqkv
        q, k, v = jnp.split(qkv, 3, axis=-1)
        sh = lambda t: t.reshape(B, N, heads, dim_head).transpose(0, 2, 1, 3)
        qh, kh, vh = sh(q), sh(k), sh(v)
        s = jnp.einsum('bhqd,bhkd->bhqk', qh, kh)          # scale already in q
        a = jax.nn.softmax(s, axis=-1)
        ctx = jnp.einsum('bhqk,bhkd->bhqd', a, vh)
        ctx = ctx.transpose(0, 2, 1, 3).reshape(B, N, inner)
        x = x + ctx @ wo + bo

        xn2 = ln(x, g2, b2)
        h = xn2 @ w1 + bb1
        h = 0.5 * h * (1.0 + jax.scipy.special.erf(h / jnp.sqrt(2.0)))
        x = x + h @ w2 + bb2
    return x


# ------------------------------ param builders ------------------------------

def init_encoder_params(key, depth, dim, heads, dim_head, mlp_dim):
    """Raw f32 parameters in torch-like layout."""
    inner = heads * dim_head
    ks = jax.random.split(key, 6)
    s = 0.05
    f32 = jnp.float32
    return {
        "g1":   jnp.ones((depth, 1, dim), f32),
        "b1":   jnp.zeros((depth, 1, dim), f32),
        "wqkv": s * jax.random.normal(ks[0], (depth, dim, 3 * inner), f32),
        "wo":   s * jax.random.normal(ks[1], (depth, inner, dim), f32),
        "bo":   s * jax.random.normal(ks[2], (depth, 1, dim), f32),
        "g2":   jnp.ones((depth, 1, dim), f32),
        "b2":   jnp.zeros((depth, 1, dim), f32),
        "w1":   s * jax.random.normal(ks[3], (depth, dim, mlp_dim), f32),
        "bb1":  s * jax.random.normal(ks[4], (depth, 1, mlp_dim), f32),
        "w2":   s * jax.random.normal(ks[5], (depth, mlp_dim, dim), f32),
        "bb2":  jnp.zeros((depth, 1, dim), f32),
    }


def prepare_kernel_params(raw, *, heads, dim_head):
    """Host-side prep: fold 1/sqrt(dim_head) into the q-columns of Wqkv and
    cast matmul weights to bf16 (LN params / biases stay f32)."""
    inner = heads * dim_head
    scale = float(dim_head) ** -0.5
    wqkv = raw["wqkv"].astype(jnp.float32)
    wqkv = wqkv.at[:, :, :inner].multiply(scale)
    bf16 = jnp.bfloat16
    return {
        "g1": raw["g1"], "b1": raw["b1"],
        "wqkv": wqkv.astype(bf16),
        "wo": raw["wo"].astype(bf16), "bo": raw["bo"],
        "g2": raw["g2"], "b2": raw["b2"],
        "w1": raw["w1"].astype(bf16), "bb1": raw["bb1"],
        "w2": raw["w2"].astype(bf16), "bb2": raw["bb2"],
    }


# ----------------------------------- main -----------------------------------

if __name__ == "__main__":
    # Small, lane/sublane-friendly demo shapes (N % 8 == 0, D/inner/mlp % 128 == 0).
    B, N, dim = 4, 16, 128
    depth, heads, dim_head, mlp_dim = 2, 2, 64, 256

    root = jax.random.PRNGKey(0)
    kx, kp = jax.random.split(root)
    x = jax.random.normal(kx, (B, N, dim), jnp.float32)

    raw = init_encoder_params(kp, depth, dim, heads, dim_head, mlp_dim)
    params = prepare_kernel_params(raw, heads=heads, dim_head=dim_head)

    out = transformer_encoder(x, params, heads=heads, dim_head=dim_head)
    out = jax.block_until_ready(out)

    assert out.shape == (B, N, dim) and out.dtype == jnp.float32
    assert bool(jnp.all(jnp.isfinite(out)))

    # Numerical check against a pure-JAX f32 reference (same bf16 weights;
    # kernel uses bf16 MXU inputs + tanh GELU -> loose tolerance).
    ref = encoder_reference(x, params, heads=heads, dim_head=dim_head)
    rel_err = float(jnp.max(jnp.abs(out - ref)) / (jnp.max(jnp.abs(ref)) + 1e-6))
    assert rel_err < 5e-2, f"relative error too high: {rel_err}"

    print("KERNEL_OK")
</pallas_src>

<mosaic_0001>
module attributes {stable_mosaic.version = 11 : i64} {
  func.func @encoder_layer_kernel(%arg0: i32, %arg1: i32, %arg2: memref<2x16x128xf32, #tpu.memory_space<vmem>>, %arg3: memref<1x1x128xf32, #tpu.memory_space<vmem>>, %arg4: memref<1x1x128xf32, #tpu.memory_space<vmem>>, %arg5: memref<1x128x384xbf16, #tpu.memory_space<vmem>>, %arg6: memref<1x128x128xbf16, #tpu.memory_space<vmem>>, %arg7: memref<1x1x128xf32, #tpu.memory_space<vmem>>, %arg8: memref<1x1x128xf32, #tpu.memory_space<vmem>>, %arg9: memref<1x1x128xf32, #tpu.memory_space<vmem>>, %arg10: memref<1x128x256xbf16, #tpu.memory_space<vmem>>, %arg11: memref<1x1x256xf32, #tpu.memory_space<vmem>>, %arg12: memref<1x256x128xbf16, #tpu.memory_space<vmem>>, %arg13: memref<1x1x128xf32, #tpu.memory_space<vmem>>, %arg14: memref<2x16x128xf32, #tpu.memory_space<vmem>>, %arg15: memref<32x128xf32, #tpu.memory_space<vmem>>) attributes {dimension_semantics = [#tpu.dimension_semantics<parallel>, #tpu.dimension_semantics<arbitrary>], iteration_bounds = array<i64: 2, 2>, scalar_prefetch = 0 : i64, scratch_operands = 1 : i64, tpu.core_type = #tpu.core_type<tc>, window_params = [{transform_indices = @transform_0, window_bounds = array<i64: 2, 16, 128>}, {transform_indices = @transform_1, window_bounds = array<i64: 1, 1, 128>}, {transform_indices = @transform_2, window_bounds = array<i64: 1, 1, 128>}, {transform_indices = @transform_3, window_bounds = array<i64: 1, 128, 384>}, {transform_indices = @transform_4, window_bounds = array<i64: 1, 128, 128>}, {transform_indices = @transform_5, window_bounds = array<i64: 1, 1, 128>}, {transform_indices = @transform_6, window_bounds = array<i64: 1, 1, 128>}, {transform_indices = @transform_7, window_bounds = array<i64: 1, 1, 128>}, {transform_indices = @transform_8, window_bounds = array<i64: 1, 128, 256>}, {transform_indices = @transform_9, window_bounds = array<i64: 1, 1, 256>}, {transform_indices = @transform_10, window_bounds = array<i64: 1, 256, 128>}, {transform_indices = @transform_11, window_bounds = array<i64: 1, 1, 128>}, {transform_indices = @transform_12, window_bounds = array<i64: 2, 16, 128>}]} {
    %c0_i32 = arith.constant 0 : i32
    %0 = arith.cmpi eq, %arg1, %c0_i32 : i32
    %1 = arith.extui %0 : i1 to i32
    %c0_i32_0 = arith.constant 0 : i32
    %2 = arith.cmpi ne, %1, %c0_i32_0 : i32
    scf.if %2 {
      %c0_59 = arith.constant 0 : index
      %c0_60 = arith.constant 0 : index
      %c0_61 = arith.constant 0 : index
      %130 = vector.load %arg2[%c0_59, %c0_60, %c0_61] : memref<2x16x128xf32, #tpu.memory_space<vmem>>, vector<2x16x128xf32>
      %131 = vector.shape_cast %130 : vector<2x16x128xf32> to vector<32x128xf32>
      %c0_62 = arith.constant 0 : index
      %c0_63 = arith.constant 0 : index
      %132 = vector.load %arg15[%c0_62, %c0_63] : memref<32x128xf32, #tpu.memory_space<vmem>>, vector<32x128xf32>
      tpu.vector_store %arg15[%c0_62, %c0_63], %131 {strides = array<i32>} : memref<32x128xf32, #tpu.memory_space<vmem>>, vector<32x128xf32>,
    } else {
    }
    %c0 = arith.constant 0 : index
    %c0_1 = arith.constant 0 : index
    %3 = vector.load %arg15[%c0, %c0_1] : memref<32x128xf32, #tpu.memory_space<vmem>>, vector<32x128xf32>
    %c0_2 = arith.constant 0 : index
    %c0_3 = arith.constant 0 : index
    %c0_4 = arith.constant 0 : index
    %4 = vector.load %arg3[%c0_2, %c0_3, %c0_4] : memref<1x1x128xf32, #tpu.memory_space<vmem>>, vector<1x1x128xf32>
    %5 = vector.shape_cast %4 : vector<1x1x128xf32> to vector<1x128xf32>
    %c0_5 = arith.constant 0 : index
    %c0_6 = arith.constant 0 : index
    %c0_7 = arith.constant 0 : index
    %6 = vector.load %arg4[%c0_5, %c0_6, %c0_7] : memref<1x1x128xf32, #tpu.memory_space<vmem>>, vector<1x1x128xf32>
    %7 = vector.shape_cast %6 : vector<1x1x128xf32> to vector<1x128xf32>
    %cst = arith.constant dense<0.000000e+00> : vector<32xf32>
    %8 = vector.multi_reduction <add>, %3, %cst [1] : vector<32x128xf32> to vector<32xf32>
    %9 = vector.shape_cast %8 : vector<32xf32> to vector<32x1xf32>
    %cst_8 = arith.constant 1.280000e+02 : f32
    %10 = vector.broadcast %cst_8 : f32 to vector<32x1xf32>
    %11 = arith.divf %9, %10 : vector<32x1xf32>
    %12 = vector.broadcast %11 : vector<32x1xf32> to vector<32x128xf32>
    %13 = arith.subf %3, %12 : vector<32x128xf32>
    %14 = arith.mulf %13, %13 : vector<32x128xf32>
    %cst_9 = arith.constant dense<0.000000e+00> : vector<32xf32>
    %15 = vector.multi_reduction <add>, %14, %cst_9 [1] : vector<32x128xf32> to vector<32xf32>
    %16 = vector.shape_cast %15 : vector<32xf32> to vector<32x1xf32>
    %cst_10 = arith.constant 1.280000e+02 : f32
    %17 = vector.broadcast %cst_10 : f32 to vector<32x1xf32>
    %18 = arith.divf %16, %17 : vector<32x1xf32>
    %cst_11 = arith.constant 9.99999974E-6 : f32
    %19 = vector.broadcast %cst_11 : f32 to vector<32x1xf32>
    %20 = arith.addf %18, %19 : vector<32x1xf32>
    %21 = math.rsqrt %20 : vector<32x1xf32>
    %22 = vector.broadcast %21 : vector<32x1xf32> to vector<32x128xf32>
    %23 = arith.mulf %13, %22 : vector<32x128xf32>
    %24 = vector.broadcast %5 : vector<1x128xf32> to vector<32x128xf32>
    %25 = arith.mulf %23, %24 : vector<32x128xf32>
    %26 = vector.broadcast %7 : vector<1x128xf32> to vector<32x128xf32>
    %27 = arith.addf %25, %26 : vector<32x128xf32>
    %28 = arith.truncf %27 : vector<32x128xf32> to vector<32x128xbf16>
    %c0_12 = arith.constant 0 : index
    %c0_13 = arith.constant 0 : index
    %c0_14 = arith.constant 0 : index
    %29 = vector.load %arg5[%c0_12, %c0_13, %c0_14] : memref<1x128x384xbf16, #tpu.memory_space<vmem>>, vector<1x128x384xbf16>
    %30 = vector.shape_cast %29 : vector<1x128x384xbf16> to vector<128x384xbf16>
    %cst_15 = arith.constant dense<0.000000e+00> : vector<32x384xf32>
    %31 = tpu.matmul %28, %30, %cst_15 {dimension_numbers = #tpu.dot_dimension_numbers<[1], [0], [0], [1], [0, 0, 1, 1], [], []>} : vector<32x128xbf16>, vector<128x384xbf16>, vector<32x384xf32> -> vector<32x384xf32>
    %32 = vector.extract_strided_slice %31 {offsets = [0, 0], sizes = [32, 128], strides = [1, 1]} : vector<32x384xf32> to vector<32x128xf32>
    %33 = arith.truncf %32 : vector<32x128xf32> to vector<32x128xbf16>
    %34 = vector.extract_strided_slice %31 {offsets = [0, 128], sizes = [32, 128], strides = [1, 1]} : vector<32x384xf32> to vector<32x128xf32>
    %35 = arith.truncf %34 : vector<32x128xf32> to vector<32x128xbf16>
    %36 = vector.extract_strided_slice %31 {offsets = [0, 256], sizes = [32, 128], strides = [1, 1]} : vector<32x384xf32> to vector<32x128xf32>
    %37 = arith.truncf %36 : vector<32x128xf32> to vector<32x128xbf16>
    %38 = vector.shape_cast %33 : vector<32x128xbf16> to vector<2x16x2x64xbf16>
    %39 = tpu.transpose %38, [0, 2, 1, 3] : vector<2x16x2x64xbf16> -> vector<2x2x16x64xbf16>
    %40 = vector.shape_cast %39 : vector<2x2x16x64xbf16> to vector<4x16x64xbf16>
    %41 = vector.shape_cast %35 : vector<32x128xbf16> to vector<2x16x2x64xbf16>
    %42 = tpu.transpose %41, [0, 2, 1, 3] : vector<2x16x2x64xbf16> -> vector<2x2x16x64xbf16>
    %43 = vector.shape_cast %42 : vector<2x2x16x64xbf16> to vector<4x16x64xbf16>
    %44 = vector.shape_cast %37 : vector<32x128xbf16> to vector<2x16x2x64xbf16>
    %45 = tpu.transpose %44, [0, 2, 1, 3] : vector<2x16x2x64xbf16> -> vector<2x2x16x64xbf16>
    %46 = vector.shape_cast %45 : vector<2x2x16x64xbf16> to vector<4x16x64xbf16>
    "tpu.trace_start"() <{level = 10 : i32, message = "hqd,hkd->hqk"}> : () -> ()
    %cst_16 = arith.constant dense<0.000000e+00> : vector<4x16x16xf32>
    %47 = tpu.matmul %40, %43, %cst_16 {dimension_numbers = #tpu.dot_dimension_numbers<[2], [2], [1], [1], [0, 0, 0, 1, 1, 1], [0], [0]>} : vector<4x16x64xbf16>, vector<4x16x64xbf16>, vector<4x16x16xf32> -> vector<4x16x16xf32>
    "tpu.trace_stop"() : () -> ()
    %cst_17 = arith.constant dense<0xFF800000> : vector<4x16xf32>
    %48 = vector.multi_reduction <maximumf>, %47, %cst_17 [2] : vector<4x16x16xf32> to vector<4x16xf32>
    %49 = vector.shape_cast %48 : vector<4x16xf32> to vector<4x16x1xf32>
    %50 = vector.broadcast %49 : vector<4x16x1xf32> to vector<4x16x16xf32>
    %51 = arith.subf %47, %50 : vector<4x16x16xf32>
    %52 = math.exp %51 : vector<4x16x16xf32>
    %cst_18 = arith.constant dense<0.000000e+00> : vector<4x16xf32>
    %53 = vector.multi_reduction <add>, %52, %cst_18 [2] : vector<4x16x16xf32> to vector<4x16xf32>
    %54 = vector.shape_cast %53 : vector<4x16xf32> to vector<4x16x1xf32>
    %55 = tpu.reciprocal %54 {approx = true} : vector<4x16x1xf32> -> vector<4x16x1xf32>
    %56 = vector.broadcast %55 : vector<4x16x1xf32> to vector<4x16x16xf32>
    %57 = arith.mulf %52, %56 : vector<4x16x16xf32>
    %58 = arith.truncf %57 : vector<4x16x16xf32> to vector<4x16x16xbf16>
    "tpu.trace_start"() <{level = 10 : i32, message = "hqk,hkd->hqd"}> : () -> ()
    %cst_19 = arith.constant dense<0.000000e+00> : vector<4x16x64xf32>
    %59 = tpu.matmul %58, %46, %cst_19 {dimension_numbers = #tpu.dot_dimension_numbers<[2], [1], [1], [2], [0, 0, 0, 1, 1, 2], [0], [0]>} : vector<4x16x16xbf16>, vector<4x16x64xbf16>, vector<4x16x64xf32> -> vector<4x16x64xf32>
    "tpu.trace_stop"() : () -> ()
    %60 = vector.shape_cast %59 : vector<4x16x64xf32> to vector<2x2x16x64xf32>
    %61 = tpu.transpose %60, [0, 2, 1, 3] : vector<2x2x16x64xf32> -> vector<2x16x2x64xf32>
    %62 = vector.shape_cast %61 : vector<2x16x2x64xf32> to vector<32x128xf32>
    %63 = arith.truncf %62 : vector<32x128xf32> to vector<32x128xbf16>
    %c0_20 = arith.constant 0 : index
    %c0_21 = arith.constant 0 : index
    %c0_22 = arith.constant 0 : index
    %64 = vector.load %arg6[%c0_20, %c0_21, %c0_22] : memref<1x128x128xbf16, #tpu.memory_space<vmem>>, vector<1x128x128xbf16>
    %65 = vector.shape_cast %64 : vector<1x128x128xbf16> to vector<128x128xbf16>
    %cst_23 = arith.constant dense<0.000000e+00> : vector<32x128xf32>
    %66 = tpu.matmul %63, %65, %cst_23 {dimension_numbers = #tpu.dot_dimension_numbers<[1], [0], [0], [1], [0, 0, 1, 1], [], []>} : vector<32x128xbf16>, vector<128x128xbf16>, vector<32x128xf32> -> vector<32x128xf32>
    %c0_24 = arith.constant 0 : index
    %c0_25 = arith.constant 0 : index
    %c0_26 = arith.constant 0 : index
    %67 = vector.load %arg7[%c0_24, %c0_25, %c0_26] : memref<1x1x128xf32, #tpu.memory_space<vmem>>, vector<1x1x128xf32>
    %68 = vector.shape_cast %67 : vector<1x1x128xf32> to vector<1x128xf32>
    %69 = vector.broadcast %68 : vector<1x128xf32> to vector<32x128xf32>
    %70 = arith.addf %66, %69 : vector<32x128xf32>
    %71 = arith.addf %3, %70 : vector<32x128xf32>
    %c0_27 = arith.constant 0 : index
    %c0_28 = arith.constant 0 : index
    %c0_29 = arith.constant 0 : index
    %72 = vector.load %arg8[%c0_27, %c0_28, %c0_29] : memref<1x1x128xf32, #tpu.memory_space<vmem>>, vector<1x1x128xf32>
    %73 = vector.shape_cast %72 : vector<1x1x128xf32> to vector<1x128xf32>
    %c0_30 = arith.constant 0 : index
    %c0_31 = arith.constant 0 : index
    %c0_32 = arith.constant 0 : index
    %74 = vector.load %arg9[%c0_30, %c0_31, %c0_32] : memref<1x1x128xf32, #tpu.memory_space<vmem>>, vector<1x1x128xf32>
    %75 = vector.shape_cast %74 : vector<1x1x128xf32> to vector<1x128xf32>
    %cst_33 = arith.constant dense<0.000000e+00> : vector<32xf32>
    %76 = vector.multi_reduction <add>, %71, %cst_33 [1] : vector<32x128xf32> to vector<32xf32>
    %77 = vector.shape_cast %76 : vector<32xf32> to vector<32x1xf32>
    %cst_34 = arith.constant 1.280000e+02 : f32
    %78 = vector.broadcast %cst_34 : f32 to vector<32x1xf32>
    %79 = arith.divf %77, %78 : vector<32x1xf32>
    %80 = vector.broadcast %79 : vector<32x1xf32> to vector<32x128xf32>
    %81 = arith.subf %71, %80 : vector<32x128xf32>
    %82 = arith.mulf %81, %81 : vector<32x128xf32>
    %cst_35 = arith.constant dense<0.000000e+00> : vector<32xf32>
    %83 = vector.multi_reduction <add>, %82, %cst_35 [1] : vector<32x128xf32> to vector<32xf32>
    %84 = vector.shape_cast %83 : vector<32xf32> to vector<32x1xf32>
    %cst_36 = arith.constant 1.280000e+02 : f32
    %85 = vector.broadcast %cst_36 : f32 to vector<32x1xf32>
    %86 = arith.divf %84, %85 : vector<32x1xf32>
    %cst_37 = arith.constant 9.99999974E-6 : f32
    %87 = vector.broadcast %cst_37 : f32 to vector<32x1xf32>
    %88 = arith.addf %86, %87 : vector<32x1xf32>
    %89 = math.rsqrt %88 : vector<32x1xf32>
    %90 = vector.broadcast %89 : vector<32x1xf32> to vector<32x128xf32>
    %91 = arith.mulf %81, %90 : vector<32x128xf32>
    %92 = vector.broadcast %73 : vector<1x128xf32> to vector<32x128xf32>
    %93 = arith.mulf %91, %92 : vector<32x128xf32>
    %94 = vector.broadcast %75 : vector<1x128xf32> to vector<32x128xf32>
    %95 = arith.addf %93, %94 : vector<32x128xf32>
    %96 = arith.truncf %95 : vector<32x128xf32> to vector<32x128xbf16>
    %c0_38 = arith.constant 0 : index
    %c0_39 = arith.constant 0 : index
    %c0_40 = arith.constant 0 : index
    %97 = vector.load %arg10[%c0_38, %c0_39, %c0_40] : memref<1x128x256xbf16, #tpu.memory_space<vmem>>, vector<1x128x256xbf16>
    %98 = vector.shape_cast %97 : vector<1x128x256xbf16> to vector<128x256xbf16>
    %cst_41 = arith.constant dense<0.000000e+00> : vector<32x256xf32>
    %99 = tpu.matmul %96, %98, %cst_41 {dimension_numbers = #tpu.dot_dimension_numbers<[1], [0], [0], [1], [0, 0, 1, 1], [], []>} : vector<32x128xbf16>, vector<128x256xbf16>, vector<32x256xf32> -> vector<32x256xf32>
    %c0_42 = arith.constant 0 : index
    %c0_43 = arith.constant 0 : index
    %c0_44 = arith.constant 0 : index
    %100 = vector.load %arg11[%c0_42, %c0_43, %c0_44] : memref<1x1x256xf32, #tpu.memory_space<vmem>>, vector<1x1x256xf32>
    %101 = vector.shape_cast %100 : vector<1x1x256xf32> to vector<1x256xf32>
    %102 = vector.broadcast %101 : vector<1x256xf32> to vector<32x256xf32>
    %103 = arith.addf %99, %102 : vector<32x256xf32>
    %104 = arith.mulf %103, %103 : vector<32x256xf32>
    %105 = arith.mulf %103, %104 : vector<32x256xf32>
    %cst_45 = arith.constant 4.471500e-02 : f32
    %106 = vector.broadcast %cst_45 : f32 to vector<32x256xf32>
    %107 = arith.mulf %106, %105 : vector<32x256xf32>
    %108 = arith.addf %103, %107 : vector<32x256xf32>
    %cst_46 = arith.constant 0.797884583 : f32
    %109 = vector.broadcast %cst_46 : f32 to vector<32x256xf32>
    %110 = arith.mulf %109, %108 : vector<32x256xf32>
    %111 = math.tanh %110 : vector<32x256xf32>
    %cst_47 = arith.constant 1.000000e+00 : f32
    %112 = vector.broadcast %cst_47 : f32 to vector<32x256xf32>
    %113 = arith.addf %112, %111 : vector<32x256xf32>
    %cst_48 = arith.constant 5.000000e-01 : f32
    %114 = vector.broadcast %cst_48 : f32 to vector<32x256xf32>
    %115 = arith.mulf %114, %113 : vector<32x256xf32>
    %116 = arith.mulf %103, %115 : vector<32x256xf32>
    %117 = arith.truncf %116 : vector<32x256xf32> to vector<32x256xbf16>
    %c0_49 = arith.constant 0 : index
    %c0_50 = arith.constant 0 : index
    %c0_51 = arith.constant 0 : index
    %118 = vector.load %arg12[%c0_49, %c0_50, %c0_51] : memref<1x256x128xbf16, #tpu.memory_space<vmem>>, vector<1x256x128xbf16>
    %119 = vector.shape_cast %118 : vector<1x256x128xbf16> to vector<256x128xbf16>
    %cst_52 = arith.constant dense<0.000000e+00> : vector<32x128xf32>
    %120 = tpu.matmul %117, %119, %cst_52 {dimension_numbers = #tpu.dot_dimension_numbers<[1], [0], [0], [1], [0, 0, 1, 1], [], []>} : vector<32x256xbf16>, vector<256x128xbf16>, vector<32x128xf32> -> vector<32x128xf32>
    %c0_53 = arith.constant 0 : index
    %c0_54 = arith.constant 0 : index
    %c0_55 = arith.constant 0 : index
    %121 = vector.load %arg13[%c0_53, %c0_54, %c0_55] : memref<1x1x128xf32, #tpu.memory_space<vmem>>, vector<1x1x128xf32>
    %122 = vector.shape_cast %121 : vector<1x1x128xf32> to vector<1x128xf32>
    %123 = vector.broadcast %122 : vector<1x128xf32> to vector<32x128xf32>
    %124 = arith.addf %120, %123 : vector<32x128xf32>
    %125 = arith.addf %71, %124 : vector<32x128xf32>
    %c0_56 = arith.constant 0 : index
    %c0_57 = arith.constant 0 : index
    %126 = vector.load %arg15[%c0_56, %c0_57] : memref<32x128xf32, #tpu.memory_space<vmem>>, vector<32x128xf32>
    tpu.vector_store %arg15[%c0_56, %c0_57], %125 {strides = array<i32>} : memref<32x128xf32, #tpu.memory_space<vmem>>, vector<32x128xf32>,
    %c1_i32 = arith.constant 1 : i32
    %127 = arith.cmpi eq, %arg1, %c1_i32 : i32
    %128 = arith.extui %127 : i1 to i32
    %c0_i32_58 = arith.constant 0 : i32
    %129 = arith.cmpi ne, %128, %c0_i32_58 : i32
    scf.if %129 {
      %130 = vector.shape_cast %125 : vector<32x128xf32> to vector<2x16x128xf32>
      %c0_59 = arith.constant 0 : index
      %c0_60 = arith.constant 0 : index
      %c0_61 = arith.constant 0 : index
      %131 = vector.load %arg14[%c0_59, %c0_60, %c0_61] : memref<2x16x128xf32, #tpu.memory_space<vmem>>, vector<2x16x128xf32>
      tpu.vector_store %arg14[%c0_59, %c0_60, %c0_61], %130 {strides = array<i32>} : memref<2x16x128xf32, #tpu.memory_space<vmem>>, vector<2x16x128xf32>,
    } else {
    }
    return
  }
  func.func @transform_0(%arg0: i32, %arg1: i32) -> (i32, i32, i32) {
    %c0_i32 = arith.constant 0 : i32
    %c0_i32_0 = arith.constant 0 : i32
    %c0_i32_1 = arith.constant 0 : i32
    return %arg0, %c0_i32, %c0_i32_0 : i32, i32, i32
  }
  func.func @transform_1(%arg0: i32, %arg1: i32) -> (i32, i32, i32) {
    %c0_i32 = arith.constant 0 : i32
    %c0_i32_0 = arith.constant 0 : i32
    %c0_i32_1 = arith.constant 0 : i32
    return %arg1, %c0_i32, %c0_i32_0 : i32, i32, i32
  }
  func.func @transform_2(%arg0: i32, %arg1: i32) -> (i32, i32, i32) {
    %c0_i32 = arith.constant 0 : i32
    %c0_i32_0 = arith.constant 0 : i32
    %c0_i32_1 = arith.constant 0 : i32
    return %arg1, %c0_i32, %c0_i32_0 : i32, i32, i32
  }
  func.func @transform_3(%arg0: i32, %arg1: i32) -> (i32, i32, i32) {
    %c0_i32 = arith.constant 0 : i32
    %c0_i32_0 = arith.constant 0 : i32
    %c0_i32_1 = arith.constant 0 : i32
    return %arg1, %c0_i32, %c0_i32_0 : i32, i32, i32
  }
  func.func @transform_4(%arg0: i32, %arg1: i32) -> (i32, i32, i32) {
    %c0_i32 = arith.constant 0 : i32
    %c0_i32_0 = arith.constant 0 : i32
    %c0_i32_1 = arith.constant 0 : i32
    return %arg1, %c0_i32, %c0_i32_0 : i32, i32, i32
  }
  func.func @transform_5(%arg0: i32, %arg1: i32) -> (i32, i32, i32) {
    %c0_i32 = arith.constant 0 : i32
    %c0_i32_0 = arith.constant 0 : i32
    %c0_i32_1 = arith.constant 0 : i32
    return %arg1, %c0_i32, %c0_i32_0 : i32, i32, i32
  }
  func.func @transform_6(%arg0: i32, %arg1: i32) -> (i32, i32, i32) {
    %c0_i32 = arith.constant 0 : i32
    %c0_i32_0 = arith.constant 0 : i32
    %c0_i32_1 = arith.constant 0 : i32
    return %arg1, %c0_i32, %c0_i32_0 : i32, i32, i32
  }
  func.func @transform_7(%arg0: i32, %arg1: i32) -> (i32, i32, i32) {
    %c0_i32 = arith.constant 0 : i32
    %c0_i32_0 = arith.constant 0 : i32
    %c0_i32_1 = arith.constant 0 : i32
    return %arg1, %c0_i32, %c0_i32_0 : i32, i32, i32
  }
  func.func @transform_8(%arg0: i32, %arg1: i32) -> (i32, i32, i32) {
    %c0_i32 = arith.constant 0 : i32
    %c0_i32_0 = arith.constant 0 : i32
    %c0_i32_1 = arith.constant 0 : i32
    return %arg1, %c0_i32, %c0_i32_0 : i32, i32, i32
  }
  func.func @transform_9(%arg0: i32, %arg1: i32) -> (i32, i32, i32) {
    %c0_i32 = arith.constant 0 : i32
    %c0_i32_0 = arith.constant 0 : i32
    %c0_i32_1 = arith.constant 0 : i32
    return %arg1, %c0_i32, %c0_i32_0 : i32, i32, i32
  }
  func.func @transform_10(%arg0: i32, %arg1: i32) -> (i32, i32, i32) {
    %c0_i32 = arith.constant 0 : i32
    %c0_i32_0 = arith.constant 0 : i32
    %c0_i32_1 = arith.constant 0 : i32
    return %arg1, %c0_i32, %c0_i32_0 : i32, i32, i32
  }
  func.func @transform_11(%arg0: i32, %arg1: i32) -> (i32, i32, i32) {
    %c0_i32 = arith.constant 0 : i32
    %c0_i32_0 = arith.constant 0 : i32
    %c0_i32_1 = arith.constant 0 : i32
    return %arg1, %c0_i32, %c0_i32_0 : i32, i32, i32
  }
  func.func @transform_12(%arg0: i32, %arg1: i32) -> (i32, i32, i32) {
    %c0_i32 = arith.constant 0 : i32
    %c0_i32_0 = arith.constant 0 : i32
    %c0_i32_1 = arith.constant 0 : i32
    return %arg0, %c0_i32, %c0_i32_0 : i32, i32, i32
  }
}

</mosaic_0001>

<bundles_post_ra>
// kernel: tpu_custom_call.1
= control target key start
LH: loop header
LB: loop body
LE: loop exit
PB: predicated region body
PF: predicated region fallthrough
CT: control target
= control target key end

     0   :  { %s6945_s0 = inlined_call_operand.hbm [shape: f32[4,16,128], index: 0, kind: input, shape index: {}]   ;;  %s6946_s1 = inlined_call_operand.hbm [shape: f32[2,1,128], index: 1, kind: input, shape index: {}]   ;;  %s6947_s2 = inlined_call_operand.hbm [shape: f32[2,1,128], index: 2, kind: input, shape index: {}]   ;;  %s6948_s3 = inlined_call_operand.hbm [shape: bf16[2,128,384], index: 3, kind: input, shape index: {}]   ;;  %s6949_s4 = inlined_call_operand.hbm [shape: bf16[2,128,128], index: 4, kind: input, shape index: {}]   ;;  %s6950_s5 = inlined_call_operand.hbm [shape: f32[2,1,128], index: 5, kind: input, shape index: {}]   ;;  %s6951_s6 = inlined_call_operand.hbm [shape: f32[2,1,128], index: 6, kind: input, shape index: {}]   ;;  %s6952_s7 = inlined_call_operand.hbm [shape: f32[2,1,128], index: 7, kind: input, shape index: {}]   ;;  %s6953_s8 = inlined_call_operand.hbm [shape: bf16[2,128,256], index: 8, kind: input, shape index: {}]   ;;  %s6954_s9 = inlined_call_operand.hbm [shape: f32[2,1,256], index: 9, kind: input, shape index: {}]   ;;  %s6955_s10 = inlined_call_operand.hbm [shape: bf16[2,256,128], index: 10, kind: input, shape index: {}]   ;;  %s6956_s11 = inlined_call_operand.hbm [shape: f32[2,1,128], index: 11, kind: input, shape index: {}]   ;;  %s6957_s12 = inlined_call_operand.hbm [shape: f32[4,16,128], index: 12, kind: output, shape index: {}]  }
   0x1   :  { %6991 = sst [smem:[#allocation41_spill]] %s6945_s0 }
   0x2   :  { %6992 = sst [smem:[#allocation42_spill]] %s6946_s1 }
   0x3   :  { %6993 = sst [smem:[#allocation43_spill]] %s6947_s2 }
   0x4   :  { %6994 = sst [smem:[#allocation44_spill]] %s6948_s3 }
   0x5   :  { %6995 = sst [smem:[#allocation45_spill]] %s6949_s4 }
   0x6   :  { %6996 = sst [smem:[#allocation46_spill]] %s6950_s5 }
   0x7   :  { %6997 = sst [smem:[#allocation47_spill]] %s6951_s6 }
   0x8   :  { %6998 = sst [smem:[#allocation48_spill]] %s6952_s7 }
   0x9   :  { %6999 = sst [smem:[#allocation49_spill]] %s6953_s8 }
   0xa   :  { %7000 = sst [smem:[#allocation50_spill]] %s6954_s9 }
   0xb   :  { %7001 = sst [smem:[#allocation51_spill]] %s6955_s10 }
   0xc   :  { %7002 = sst [smem:[#allocation52_spill]] %s6956_s11 }
   0xd   :  { %7003 = sst [smem:[#allocation53_spill]] %s6957_s12 }
   0xe   :  { %17 = vsyncpa [#allocation4], 0 }
   0xf   :  { %19 = vsyncpa [#allocation4 + $0x1], 0 }
  0x10   :  { %20 = vsyncpa [#allocation7], 0 }
  0x11   :  { %22 = vsyncpa [#allocation7 + $0x1], 0 }
  0x12   :  { %23 = vsyncpa [#allocation10], 0 }
  0x13   :  { %25 = vsyncpa [#allocation10 + $0x1], 0 }
  0x14   :  { %26 = vsyncpa [#allocation13], 0 }
  0x15   :  { %28 = vsyncpa [#allocation13 + $0x1], 0 }
  0x16   :  { %29 = vsyncpa [#allocation16], 0 }
  0x17   :  { %31 = vsyncpa [#allocation16 + $0x1], 0 }
  0x18   :  { %32 = vsyncpa [#allocation19], 0 }
  0x19   :  { %34 = vsyncpa [#allocation19 + $0x1], 0 }
  0x1a   :  { %35 = vsyncpa [#allocation22], 0 }
  0x1b   :  { %37 = vsyncpa [#allocation22 + $0x1], 0 }
  0x1c   :  { %38 = vsyncpa [#allocation5], 0 }
  0x1d   :  { %40 = vsyncpa [#allocation5 + $0x1], 0  ;;  %s5612_s21 = smov 0   ;;  %s5614_s22 = smov 0  }
  0x1e   :  { %s5616_s23 = smov 0   ;;  %s5618_s24 = smov 0  }
  0x1f   :  { %s5620_s25 = smov 0   ;;  %s5622_s26 = smov 0  }
  0x20   :  { %s5624_s27 = smov 0   ;;  %s5626_s28 = smov 0  }
  0x21   :  { %s5628_s29 = smov 0   ;;  %s5630_s30 = smov 0  }
  0x22   :  { %s5632_s13 = smov 0  }
  0x23 LB: > { %7004 = sst [smem:[#allocation32_spill]] %s5498_s26  ;;  %p6964_p0 = scmp.eq.s32.totalorder %s5518_s13, 0  ;;  %s5518_s13 = sphi %s5632_s13, %s46_s13   ;;  %s5514_s30 = sphi %s5630_s30, %s7072_s30   ;;  %s5510_s29 = sphi %s5628_s29, %s7079_s29   ;;  %s5506_s28 = sphi %s5626_s28, %s7070_s28   ;;  %s5502_s27 = sphi %s5624_s27, %s7078_s27   ;;  %s5498_s26 = sphi %s5622_s26, %s7069_s26   ;;  %s5494_s25 = sphi %s5620_s25, %s7077_s25   ;;  %s5490_s24 = sphi %s5618_s24, %s7076_s24   ;;  %s5486_s23 = sphi %s5616_s23, %s7075_s23   ;;  %s5482_s22 = sphi %s5614_s22, %s7074_s22   ;;  %s5478_s21 = sphi %s5612_s21, %s7073_s21  }
  0x24   : > { %7005 = sst [smem:[#allocation33_spill]] %s5502_s27  ;;  %p98_p1 = scmp.ne.s32.totalorder %s5486_s23, %s5482_s22 }
  0x25   : > { %7006 = sst [smem:[#allocation34_spill]] %s5506_s28  ;;  %p6963_p2 = scmp.lt.s32.totalorder %s5518_s13, 4 }
  0x26   : > { %7007 = sst [smem:[#allocation35_spill]] %s5514_s30  ;;  %p100_p3 = por %p98_p1, %p6964_p0 }
  0x27   : > { %s5674_s14 = sand.u32 1, %s5518_s13   ;;  %s5677_s15 = sand.u32 1, %s5486_s23  }
  0x28   : > { %s5680_s16 = sshll.u32 %s5510_s29, 4  ;;  %s7008_s1 = sld [smem:[#allocation42_spill]] }
  0x29   : > { %s439_s20 = scalar_lea.vmem [#allocation6], %s5677_s15  ;;  %p5693_p4 = pnand %p6963_p2, %p100_p3 }
  0x2a   : > { %s446_s12 = sshll.u32 %s439_s20, 4  ;;  %s5689_s12 = int_to_ptr.vmem [resolvable:$true] %s446_s12 }
  0x2b   : > { %s7009_s28 = scalar_select %p5693_p4, 1, 0 }
  0x2c   : > { %p5704_p8 = pneg %p5693_p4 }
  0x2e   : > { %s5686_s19 = scalar_lea.hbm %s7008_s1, %s5680_s16  ;;  %s5017_s10 = scalar_lea.hbm %s7008_s1, 32 }
  0x2f   : > { %s5012_s17 = scalar_lea.hbm %s5686_s19, 16  ;;  %p5018_p11 = scmp.lt.u32.totalorder %s5686_s19, %s7008_s1 }
  0x30   : > { %p5013_p7 = scmp.ne.s32.totalorder %s5686_s19, %s5012_s17  ;;  %p5019_p12 = scmp.lt.u32.totalorder %s5017_s10, %s5012_s17 }
  0x31   : > { %p5021_p1 = scmp.lt.u32.totalorder %s5012_s17, %s5686_s19 }
  0x32   : > { %p5015_p9 = pnand %p5704_p8, %p5013_p7  ;;  %p5020_p13 = por %p5019_p12, %p5018_p11 }
  0x34   : > { %p5016_p10 = pneg %p5015_p9  ;;  %p5022_p3 = por %p5021_p1, %p5020_p13 }
  0x36   : > { %p5023_p2 = pnand %p5022_p3, %p5016_p10 }
  0x38   : > { %5026 = shalt.err (!%p5023_p2)
}
  0x39   : > { %s5027_s27 = scalar_lea.vmem %s5689_s12, 16  ;;  %s5520_s11 = smov [#allocation6]  }
  0x3a   : > { %p5028_p7 = scmp.ne.s32.totalorder %s5689_s12, %s5027_s27  ;;  %s5032_s20 = sshll.u32 %s5520_s11, 4  ;;  %s5033_s20 = int_to_ptr.vmem [resolvable:$false] %s5032_s20 }
  0x3b   : > { %s5034_s6 = scalar_lea.vmem %s5033_s20, 32  ;;  %p5035_p5 = scmp.lt.s32.totalorder %s5689_s12, %s5033_s20 }
  0x3c   : > { %p5030_p9 = pnand %p5028_p7, %p5704_p8  ;;  %p5036_p6 = scmp.lt.s32.totalorder %s5034_s6, %s5027_s27 }
  0x3e   : > { %p5031_p0 = pneg %p5030_p9  ;;  %p5037_p11 = por %p5036_p6, %p5035_p5 }
  0x40   : > { %p5038_p12 = pnand %p5037_p11, %p5031_p0 }
  0x42   : > { %5041 = shalt.err (!%p5038_p12)
}
  0x43   : > { %s7011_s8 = scalar_lea.sflag [#allocation7], %s5674_s14  ;;  %p7012_p2 = scmp.lt.s32.totalorder %s5518_s13, 5 }
  0x44   : > { %4715 = dma.hbm_to_vmem [thread:$0]  (!%p5693_p4), %s5686_s19, 16, %s5689_s12, %s7011_s8  }
  0x45   : > { %p7013_p10 = scmp.ge.s32.totalorder %s5518_s13, 1  ;;  %s4680_s27 = smul.u32 192, %s5677_s15 }
  0x46   : > { %s4681_s17 = smul.u32 3072, %s5510_s29  ;;  %s7016_s3 = sld [smem:[#allocation44_spill]] }
  0x47   : > { %p5733_p13 = pnand %p7013_p10, %p7012_p2  ;;  %s474_s1 = scalar_lea.vmem [#allocation9], %s4680_s27 }
  0x48   : > { %s481_s4 = sshll.u32 %s474_s1, 4  ;;  %s6973_s12 = scalar_lea.sflag [#allocation10], %s5674_s14  ;;  %s5744_s4 = int_to_ptr.vmem [resolvable:$true] %s481_s4 }
  0x49   : > { %s7014_s10 = scalar_select %p5733_p13, 1, 0 }
  0x4b   : > { %7015 = sst [smem:[#allocation36_spill]] %s7014_s10 }
  0x4c   : > { %s5742_s6 = scalar_lea.hbm %s7016_s3, %s4681_s17  ;;  %s5047_s11 = scalar_lea.hbm %s7016_s3, 6144 }
  0x4d   : > { %s5042_s19 = scalar_lea.hbm %s5742_s6, 3072  ;;  %p5048_p1 = scmp.lt.u32.totalorder %s5742_s6, %s7016_s3 }
  0x4e   : > { %p5043_p0 = scmp.ne.s32.totalorder %s5742_s6, %s5042_s19  ;;  %p5049_p3 = scmp.lt.u32.totalorder %s5047_s11, %s5042_s19 }
  0x4f   : > { %p5051_p9 = scmp.lt.u32.totalorder %s5042_s19, %s5742_s6 }
  0x50   : > { %p5045_p5 = pnand %p5043_p0, %p5704_p8  ;;  %p5050_p7 = por %p5049_p3, %p5048_p1 }
  0x52   : > { %p5046_p6 = pneg %p5045_p5  ;;  %p5052_p11 = por %p5051_p9, %p5050_p7 }
  0x54   : > { %p5053_p12 = pnand %p5052_p11, %p5046_p6 }
  0x56   : > { %5056 = shalt.err (!%p5053_p12)
}
  0x57   : > { %s5057_s1 = scalar_lea.vmem %s5744_s4, 3072  ;;  %s5521_s10 = smov [#allocation9]  }
  0x58   : > { %p5058_p2 = scmp.ne.s32.totalorder %s5744_s4, %s5057_s1  ;;  %s5062_s27 = sshll.u32 %s5521_s10, 4  ;;  %s5063_s27 = int_to_ptr.vmem [resolvable:$false] %s5062_s27 }
  0x59   : > { %s5064_s8 = scalar_lea.vmem %s5063_s27, 6144  ;;  %p5065_p5 = scmp.lt.s32.totalorder %s5744_s4, %s5063_s27 }
  0x5a   : > { %p5060_p10 = pnand %p5058_p2, %p5704_p8  ;;  %p5066_p13 = scmp.lt.s32.totalorder %s5064_s8, %s5057_s1 }
  0x5c   : > { %p5061_p0 = pneg %p5060_p10  ;;  %p5067_p1 = por %p5066_p13, %p5065_p5 }
  0x5e   : > { %p5068_p3 = pnand %p5067_p1, %p5061_p0 }
  0x60   : > { %5071 = shalt.err (!%p5068_p3)
}
  0x61   : > { %s5522_s19 = smov 192   ;;  %s5523_s11 = smov 12  }
  0x62   : > { %4721 = dma.hbm_to_vmem [thread:$0]  (!%p5693_p4), %s5742_s6, 3072, %s5744_s4, %s6973_s12, %s5522_s19, %s5522_s19, %s5523_s11  }
  0x63   : > { %s7017_s5 = sld [smem:[#allocation46_spill]]  ;;  %s515_s10 = scalar_lea.vmem [#allocation12], %s5677_s15 }
  0x64   : > { %s522_s27 = sshll.u32 %s515_s10, 4  ;;  %s6970_s8 = scalar_lea.sflag [#allocation13], %s5674_s14  ;;  %s523_s27 = int_to_ptr.vmem [resolvable:$true] %s522_s27 }
  0x69   : > { %s5774_s1 = scalar_lea.hbm %s7017_s5, %s5680_s16  ;;  %s5077_s6 = scalar_lea.hbm %s7017_s5, 32 }
  0x6a   : > { %s5072_s3 = scalar_lea.hbm %s5774_s1, 16  ;;  %p5078_p9 = scmp.lt.u32.totalorder %s5774_s1, %s7017_s5 }
  0x6b   : > { %p5073_p13 = scmp.ne.s32.totalorder %s5774_s1, %s5072_s3  ;;  %p5079_p11 = scmp.lt.u32.totalorder %s5077_s6, %s5072_s3 }
  0x6c   : > { %p5081_p2 = scmp.lt.u32.totalorder %s5072_s3, %s5774_s1 }
  0x6d   : > { %p5075_p6 = pnand %p5073_p13, %p5704_p8  ;;  %p5080_p12 = por %p5079_p11, %p5078_p9 }
  0x6f   : > { %p5076_p7 = pneg %p5075_p6  ;;  %p5082_p10 = por %p5081_p2, %p5080_p12 }
  0x71   : > { %p5083_p0 = pnand %p5082_p10, %p5076_p7 }
  0x73   : > { %5086 = shalt.err (!%p5083_p0)
}
  0x74   : > { %s5087_s17 = scalar_lea.vmem %s523_s27, 16  ;;  %s5524_s20 = smov [#allocation12]  }
  0x75   : > { %p5088_p5 = scmp.ne.s32.totalorder %s523_s27, %s5087_s17  ;;  %s5092_s10 = sshll.u32 %s5524_s20, 4  ;;  %s5093_s10 = int_to_ptr.vmem [resolvable:$false] %s5092_s10 }
  0x76   : > { %s5094_s2 = scalar_lea.vmem %s5093_s10, 32  ;;  %p5095_p13 = scmp.lt.s32.totalorder %s523_s27, %s5093_s10 }
  0x77   : > { %p5090_p1 = pnand %p5088_p5, %p5704_p8  ;;  %p5096_p6 = scmp.lt.s32.totalorder %s5094_s2, %s5087_s17 }
  0x79   : > { %p5091_p3 = pneg %p5090_p1  ;;  %p5097_p4 = por %p5096_p6, %p5095_p13 }
  0x7b   : > { %p5098_p9 = pnand %p5097_p4, %p5091_p3 }
  0x7d   : > { %5101 = shalt.err (!%p5098_p9)
}
  0x7e   : > { %p7018_p11 = scmp.ne.s32.totalorder %s7009_s28, 0  ;;  %s7019_s7 = sld [smem:[#allocation48_spill]] }
  0x7f   : > { %s549_s19 = scalar_lea.vmem [#allocation15], %s5677_s15  ;;  %s6971_s17 = scalar_lea.sflag [#allocation16], %s5674_s14 }
  0x80   : > { %4727 = dma.hbm_to_vmem [thread:$0]  (!%p7018_p11), %s5774_s1, 16, %s523_s27, %s6970_s8  }
  0x81   : > { %s556_s11 = sshll.u32 %s549_s19, 4  ;;  %s557_s11 = int_to_ptr.vmem [resolvable:$true] %s556_s11 }
  0x84   : > { %s5801_s6 = scalar_lea.hbm %s7019_s7, %s5680_s16  ;;  %s5107_s27 = scalar_lea.hbm %s7019_s7, 32 }
  0x85   : > { %s5102_s20 = scalar_lea.hbm %s5801_s6, 16  ;;  %p5108_p2 = scmp.lt.u32.totalorder %s5801_s6, %s7019_s7 }
  0x86   : > { %p5103_p4 = scmp.ne.s32.totalorder %s5801_s6, %s5102_s20  ;;  %p5109_p10 = scmp.lt.u32.totalorder %s5107_s27, %s5102_s20 }
  0x87   : > { %p5111_p5 = scmp.lt.u32.totalorder %s5102_s20, %s5801_s6 }
  0x88   : > { %p5105_p7 = pnand %p5103_p4, %p5704_p8  ;;  %p5110_p0 = por %p5109_p10, %p5108_p2 }
  0x8a   : > { %p5106_p12 = pneg %p5105_p7  ;;  %p5112_p1 = por %p5111_p5, %p5110_p0 }
  0x8c   : > { %p5113_p3 = pnand %p5112_p1, %p5106_p12 }
  0x8e   : > { %5116 = shalt.err (!%p5113_p3)
}
  0x8f   : > { %s5117_s4 = scalar_lea.vmem %s557_s11, 16  ;;  %s5525_s19 = smov [#allocation15]  }
  0x90   : > { %p5118_p13 = scmp.ne.s32.totalorder %s557_s11, %s5117_s4  ;;  %s5122_s8 = sshll.u32 %s5525_s19, 4  ;;  %s5123_s8 = int_to_ptr.vmem [resolvable:$false] %s5122_s8 }
  0x91   : > { %s5124_s10 = scalar_lea.vmem %s5123_s8, 32  ;;  %p5125_p4 = scmp.lt.s32.totalorder %s557_s11, %s5123_s8 }
  0x92   : > { %p5120_p6 = pnand %p5118_p13, %p5704_p8  ;;  %p5126_p7 = scmp.lt.s32.totalorder %s5124_s10, %s5117_s4 }
  0x94   : > { %p5121_p9 = pneg %p5120_p6  ;;  %p5127_p11 = por %p5126_p7, %p5125_p4 }
  0x96   : > { %p5128_p2 = pnand %p5127_p11, %p5121_p9 }
  0x98   : > { %5131 = shalt.err (!%p5128_p2)
}
  0x99   : > { %p7020_p10 = scmp.ne.s32.totalorder %s7009_s28, 0  ;;  %s4388_s20 = sshll.u32 %s5677_s15, 1 }
  0x9a   : > { %s4524_s1 = sshll.u32 %s5510_s29, 5  ;;  %s7021_s9 = sld [smem:[#allocation50_spill]] }
  0x9b   : > { %4733 = dma.hbm_to_vmem [thread:$0]  (!%p7020_p10), %s5801_s6, 16, %s557_s11, %s6971_s17  }
  0x9c   : > { %s588_s3 = scalar_lea.vmem [#allocation18], %s4388_s20  ;;  %s6972_s19 = scalar_lea.sflag [#allocation19], %s5674_s14 }
  0x9d   : > { %s596_s4 = sshll.u32 %s588_s3, 4  ;;  %s597_s4 = int_to_ptr.vmem [resolvable:$true] %s596_s4 }
  0xa0   : > { %s5829_s8 = scalar_lea.hbm %s7021_s9, %s4524_s1  ;;  %s5137_s17 = scalar_lea.hbm %s7021_s9, 64 }
  0xa1   : > { %s5132_s10 = scalar_lea.hbm %s5829_s8, 32  ;;  %p5138_p5 = scmp.lt.u32.totalorder %s5829_s8, %s7021_s9 }
  0xa2   : > { %p5133_p11 = scmp.ne.s32.totalorder %s5829_s8, %s5132_s10  ;;  %p5139_p1 = scmp.lt.u32.totalorder %s5137_s17, %s5132_s10 }
  0xa3   : > { %p5141_p13 = scmp.lt.u32.totalorder %s5132_s10, %s5829_s8 }
  0xa4   : > { %p5135_p12 = pnand %p5133_p11, %p5704_p8  ;;  %p5140_p3 = por %p5139_p1, %p5138_p5 }
  0xa6   : > { %p5136_p0 = pneg %p5135_p12  ;;  %p5142_p6 = por %p5141_p13, %p5140_p3 }
  0xa8   : > { %p5143_p9 = pnand %p5142_p6, %p5136_p0 }
  0xaa   : > { %5146 = shalt.err (!%p5143_p9)
}
  0xab   : > { %s5147_s20 = scalar_lea.vmem %s597_s4, 32  ;;  %s5526_s2 = smov [#allocation18]  }
  0xac   : > { %p5148_p4 = scmp.ne.s32.totalorder %s597_s4, %s5147_s20  ;;  %s5152_s3 = sshll.u32 %s5526_s2, 4  ;;  %s5153_s3 = int_to_ptr.vmem [resolvable:$false] %s5152_s3 }
  0xad   : > { %s5154_s6 = scalar_lea.vmem %s5153_s3, 64  ;;  %p5155_p11 = scmp.lt.s32.totalorder %s597_s4, %s5153_s3 }
  0xae   : > { %p5150_p7 = pnand %p5148_p4, %p5704_p8  ;;  %p5156_p12 = scmp.lt.s32.totalorder %s5154_s6, %s5147_s20 }
  0xb0   : > { %p5151_p2 = pneg %p5150_p7  ;;  %p5157_p10 = por %p5156_p12, %p5155_p11 }
  0xb2   : > { %p5158_p1 = pnand %p5157_p10, %p5151_p2 }
  0xb4   : > { %5161 = shalt.err (!%p5158_p1)
}
  0xb5   : > { %p7022_p5 = scmp.ne.s32.totalorder %s7009_s28, 0  ;;  %s5852_s17 = sadd.s32 4294967295, %s5518_s13  }
  0xb6   : > { %s4369_s10 = sadd.s32 4294967294, %s5518_s13   ;;  %s55_s11 = sadd.s32 1, %s5510_s29 }
  0xb7   : > { %4739 = dma.hbm_to_vmem [thread:$0]  (!%p7022_p5), %s5829_s8, 32, %s597_s4, %s6972_s19  }
  0xb8   : > { %s58_s27 = sadd.s32 1, %s5514_s30  ;;  %p56_p10 = scmp.ge.s32.totalorder %s55_s11, 2 }
  0xb9   : > { %s65_s1 = sadd.s32 1, %s5498_s26  ;;  %p72_p0 = scmp.ne.s32.totalorder %s5498_s26, %s5494_s25 }
  0xba   : > { %p78_p3 = scmp.ne.s32.totalorder %s5494_s25, %s5490_s24  ;;  %s7081_s11 = smov (%p56_p10, %s55_s11), 0 }
  0xbb   : > { %7023 = sst [smem:[#allocation37_spill]] %s7081_s11  ;;  %s7083_s27 = smov (!%p56_p10, %s58_s27), %s5514_s30 }
  0xbc   : > { %p7024_p13 = scmp.eq.s32.totalorder %s5518_s13, 0  ;;  %p79_p9 = scmp.eq.s32.totalorder %s5852_s17, 0 }
  0xbd   : > { %p60_p4 = scmp.ge.s32.totalorder %s7083_s27, 2  ;;  %s88_s4 = ssub.s32 %s5510_s29, %s7081_s11 }
  0xbe   : > { %p5870_p6 = por %p7024_p13, %p72_p0  ;;  %p5880_p7 = por %p79_p9, %p78_p3 }
  0xbf   : > { %p89_p2 = scmp.eq.s32.totalorder %s88_s4, 0  ;;  %s7085_s27 = smov (%p60_p4, %s7083_s27), 0 }
  0xc0   : > { %s7026_s20 = scalar_select %p5880_p7, 1, 0 }
  0xc1   : > { %7027 = sst [smem:[#allocation38_spill]] %s7085_s27  ;;  %s91_s2 = sadd.s32 1, %s5486_s23 }
  0xc2   : > { %p104_p11 = scmp.ne.s32.totalorder %s5482_s22, %s5478_s21  ;;  %s62_s3 = ssub.s32 %s5514_s30, %s7085_s27 }
  0xc3   : > { %p388_p12 = scmp.eq.s32.totalorder %s5852_s17, 3  ;;  %p63_p1 = scmp.eq.s32.totalorder %s62_s3, 0 }
  0xc4   : > { %p5892_p10 = por %p104_p11, %p79_p9  ;;  %p394_p4 = scmp.eq.s32.totalorder %s4369_s10, 3 }
  0xc5   : > { %s5897_s19 = scalar_select %p89_p2, %s5486_s23, %s91_s2  }
  0xc6   : > { %s7028_s6 = scalar_select %p5892_p10, 1, 0 }
  0xc7   : > { %7029 = sst [smem:[#allocation39_spill]] %s5897_s19  ;;  %p5905_p13 = por %p388_p12, %p72_p0 }
  0xc8   : > { %s5900_s12 = scalar_select %p63_p1, %s5498_s26, %s65_s1  }
  0xc9   : > { %s7031_s4 = scalar_select %p5905_p13, 1, 0 }
  0xca   : > { %7030 = sst [smem:[#allocation40_spill]] %s5900_s12  ;;  %s414_s5 = sand.u32 1, %s5498_s26  }
  0xcb   : > { %s4521_s7 = sshll.u32 %s5514_s30, 9  ;;  %p5914_p7 = por %p394_p4, %p78_p3 }
  0xcc   : > { %s4372_s3 = sshll.u32 %s414_s5, 5  ;;  %s7033_s0 = sld [smem:[#allocation41_spill]] }
  0xcd   : > { %s7032_s21 = scalar_select %p5914_p7, 1, 0 }
  0xce   : > { %p7034_p9 = scmp.lt.s32.totalorder %s5518_s13, 4  ;;  %s418_s1 = scalar_lea.vmem [#allocation3], %s4372_s3 }
  0xcf   : > { %s426_s11 = sshll.u32 %s418_s1, 4  ;;  %s5933_s30 = scalar_lea.sflag [#allocation4], %s414_s5  ;;  %s5931_s11 = int_to_ptr.vmem [resolvable:$true] %s426_s11 }
  0xd0   : > { %p5927_p0 = pnand %p7034_p9, %p5870_p6 }
  0xd2   : > { %s5921_s2 = scalar_lea.hbm %s7033_s0, %s4521_s7  ;;  %p5164_p2 = pneg %p5927_p0 }
  0xd3   : > { %s5162_s7 = scalar_lea.hbm %s5921_s2, 512  ;;  %s5167_s8 = scalar_lea.hbm %s7033_s0, 1024 }
  0xd4   : > { %p5163_p3 = scmp.ne.s32.totalorder %s5921_s2, %s5162_s7  ;;  %p5168_p6 = scmp.lt.u32.totalorder %s5921_s2, %s7033_s0 }
  0xd5   : > { %p5169_p1 = scmp.lt.u32.totalorder %s5167_s8, %s5162_s7  ;;  %p5171_p9 = scmp.lt.u32.totalorder %s5162_s7, %s5921_s2 }
  0xd6   : > { %p5165_p11 = pnand %p5164_p2, %p5163_p3 }
  0xd7   : > { %p5170_p4 = por %p5169_p1, %p5168_p6 }
  0xd8   : > { %p5166_p12 = pneg %p5165_p11 }
  0xd9   : > { %p5172_p7 = por %p5171_p9, %p5170_p4 }
  0xdb   : > { %p5173_p13 = pnand %p5172_p7, %p5166_p12 }
  0xdd   : > { %5176 = shalt.err (!%p5173_p13)
}
  0xde   : > { %s5177_s5 = scalar_lea.vmem %s5931_s11, 512  ;;  %s5527_s3 = smov [#allocation3]  }
  0xdf   : > { %p5178_p3 = scmp.ne.s32.totalorder %s5931_s11, %s5177_s5  ;;  %s5182_s1 = sshll.u32 %s5527_s3, 4  ;;  %s5183_s1 = int_to_ptr.vmem [resolvable:$false] %s5182_s1 }
  0xe0   : > { %s5184_s26 = scalar_lea.vmem %s5183_s1, 1024  ;;  %p5185_p5 = scmp.lt.s32.totalorder %s5931_s11, %s5183_s1 }
  0xe1   : > { %p5180_p11 = pnand %p5178_p3, %p5164_p2  ;;  %p5186_p6 = scmp.lt.s32.totalorder %s5184_s26, %s5177_s5 }
  0xe3   : > { %p5181_p10 = pneg %p5180_p11  ;;  %p5187_p1 = por %p5186_p6, %p5185_p5 }
  0xe5   : > { %p5188_p4 = pnand %p5187_p1, %p5181_p10 }
  0xe7   : > { %5191 = shalt.err (!%p5188_p4)
}
  0xe8   : > { %s6981_s12 = smov 128   ;;  %s6982_s7 = smov 8  }
  0xe9   : > { %4712 = dma.hbm_to_vmem [thread:$0]  (!%p5927_p0), %s5921_s2, 512, %s5931_s11, %s5933_s30, %s6981_s12, %s6981_s12, %s6982_s7  }
  0xea   : > { %s7036_s8 = sld [smem:[#allocation43_spill]]  ;;  %s456_s3 = scalar_lea.vmem [#allocation8], %s5677_s15 }
  0xeb   : > { %s463_s1 = sshll.u32 %s456_s3, 4  ;;  %s4379_s26 = sshll.u32 %s5677_s15, 6  ;;  %s464_s1 = int_to_ptr.vmem [resolvable:$true] %s463_s1 }
  0xf0   : > { %s5968_s5 = scalar_lea.hbm %s7036_s8, %s5680_s16  ;;  %s5197_s11 = scalar_lea.hbm %s7036_s8, 32 }
  0xf1   : > { %s5192_s0 = scalar_lea.hbm %s5968_s5, 16  ;;  %p5198_p13 = scmp.lt.u32.totalorder %s5968_s5, %s7036_s8 }
  0xf2   : > { %p5193_p5 = scmp.ne.s32.totalorder %s5968_s5, %s5192_s0  ;;  %p5199_p0 = scmp.lt.u32.totalorder %s5197_s11, %s5192_s0 }
  0xf3   : > { %p5201_p12 = scmp.lt.u32.totalorder %s5192_s0, %s5968_s5 }
  0xf4   : > { %p5195_p7 = pnand %p5193_p5, %p5704_p8  ;;  %p5200_p2 = por %p5199_p0, %p5198_p13 }
  0xf6   : > { %p5196_p10 = pneg %p5195_p7  ;;  %p5202_p9 = por %p5201_p12, %p5200_p2 }
  0xf8   : > { %p5203_p3 = pnand %p5202_p9, %p5196_p10 }
  0xfa   : > { %5206 = shalt.err (!%p5203_p3)
}
  0xfb   : > { %s5207_s27 = scalar_lea.vmem %s464_s1, 16  ;;  %s5530_s3 = smov [#allocation8]  }
  0xfc   : > { %p5208_p11 = scmp.ne.s32.totalorder %s464_s1, %s5207_s27  ;;  %s5212_s12 = sshll.u32 %s5530_s3, 4  ;;  %s5213_s12 = int_to_ptr.vmem [resolvable:$false] %s5212_s12 }
  0xfd   : > { %s5214_s10 = scalar_lea.vmem %s5213_s12, 32  ;;  %p5215_p4 = scmp.lt.s32.totalorder %s464_s1, %s5213_s12 }
  0xfe   : > { %p5210_p6 = pnand %p5208_p11, %p5704_p8  ;;  %p5216_p5 = scmp.lt.s32.totalorder %s5214_s10, %s5207_s27 }
 0x100   : > { %p5211_p1 = pneg %p5210_p6  ;;  %p5217_p7 = por %p5216_p5, %p5215_p4 }
 0x102   : > { %p5218_p0 = pnand %p5217_p7, %p5211_p1 }
 0x104   : > { %5221 = shalt.err (!%p5218_p0)
}
 0x105   : > { %p7037_p13 = scmp.ne.s32.totalorder %s7009_s28, 0  ;;  %s7038_s0 = scalar_lea.sflag [#allocation7], %s5674_s14 }
 0x106   : > { %s4522_s30 = sshll.u32 %s5510_s29, 10  ;;  %s7039_s9 = sld [smem:[#allocation45_spill]] }
 0x107   : > { %4718 = dma.hbm_to_vmem [thread:$0]  (!%p7037_p13), %s5968_s5, 16, %s464_s1, %s7038_s0  }
 0x108   : > { %s495_s12 = scalar_lea.vmem [#allocation11], %s4379_s26 }
 0x109   : > { %s502_s27 = sshll.u32 %s495_s12, 4  ;;  %s5999_s27 = int_to_ptr.vmem [resolvable:$true] %s502_s27 }
 0x10c   : > { %s5995_s3 = scalar_lea.hbm %s7039_s9, %s4522_s30  ;;  %s5227_s0 = scalar_lea.hbm %s7039_s9, 2048 }
 0x10d   : > { %s5222_s10 = scalar_lea.hbm %s5995_s3, 1024  ;;  %p5228_p9 = scmp.lt.u32.totalorder %s5995_s3, %s7039_s9 }
 0x10e   : > { %p5223_p10 = scmp.ne.s32.totalorder %s5995_s3, %s5222_s10  ;;  %p5229_p3 = scmp.lt.u32.totalorder %s5227_s0, %s5222_s10 }
 0x10f   : > { %p5231_p6 = scmp.lt.u32.totalorder %s5222_s10, %s5995_s3 }
 0x110   : > { %p5225_p2 = pnand %p5223_p10, %p5704_p8  ;;  %p5230_p11 = por %p5229_p3, %p5228_p9 }
 0x112   : > { %p5226_p12 = pneg %p5225_p2  ;;  %p5232_p1 = por %p5231_p6, %p5230_p11 }
 0x114   : > { %p5233_p4 = pnand %p5232_p1, %p5226_p12 }
 0x116   : > { %5236 = shalt.err (!%p5233_p4)
}
 0x117   : > { %s5237_s26 = scalar_lea.vmem %s5999_s27, 1024  ;;  %s5531_s2 = smov [#allocation11]  }
 0x118   : > { %p5238_p5 = scmp.ne.s32.totalorder %s5999_s27, %s5237_s26  ;;  %s5242_s12 = sshll.u32 %s5531_s2, 4  ;;  %s5243_s12 = int_to_ptr.vmem [resolvable:$false] %s5242_s12 }
 0x119   : > { %s5244_s5 = scalar_lea.vmem %s5243_s12, 2048  ;;  %p5245_p10 = scmp.lt.s32.totalorder %s5999_s27, %s5243_s12 }
 0x11a   : > { %p5240_p7 = pnand %p5238_p5, %p5704_p8  ;;  %p5246_p2 = scmp.lt.s32.totalorder %s5244_s5, %s5237_s26 }
 0x11c   : > { %p5241_p0 = pneg %p5240_p7  ;;  %p5247_p9 = por %p5246_p2, %p5245_p10 }
 0x11e   : > { %p5248_p3 = pnand %p5247_p9, %p5241_p0 }
 0x120   : > { %5251 = shalt.err (!%p5248_p3)
}
 0x121   : > { %s6986_s10 = smov 64   ;;  %s6987_s1 = smov 4  }
 0x122   : > { %s7040_s0 = scalar_lea.sflag [#allocation10], %s5674_s14  ;;  %s7041_s26 = sld [smem:[#allocation47_spill]] }
 0x123   : > { %4724 = dma.hbm_to_vmem [thread:$0]  (!%p7037_p13), %s5995_s3, 1024, %s5999_s27, %s7040_s0, %s6986_s10, %s6986_s10, %s6987_s1  }
 0x124   : > { %s532_s5 = scalar_lea.vmem [#allocation14], %s5677_s15  ;;  %s4385_s8 = sshll.u32 %s5677_s15, 7 }
 0x125   : > { %s539_s7 = sshll.u32 %s532_s5, 4  ;;  %s540_s7 = int_to_ptr.vmem [resolvable:$true] %s539_s7 }
 0x128   : > { %s7042_s2 = smov %s7041_s26  ;;  %s6031_s12 = scalar_lea.hbm %s7041_s26, %s5680_s16 }
 0x129   : > { %s5252_s9 = scalar_lea.hbm %s6031_s12, 16  ;;  %s5257_s27 = scalar_lea.hbm %s7042_s2, 32 }
 0x12a   : > { %p5253_p12 = scmp.ne.s32.totalorder %s6031_s12, %s5252_s9  ;;  %p5258_p1 = scmp.lt.u32.totalorder %s6031_s12, %s7042_s2 }
 0x12b   : > { %p5259_p4 = scmp.lt.u32.totalorder %s5257_s27, %s5252_s9  ;;  %p5261_p7 = scmp.lt.u32.totalorder %s5252_s9, %s6031_s12 }
 0x12c   : > { %p5255_p11 = pnand %p5253_p12, %p5704_p8 }
 0x12d   : > { %p5260_p5 = por %p5259_p4, %p5258_p1 }
 0x12e   : > { %p5256_p6 = pneg %p5255_p11 }
 0x12f   : > { %p5262_p0 = por %p5261_p7, %p5260_p5 }
 0x131   : > { %p5263_p10 = pnand %p5262_p0, %p5256_p6 }
 0x133   : > { %5266 = shalt.err (!%p5263_p10)
}
 0x134   : > { %s5267_s11 = scalar_lea.vmem %s540_s7, 16  ;;  %s5534_s26 = smov [#allocation14]  }
 0x135   : > { %p5268_p2 = scmp.ne.s32.totalorder %s540_s7, %s5267_s11  ;;  %s5272_s5 = sshll.u32 %s5534_s26, 4  ;;  %s5273_s5 = int_to_ptr.vmem [resolvable:$false] %s5272_s5 }
 0x136   : > { %s5274_s19 = scalar_lea.vmem %s5273_s5, 32  ;;  %p5275_p12 = scmp.lt.s32.totalorder %s540_s7, %s5273_s5 }
 0x137   : > { %p5270_p9 = pnand %p5268_p2, %p5704_p8  ;;  %p5276_p11 = scmp.lt.s32.totalorder %s5274_s19, %s5267_s11 }
 0x139   : > { %p5271_p3 = pneg %p5270_p9  ;;  %p5277_p13 = por %p5276_p11, %p5275_p12 }
 0x13b   : > { %p5278_p1 = pnand %p5277_p13, %p5271_p3 }
 0x13d   : > { %5281 = shalt.err (!%p5278_p1)
}
 0x13e   : > { %p7043_p4 = scmp.ne.s32.totalorder %s7009_s28, 0  ;;  %s7044_s9 = scalar_lea.sflag [#allocation13], %s5674_s14 }
 0x13f   : > { %s4523_s3 = sshll.u32 %s5510_s29, 11  ;;  %s7045_s30 = sld [smem:[#allocation49_spill]] }
 0x140   : > { %4730 = dma.hbm_to_vmem [thread:$0]  (!%p7043_p4), %s6031_s12, 16, %s540_s7, %s7044_s9  }
 0x141   : > { %s567_s11 = scalar_lea.vmem [#allocation17], %s4385_s8 }
 0x142   : > { %s574_s5 = sshll.u32 %s567_s11, 4  ;;  %s6064_s5 = int_to_ptr.vmem [resolvable:$true] %s574_s5 }
 0x145   : > { %s7046_s10 = smov %s7045_s30  ;;  %s6060_s26 = scalar_lea.hbm %s7045_s30, %s4523_s3 }
 0x146   : > { %s5282_s19 = scalar_lea.hbm %s6060_s26, 2048  ;;  %s5287_s9 = scalar_lea.hbm %s7046_s10, 4096 }
 0x147   : > { %p5283_p13 = scmp.ne.s32.totalorder %s6060_s26, %s5282_s19  ;;  %p5288_p7 = scmp.lt.u32.totalorder %s6060_s26, %s7046_s10 }
 0x148   : > { %p5289_p0 = scmp.lt.u32.totalorder %s5287_s9, %s5282_s19  ;;  %p5291_p2 = scmp.lt.u32.totalorder %s5282_s19, %s6060_s26 }
 0x149   : > { %p5285_p6 = pnand %p5283_p13, %p5704_p8 }
 0x14a   : > { %p5290_p10 = por %p5289_p0, %p5288_p7 }
 0x14b   : > { %p5286_p5 = pneg %p5285_p6 }
 0x14c   : > { %p5292_p9 = por %p5291_p2, %p5290_p10 }
 0x14e   : > { %p5293_p3 = pnand %p5292_p9, %p5286_p5 }
 0x150   : > { %5296 = shalt.err (!%p5293_p3)
}
 0x151   : > { %s5297_s30 = scalar_lea.vmem %s6064_s5, 2048  ;;  %s5535_s11 = smov [#allocation17]  }
 0x152   : > { %p5298_p12 = scmp.ne.s32.totalorder %s6064_s5, %s5297_s30  ;;  %s5302_s7 = sshll.u32 %s5535_s11, 4  ;;  %s5303_s7 = int_to_ptr.vmem [resolvable:$false] %s5302_s7 }
 0x153   : > { %s5304_s12 = scalar_lea.vmem %s5303_s7, 4096  ;;  %p5305_p13 = scmp.lt.s32.totalorder %s6064_s5, %s5303_s7 }
 0x154   : > { %p5300_p11 = pnand %p5298_p12, %p5704_p8  ;;  %p5306_p6 = scmp.lt.s32.totalorder %s5304_s12, %s5297_s30 }
 0x156   : > { %p5301_p1 = pneg %p5300_p11  ;;  %p5307_p7 = por %p5306_p6, %p5305_p13 }
 0x158   : > { %p5308_p0 = pnand %p5307_p7, %p5301_p1 }
 0x15a   : > { %5311 = shalt.err (!%p5308_p0)
}
 0x15b   : > { %s7047_s19 = smov 8   ;;  %s7048_s9 = smov 128  }
 0x15c   : > { %s7049_s27 = scalar_lea.sflag [#allocation16], %s5674_s14  ;;  %s7050_s30 = sld [smem:[#allocation51_spill]] }
 0x15d   : > { %4736 = dma.hbm_to_vmem [thread:$0]  (!%p7043_p4), %s6060_s26, 2048, %s6064_s5, %s7049_s27, %s7048_s9, %s7048_s9, %s7047_s19  }
 0x15e   : > { %s607_s1 = scalar_lea.vmem [#allocation20], %s4385_s8 }
 0x15f   : > { %s614_s2 = sshll.u32 %s607_s1, 4  ;;  %s6101_s2 = int_to_ptr.vmem [resolvable:$true] %s614_s2 }
 0x162   : > { %s7051_s7 = smov %s7050_s30  ;;  %s6097_s12 = scalar_lea.hbm %s7050_s30, %s4523_s3 }
 0x163   : > { %s5312_s10 = scalar_lea.hbm %s6097_s12, 2048  ;;  %s5317_s19 = scalar_lea.hbm %s7051_s7, 4096 }
 0x164   : > { %p5313_p5 = scmp.ne.s32.totalorder %s6097_s12, %s5312_s10  ;;  %p5318_p9 = scmp.lt.u32.totalorder %s6097_s12, %s7051_s7 }
 0x165   : > { %p5319_p3 = scmp.lt.u32.totalorder %s5317_s19, %s5312_s10  ;;  %p5321_p11 = scmp.lt.u32.totalorder %s5312_s10, %s6097_s12 }
 0x166   : > { %p5315_p10 = pnand %p5313_p5, %p5704_p8 }
 0x167   : > { %p5320_p12 = por %p5319_p3, %p5318_p9 }
 0x168   : > { %p5316_p2 = pneg %p5315_p10 }
 0x169   : > { %p5322_p1 = por %p5321_p11, %p5320_p12 }
 0x16b   : > { %p5323_p13 = pnand %p5322_p1, %p5316_p2 }
 0x16d   : > { %5326 = shalt.err (!%p5323_p13)
}
 0x16e   : > { %s5327_s8 = scalar_lea.vmem %s6101_s2, 2048  ;;  %s5536_s1 = smov [#allocation20]  }
 0x16f   : > { %p5328_p6 = scmp.ne.s32.totalorder %s6101_s2, %s5327_s8  ;;  %s5332_s27 = sshll.u32 %s5536_s1, 4  ;;  %s5333_s27 = int_to_ptr.vmem [resolvable:$false] %s5332_s27 }
 0x170   : > { %s5334_s0 = scalar_lea.vmem %s5333_s27, 4096  ;;  %p5335_p5 = scmp.lt.s32.totalorder %s6101_s2, %s5333_s27 }
 0x171   : > { %p5330_p7 = pnand %p5328_p6, %p5704_p8  ;;  %p5336_p10 = scmp.lt.s32.totalorder %s5334_s0, %s5327_s8 }
 0x173   : > { %p5331_p0 = pneg %p5330_p7  ;;  %p5337_p9 = por %p5336_p10, %p5335_p5 }
 0x175   : > { %p5338_p3 = pnand %p5337_p9, %p5331_p0 }
 0x177   : > { %5341 = shalt.err (!%p5338_p3)
}
 0x178   : > { %s7052_s10 = smov 4   ;;  %s7053_s11 = smov 64  }
 0x179   : > { %s7054_s30 = scalar_lea.sflag [#allocation19], %s5674_s14  ;;  %s7055_s19 = sld [smem:[#allocation52_spill]] }
 0x17a   : > { %4742 = dma.hbm_to_vmem [thread:$0]  (!%p7043_p4), %s6097_s12, 2048, %s6101_s2, %s7054_s30, %s7053_s11, %s7053_s11, %s7052_s10  }
 0x17b   : > { %s627_s9 = scalar_lea.vmem [#allocation21], %s5677_s15  ;;  %s625_s14 = scalar_lea.sflag [#allocation22], %s5677_s15 }
 0x17c   : > { %s634_s8 = sshll.u32 %s627_s9, 4  ;;  %s635_s8 = int_to_ptr.vmem [resolvable:$true] %s634_s8 }
 0x17f   : > { %s6133_s3 = scalar_lea.hbm %s7055_s19, %s5680_s16  ;;  %s5347_s12 = scalar_lea.hbm %s7055_s19, 32 }
 0x180   : > { %s5342_s1 = scalar_lea.hbm %s6133_s3, 16  ;;  %p5348_p1 = scmp.lt.u32.totalorder %s6133_s3, %s7055_s19 }
 0x181   : > { %p5343_p2 = scmp.ne.s32.totalorder %s6133_s3, %s5342_s1  ;;  %p5349_p13 = scmp.lt.u32.totalorder %s5347_s12, %s5342_s1 }
 0x182   : > { %p5351_p7 = scmp.lt.u32.totalorder %s5342_s1, %s6133_s3 }
 0x183   : > { %p5345_p12 = pnand %p5343_p2, %p5704_p8  ;;  %p5350_p6 = por %p5349_p13, %p5348_p1 }
 0x185   : > { %p5346_p11 = pneg %p5345_p12  ;;  %p5352_p0 = por %p5351_p7, %p5350_p6 }
 0x187   : > { %p5353_p5 = pnand %p5352_p0, %p5346_p11 }
 0x189   : > { %5356 = shalt.err (!%p5353_p5)
}
 0x18a   : > { %s5357_s15 = scalar_lea.vmem %s635_s8, 16  ;;  %s5537_s10 = smov [#allocation21]  }
 0x18b   : > { %p5358_p10 = scmp.ne.s32.totalorder %s635_s8, %s5357_s15  ;;  %s5362_s11 = sshll.u32 %s5537_s10, 4  ;;  %s5363_s11 = int_to_ptr.vmem [resolvable:$false] %s5362_s11 }
 0x18c   : > { %s5364_s30 = scalar_lea.vmem %s5363_s11, 32  ;;  %p5365_p2 = scmp.lt.s32.totalorder %s635_s8, %s5363_s11 }
 0x18d   : > { %p5360_p9 = pnand %p5358_p10, %p5704_p8  ;;  %p5366_p12 = scmp.lt.s32.totalorder %s5364_s30, %s5357_s15 }
 0x18f   : > { %p5361_p3 = pneg %p5360_p9  ;;  %p5367_p4 = por %p5366_p12, %p5365_p2 }
 0x191   : > { %p5368_p1 = pnand %p5367_p4, %p5361_p3 }
 0x193   : > { %5371 = shalt.err (!%p5368_p1)
}
 0x194   : > { %p7056_p13 = scmp.ne.s32.totalorder %s7009_s28, 0  ;;  %s7057_s26 = sld [smem:[#allocation36_spill]] }
 0x196   : > { %4745 = dma.hbm_to_vmem [thread:$0]  (!%p7056_p13), %s6133_s3, 16, %s635_s8, %s625_s14  }
 0x19a   : > { %p7058_p11 = scmp.ne.s32.totalorder %s7057_s26, 0 }
 0x19b   : > { %s6157_s18 = sand.u32 (!%p7058_p11), 1, %s5494_s25   ;;  %p7059_p8 = scmp.ne.s32.totalorder (!%p7058_p11), %s7026_s20, 0 }
 0x19c   : > { %643 = sbr.rel (%p7058_p11) target bundleno = 3144 (0xc48), region = 68  ;;  %s4396_s5 = sshll.u32 (!%p7058_p11), %s6157_s18, 5 }
 0x19d   : > { %s646_s9 = scalar_lea.sflag (!%p7058_p11), [#allocation4], %s6157_s18  ;;  %s6163_s1 = scalar_lea.vmem (!%p7058_p11), [#allocation3], %s4396_s5 }
 0x1a3   : > { %5445 = dma.done.wait (%p7059_p8), %s646_s9, 512  }
 0x1a4   : > { %5447 = vsyncadd (%p7059_p8), %s646_s9, 4294966784  ;;  %s6170_s28 = sand.u32 1, %s5852_s17   ;;  %s6173_s3 = sand.u32 1, %s5482_s22  }
 0x1a5   : > { %s655_s8 = scalar_lea.sflag [#allocation7], %s6170_s28  ;;  %s657_s14 = scalar_lea.vmem [#allocation6], %s6173_s3 }
 0x1a6   : > { %p7060_p4 = scmp.ne.s32.totalorder %s7028_s6, 0 }
 0x1a8   : > { %5449 = dma.done.wait (%p7060_p4), %s655_s8, 32  }
 0x1a9   : > { %5451 = vsyncadd (%p7060_p4), %s655_s8, 4294967264  ;;  %s4682_s20 = smul.u32 192, %s6173_s3  ;;  %s665_s27 = scalar_lea.vmem [#allocation8], %s6173_s3 }
 0x1aa   : > { %s671_s2 = scalar_lea.sflag [#allocation10], %s6170_s28 }
 0x1ab   : > { %s6184_s17 = scalar_lea.vmem [#allocation9], %s4682_s20 }
 0x1ac   : > { %5453 = dma.done.wait (%p7060_p4), %s671_s2, 4096  }
 0x1ad   : > { %5455 = vsyncadd (%p7060_p4), %s671_s2, 4294963200  ;;  %s4397_s12 = sshll.u32 %s6173_s3, 6  ;;  %s689_s16 = scalar_lea.sflag [#allocation13], %s6170_s28 }
 0x1ae   : > { %s6191_s0 = scalar_lea.vmem [#allocation11], %s4397_s12  ;;  %s691_s15 = scalar_lea.vmem [#allocation12], %s6173_s3 }
 0x1af   : > { %5457 = dma.done.wait (%p7060_p4), %s689_s16, 32  }
 0x1b0   : > { %5459 = vsyncadd (%p7060_p4), %s689_s16, 4294967264  ;;  %s699_s10 = scalar_lea.vmem [#allocation14], %s6173_s3  ;;  %s705_s11 = scalar_lea.sflag [#allocation16], %s6170_s28 }
 0x1b1   : > { %s707_s30 = scalar_lea.vmem [#allocation15], %s6173_s3 }
 0x1b2   : > { %5461 = dma.done.wait (%p7060_p4), %s705_s11, 2064  }
 0x1b3   : > { %5463 = vsyncadd (%p7060_p4), %s705_s11, 4294965232  ;;  %s4398_s26 = sshll.u32 %s6173_s3, 7  ;;  %s4399_s9 = sshll.u32 %s6173_s3, 1 }
 0x1b4   : > { %s6208_s8 = scalar_lea.vmem [#allocation17], %s4398_s26  ;;  %s722_s20 = scalar_lea.sflag [#allocation19], %s6170_s28 }
 0x1b5   : > { %s6211_s2 = scalar_lea.vmem [#allocation18], %s4399_s9 }
 0x1b6   : > { %5465 = dma.done.wait (%p7060_p4), %s722_s20, 2080  }
 0x1b7   : > { %5467 = vsyncadd (%p7060_p4), %s722_s20, 4294965216  ;;  %s6217_s12 = scalar_lea.vmem [#allocation20], %s4398_s26  ;;  %s740_s16 = scalar_lea.sflag [#allocation22], %s6173_s3 }
 0x1b8   : > { %s742_s11 = scalar_lea.vmem [#allocation21], %s6173_s3 }
 0x1b9   : > { %5469 = dma.done.wait (%p7060_p4), %s740_s16, 16  }
 0x1ba   : > { %5471 = vsyncadd (%p7060_p4), %s740_s16, 4294967280  ;;  %s6227_s28 = scalar_lea.vmem [#allocation23], %s4396_s5  ;;  %s7061_s9 = sld [smem:[#allocation33_spill]] }
 0x1c0   : > { %p4402_p6 = scmp.ne.s32.totalorder %s7061_s9, 0 }
 0x1c1   : > { %v839_v0 = vld [vmem:[%s6163_s1] sm:$0xff] (!%p4402_p6)  ;;  %v840_v1 = vld [vmem:[%s6163_s1 + $0x8] sm:$0xff] (!%p4402_p6)  ;;  %v841_v2 = vld [vmem:[%s6163_s1 + $0x10] sm:$0xff] (!%p4402_p6) }
 0x1c2   : > { %838 = sbr.rel (%p4402_p6) target bundleno = 457 (0x1c9), region = 120  ;;  %843 = vst [vmem:[#allocation2] sm:$0xff] (!%p4402_p6), %v839_v0  ;;  %844 = vst [vmem:[#allocation2 + $0x8] sm:$0xff] (!%p4402_p6), %v840_v1  ;;  %v842_v3 = vld [vmem:[%s6163_s1 + $0x18] sm:$0xff] (!%p4402_p6) }
 0x1c3   : > { %845 = vst [vmem:[#allocation2 + $0x10] sm:$0xff] (!%p4402_p6), %v841_v2  ;;  %846 = vst [vmem:[#allocation2 + $0x18] sm:$0xff] (!%p4402_p6), %v842_v3 }
 0x1c9 PF: > { %v847_v4 = vld [vmem:[#allocation2] sm:$0xff]  ;;  %v848_v6 = vld [vmem:[#allocation2 + $0x8] sm:$0xff]  ;;  %v4875_v32 = vld [vmem:[%s6184_s17 + $0x4c] ss:$12 sps:$4 sm:$0xff]   ;;  %v5538_v43 = vmov 0   ;;  %s5539_s6 = smov 64  }
 0x1ca   : > { %v849_v5 = vld [vmem:[#allocation2 + $0x10] sm:$0xff]  ;;  %853 = vadd.xlane.f32.xlu0 %v847_v4  ;;  %v850_v7 = vld [vmem:[#allocation2 + $0x18] sm:$0xff]  ;;  %v4867_v10 = vld [vmem:[%s6184_s17 + $0x1c] ss:$12 sps:$4 sm:$0xff]   ;;  %1112 = vmatprep.mubr.bf16.mxu0 %v5538_v43  ;;  %vm5541_vm0 = vmmov 0   ;;  %vm2476_vm1 = vcmask 523264  }
 0x1cb   : > { %857 = vadd.xlane.f32.xlu1 %v849_v5  ;;  %v4864_v8 = vld [vmem:[%s6184_s17 + $0x4] ss:$12 sps:$4 sm:$0xff]   ;;  %v4866_v9 = vld [vmem:[%s6184_s17] ss:$12 sps:$4 sm:$0xff]   ;;  %v4869_v11 = vld [vmem:[%s6184_s17 + $0x8] ss:$12 sps:$4 sm:$0xff]  }
 0x1cc   : > { %1080 = vmatprep.subr.bf16.mxu0 %v4864_v8  ;;  %4592 = vmatprep.subr.bf16.mxu1 %v4869_v11  ;;  %v4870_v28 = vld [vmem:[%s6184_s17 + $0x18] ss:$12 sps:$4 sm:$0xff]   ;;  %v4871_v29 = vld [vmem:[%s6184_s17 + $0x34] ss:$12 sps:$4 sm:$0xff]   ;;  %v4874_v31 = vld [vmem:[%s6184_s17 + $0x30] ss:$12 sps:$4 sm:$0xff]  }
 0x1cd   : > { %1081 = vmatpush1.bf16.msra.mxu0 %v4866_v9  ;;  %4593 = vmatpush3.bf16.msra.mxu1 %v4869_v11  ;;  %v4873_v30 = vld [vmem:[%s6184_s17 + $0x20] ss:$12 sps:$4 sm:$0xff]   ;;  %v4877_v33 = vld [vmem:[%s6184_s17 + $0x38] ss:$12 sps:$4 sm:$0xff]   ;;  %v4878_v34 = vld [vmem:[%s6184_s17 + $0x48] ss:$12 sps:$4 sm:$0xff]  }
 0x1ce   : > { %855 = vadd.xlane.f32.xlu0 %v848_v6  ;;  %1082 = vmatprep.subr.bf16.mxu0 %v4867_v10  ;;  %v4879_v35 = vld [vmem:[%s6184_s17 + $0x64] ss:$12 sps:$4 sm:$0xff]   ;;  %v4882_v37 = vld [vmem:[%s6184_s17 + $0x60] ss:$12 sps:$4 sm:$0xff]   ;;  %v4883_v38 = vld [vmem:[%s6184_s17 + $0x7c] ss:$12 sps:$4 sm:$0xff]  }
 0x1cf   : > { %859 = vadd.xlane.f32.xlu1 %v850_v7  ;;  %4594 = vmatprep.subr.bf16.mxu1 %v4873_v30  ;;  %v4881_v36 = vld [vmem:[%s6184_s17 + $0x50] ss:$12 sps:$4 sm:$0xff]   ;;  %v4885_v39 = vld [vmem:[%s6184_s17 + $0x68] ss:$12 sps:$4 sm:$0xff]   ;;  %v4886_v40 = vld [vmem:[%s6184_s17 + $0x78] ss:$12 sps:$4 sm:$0xff]  }
 0x1d0   : > { %v4887_v41 = vld [vmem:[%s6184_s17 + $0x94] ss:$12 sps:$4 sm:$0xff]   ;;  %v4890_v44 = vld [vmem:[%s6184_s17 + $0x90] ss:$12 sps:$4 sm:$0xff]   ;;  %v4891_v45 = vld [vmem:[%s6184_s17 + $0xac] ss:$12 sps:$4 sm:$0xff]  }
 0x1d1   : > { %1083 = vmatpush1.bf16.msra.mxu0 %v4870_v28  ;;  %4595 = vmatpush3.bf16.msra.mxu1 %v4873_v30  ;;  %v4889_v42 = vld [vmem:[%s6184_s17 + $0x80] ss:$12 sps:$4 sm:$0xff]   ;;  %v4893_v46 = vld [vmem:[%s6184_s17 + $0x98] ss:$12 sps:$4 sm:$0xff]   ;;  %v4894_v47 = vld [vmem:[%s6184_s17 + $0xa8] ss:$12 sps:$4 sm:$0xff]  }
 0x1d2   : > { %1084 = vmatprep.subr.bf16.mxu0 %v4871_v29  ;;  %4596 = vmatprep.subr.bf16.mxu1 %v4877_v33  ;;  %v4895_v48 = vld [vmem:[%s6184_s17 + $0xb0] ss:$12 sps:$4 sm:$0xff]   ;;  %vm2665_vm2 = vcmask 130048   ;;  %s7062_s5 = sld [smem:[#allocation33_spill]] }
 0x1d3   : > { %v4403_v63 = vld [vmem:[%s657_s14] ss:$0 sm:$0xff] }
 0x1d5   : > { %1085 = vmatpush1.bf16.msra.mxu0 %v4874_v31  ;;  %4597 = vmatpush3.bf16.msra.mxu1 %v4877_v33 }
 0x1d6   : > { %1086 = vmatprep.subr.bf16.mxu0 %v4875_v32  ;;  %4598 = vmatprep.subr.bf16.mxu1 %v4881_v36 }
 0x1d8   : > { %p4513_p7 = scmp.ne.s32.totalorder %s7062_s5, 1 }
 0x1d9   : > { %1087 = vmatpush1.bf16.msra.mxu0 %v4878_v34  ;;  %4599 = vmatpush3.bf16.msra.mxu1 %v4881_v36  ;;  %v5542_v36 = vmov 1983009808  }
 0x1da   : > { %1088 = vmatprep.subr.bf16.mxu0 %v4879_v35  ;;  %4600 = vmatprep.subr.bf16.mxu1 %v4885_v39  ;;  %v5540_v35 = vmov 0.0  }
 0x1dd   : > { %1089 = vmatpush1.bf16.msra.mxu0 %v4882_v37  ;;  %4601 = vmatpush3.bf16.msra.mxu1 %v4885_v39  ;;  %v1218_v37 = vunpack.c.l.s4 %v5542_v36 }
 0x1de   : > { %1090 = vmatprep.subr.bf16.mxu0 %v4883_v38  ;;  %4602 = vmatprep.subr.bf16.mxu1 %v4889_v42  ;;  %v1220_v38 = vlaneseq }
 0x1df   : > { %v1219_v39 = vunpack.c.0.s8 %v1218_v37 }
 0x1e1   : > { %1091 = vmatpush1.bf16.msra.mxu0 %v4886_v40  ;;  %4603 = vmatpush3.bf16.msra.mxu1 %v4889_v42  ;;  %v6304_v40 = vshrl.u32 %v1220_v38, 7 }
 0x1e2   : > { %1092 = vmatprep.subr.bf16.mxu0 %v4887_v41  ;;  %4604 = vmatprep.subr.bf16.mxu1 %v4893_v46  ;;  %v5543_v41 = vmov 1934713408  }
 0x1e3   : > { %v1233_v42 = vunpack.c.l.s4 %v5543_v41 }
 0x1e5   : > { %1093 = vmatpush1.bf16.msra.mxu0 %v4890_v44  ;;  %4605 = vmatpush3.bf16.msra.mxu1 %v4893_v46  ;;  %v6308_v44 = vpack.i.b16 %v5538_v43, %v5538_v43 }
 0x1e6   : > { %1094 = vmatprep.subr.bf16.mxu0 %v4891_v45  ;;  %4606 = vmatprep.subr.bf16.mxu1 %v4895_v48  ;;  %v6311_v45 = vsub.s32 %v1219_v39, %v6304_v40 }
 0x1e9   : > { %1095 = vmatpush1.bf16.msra.mxu0 %v4894_v47  ;;  %4607 = vmatpush3.bf16.msra.mxu1 %v4895_v48 }
 0x1ea   : > { %4612 = vmatprep.subr.bf16.mxu0 %v5540_v35  ;;  %4624 = vmatprep.subr.bf16.mxu1 %v5540_v35 }
 0x257   : > { %v854_v12 = vpop.xlane.xlu0 %853 }
 0x258   : > { %v858_v13 = vpop.xlane.xlu1 %857  ;;  %v862_v14 = vmul.f32 0.0078125, %v854_v12 }
 0x259   : > { %v864_v15 = vmul.f32 0.0078125, %v858_v13 }
 0x25a   : > { %v6238_v16 = vsub.f32 %v847_v4, %v862_v14  ;;  %v4404_v4 = vld [vmem:[%s665_s27] ss:$0 sm:$0xff] }
 0x25b   : > { %v6240_v17 = vsub.f32 %v849_v5, %v864_v15  ;;  %v856_v18 = vpop.xlane.xlu0 %855 }
 0x25c   : > { %v860_v19 = vpop.xlane.xlu1 %859  ;;  %v863_v20 = vmul.f32 0.0078125, %v856_v18  ;;  %v870_v21 = vmul.f32 %v6238_v16, %v6238_v16 }
 0x25d   : > { %v865_v22 = vmul.f32 0.0078125, %v860_v19  ;;  %v872_v25 = vmul.f32 %v6240_v17, %v6240_v17 }
 0x25e   : > { %v6244_v23 = vsub.f32 %v848_v6, %v863_v20  ;;  %874 = vadd.xlane.f32.xlu0 %v870_v21 }
 0x25f   : > { %v6246_v24 = vsub.f32 %v850_v7, %v865_v22 }
 0x260   : > { %v871_v26 = vmul.f32 %v6244_v23, %v6244_v23 }
 0x261   : > { %v873_v27 = vmul.f32 %v6246_v24, %v6246_v24 }
 0x262   : > { %878 = vadd.xlane.f32.xlu0 %v872_v25  ;;  %876 = vadd.xlane.f32.xlu1 %v871_v26 }
 0x266   : > { %880 = vadd.xlane.f32.xlu1 %v873_v27 }
 0x2eb   : > { %v875_v49 = vpop.xlane.xlu0 %874 }
 0x2ec   : > { %v882_v50 = vmul.f32 0.0078125, %v875_v49 }
 0x2ee   : > { %v886_v51 = vadd.f32 1e-05, %v882_v50 }
 0x2ef   : > { %v877_v52 = vpop.xlane.xlu1 %876  ;;  %v879_v53 = vpop.xlane.xlu0 %878 }
 0x2f0   : > { %4944 = vrsqrt.f32 %v886_v51  ;;  %v883_v54 = vmul.f32 0.0078125, %v877_v52  ;;  %v884_v55 = vmul.f32 0.0078125, %v879_v53  ;;  %v1234_v51 = vunpack.c.0.s8 %v1233_v42 }
 0x2f2   : > { %v887_v56 = vadd.f32 1e-05, %v883_v54  ;;  %v888_v57 = vadd.f32 1e-05, %v884_v55 }
 0x2f3   : > { %v881_v58 = vpop.xlane.xlu1 %880 }
 0x2f4   : > { %4946 = vrsqrt.f32 %v887_v56  ;;  %v885_v59 = vmul.f32 0.0078125, %v881_v58 }
 0x2f5   : > { %4948 = vrsqrt.f32 %v888_v57 }
 0x2f6   : > { %v889_v60 = vadd.f32 1e-05, %v885_v59 }
 0x2f8   : > { %4950 = vrsqrt.f32 %v889_v60  ;;  %v6319_v60 = vsub.s32 %v1234_v51, %v6304_v40 }
 0x2fa   : > { %v4945_v61 = vpop.eup %4944 }
 0x2fb   : > { %v894_v62 = vmul.f32 %v4945_v61, %v6238_v16 }
 0x2fd   : > { %v904_v3 = vmul.f32 %v4403_v63, %v894_v62 }
 0x2fe   : > { %v4947_v0 = vpop.eup %4946 }
 0x2ff   : > { %v4949_v1 = vpop.eup %4948  ;;  %v895_v2 = vmul.f32 %v4947_v0, %v6244_v23  ;;  %v914_v8 = vadd.f32 %v4404_v4, %v904_v3 }
 0x300   : > { %v896_v5 = vmul.f32 %v4949_v1, %v6240_v17 }
 0x301   : > { %v905_v6 = vmul.f32 %v4403_v63, %v895_v2 }
 0x302   : > { %v4951_v7 = vpop.eup %4950  ;;  %v906_v11 = vmul.f32 %v4403_v63, %v896_v5 }
 0x303   : > { %v915_v9 = vadd.f32 %v4404_v4, %v905_v6  ;;  %v897_v10 = vmul.f32 %v4951_v7, %v6246_v24 }
 0x304   : > { %v916_v14 = vadd.f32 %v4404_v4, %v906_v11 }
 0x305   : > { %v918_v12 = vpack.c.bf16 %v915_v9, %v914_v8  ;;  %v907_v13 = vmul.f32 %v4403_v63, %v897_v10 }
 0x307   : > { %1113 = vmatmul.mubr.bf16.vlgmr.msra.gmra.mrb[0].mxu0 %v918_v12  ;;  %4608 = vmatprep.mubr.bf16.mxu1 %v918_v12  ;;  %v917_v15 = vadd.f32 %v4404_v4, %v907_v13 }
 0x308   : > { %1122 = vmatprep.mubr.bf16.mxu0 %v5538_v43 }
 0x309   : > { %v919_v16 = vpack.c.bf16 %v917_v15, %v916_v14 }
 0x30b   : > { %4609 = vmatmul.mubr.bf16.vlgmr.msra.gmra.mrb[0].mxu1 %v919_v16 }
 0x30c   : > { %4626 = vmatprep.mubr.msk.bf16.mxu1 %vm5541_vm0, %v5540_v35 }
 0x30f   : > { %1123 = vmatmul.mubr.bf16.gmra.mrb[4].mxu0 %v919_v16 }
 0x310   : > { %4614 = vmatprep.mubr.msk.bf16.mxu0 %vm5541_vm0, %v5540_v35 }
 0x3da   : > { %v1114_v18 = vpop.f32.mrb[0].mxu0 }
 0x3db   : > { %v1116_v17 = vpop.f32.mrb[1].mxu0 }
 0x3dc   : > { %v1118_v19 = vpop.f32.mrb[2].mxu0 }
 0x3dd   : > { %v1182_v20 = vpack.c.bf16 %v1118_v19, %v1114_v18  ;;  %v1120_v21 = vpop.f32.mrb[3].mxu0 }
 0x3de   : > { %v1184_v22 = vpack.c.bf16 %v1120_v21, %v1116_v17  ;;  %v4610_v23 = vpop.f32.mrb[0].mxu1 }
 0x3df   : > { %1190 = vrot.lane.b32.xlu1 %v1182_v20, %s5539_s6  ;;  %v1167_v24 = vpop.f32.mrb[1].mxu1  ;;  %v1198_v47 = vshrl.u32 %v1182_v20, 16 }
 0x3e0   : > { %1622 = vrot.lane.b32.xlu0 %v1184_v22, %s5539_s6  ;;  %v4611_v25 = vpop.f32.mrb[2].mxu1  ;;  %v1630_v62 = vshrl.u32 %v1184_v22, 16 }
 0x3e1   : > { %v6286_v26 = vpack.c.bf16 %v4611_v25, %v4610_v23  ;;  %v1170_v27 = vpop.f32.mrb[3].mxu1 }
 0x3e2   : > { %v6288_v28 = vpack.c.bf16 %v1170_v27, %v1167_v24  ;;  %v1124_v29 = vpop.f32.mrb[4].mxu0 }
 0x3e3   : > { %v1126_v30 = vpop.f32.mrb[5].mxu0 }
 0x3e4   : > { %v1128_v31 = vpop.f32.mrb[6].mxu0 }
 0x3e5   : > { %v6290_v32 = vpack.c.bf16 %v1128_v31, %v1124_v29  ;;  %v1130_v33 = vpop.f32.mrb[7].mxu0 }
 0x3e6   : > { %v6292_v34 = vpack.c.bf16 %v1130_v33, %v1126_v30 }
 0x3e8   : > { %1624 = vrot.lane.b32.xlu1 %v6292_v34, %s5539_s6 }
 0x3ec   : > { %1192 = vrot.lane.b32.xlu1 %v6290_v32, %s5539_s6 }
 0x451   : > { %v1191_v46 = vpop.permute.xlu1 %1190 }
 0x452   : > { %v1196_v48 = vpack.i.b16 %v1191_v46, %v1182_v20  ;;  %v1199_v49 = vshrl.u32 %v1191_v46, 16  ;;  %v1623_v50 = vpop.permute.xlu0 %1622  ;;  %v1212_v46 = vshrl.u32 %v6290_v32, 16 }
 0x453   : > { %v1628_v55 = vpack.i.b16 %v1623_v50, %v1184_v22  ;;  %v1631_v59 = vshrl.u32 %v1623_v50, 16 }
 0x454   : > { %v1200_v52 = vpack.i.b16 %v1199_v49, %v1198_v47  ;;  %v1216_v53 = vcombine.high %v1196_v48, %v6308_v44  ;;  %v1223_v54 = vrot.slane %v1196_v48, %v6311_v45  ;;  %v1638_v47 = vshrl.u32 %v6292_v34, 16 }
 0x455   : > { %v1642_v1 = vcombine.high %v1628_v55, %v6308_v44  ;;  %v1632_v6 = vpack.i.b16 %v1631_v59, %v1630_v62  ;;  %v1649_v7 = vrot.slane %v1628_v55, %v6311_v45 }
 0x456   : > { %v1230_v56 = vrot.slane %v1216_v53, %v6311_v45  ;;  %v1231_v57 = vcombine.high %v1223_v54, %v5538_v43  ;;  %v1265_v58 = vcombine.high %v1200_v52, %v6308_v44  ;;  %v1272_v61 = vrot.slane %v1200_v52, %v6311_v45 }
 0x457   : > { %v1238_v8 = vrot.slane %v1223_v54, %v6319_v60  ;;  %v1656_v12 = vrot.slane %v1642_v1, %v6311_v45  ;;  %v1657_v17 = vcombine.high %v1649_v7, %v5538_v43  ;;  %v1691_v19 = vcombine.high %v1632_v6, %v6308_v44 }
 0x458   : > { %v1246_v63 = vcombine.high %v1230_v56, %v5538_v43  ;;  %v1279_v0 = vrot.slane %v1265_v58, %v6311_v45  ;;  %v1245_v2 = vrot.slane %v1231_v57, %v6319_v60  ;;  %v1280_v3 = vcombine.high %v1272_v61, %v5538_v43 }
 0x459   : > { %v1253_v9 = vrot.slane %v1230_v56, %v6319_v60  ;;  %v1287_v11 = vrot.slane %v1272_v61, %v6319_v60  ;;  %v1698_v22 = vrot.slane %v1632_v6, %v6311_v45  ;;  %v1672_v25 = vcombine.high %v1656_v12, %v5538_v43 }
 0x45a   : > { %v1260_v4 = vrot.slane %v1246_v63, %v6319_v60  ;;  %v1295_v5 = vcombine.high %v1279_v0, %v5538_v43  ;;  %v1294_v10 = vrot.slane %v1280_v3, %v6319_v60  ;;  %v1412_v13 = vcombine.low %v1238_v8, %v1245_v2  ;;  %v1625_v23 = vpop.permute.xlu1 %1624 }
 0x45b   : > { %v4429_v14 = vcombine.high %v1238_v8, %v1245_v2  ;;  %v1302_v24 = vrot.slane %v1279_v0, %v6319_v60  ;;  %v1671_v37 = vrot.slane %v1657_v17, %v6319_v60  ;;  %v1705_v38 = vrot.slane %v1691_v19, %v6311_v45 }
 0x45c   : > { %v1428_v15 = vcombine.low %v1253_v9, %v1260_v4  ;;  %v4430_v16 = vcombine.high %v1253_v9, %v1260_v4  ;;  %v1309_v18 = vrot.slane %v1295_v5, %v6319_v60  ;;  %v1461_v20 = vcombine.low %v1287_v11, %v1294_v10 }
 0x45d   : > { %v4431_v21 = vcombine.high %v1287_v11, %v1294_v10  ;;  %v6342_v27 = vrot.slane %v1412_v13, %v6311_v45  ;;  %v6345_v29 = vrot.slane %v4429_v14, %v6311_v45  ;;  %v1706_v42 = vcombine.high %v1698_v22, %v5538_v43 }
 0x45e   : > { %v6348_v30 = vrot.slane %v1428_v15, %v6311_v45  ;;  %v6351_v31 = vrot.slane %v4430_v16, %v6311_v45  ;;  %v1477_v33 = vcombine.low %v1302_v24, %v1309_v18  ;;  %v4432_v36 = vcombine.high %v1302_v24, %v1309_v18  ;;  %v1193_v53 = vpop.permute.xlu1 %1192 }
 0x45f   : > { %v6356_v39 = vrot.slane %v1461_v20, %v6311_v45  ;;  %v6359_v41 = vrot.slane %v4431_v21, %v6311_v45  ;;  %v1664_v48 = vrot.slane %v1649_v7, %v6319_v60  ;;  %v1444_v49 = vcombine.low %v6342_v27, %v6345_v29 }
 0x460   : > { %v1452_v50 = vcombine.low %v6348_v30, %v6351_v31  ;;  %v1679_v51 = vrot.slane %v1656_v12, %v6319_v60  ;;  %v1686_v52 = vrot.slane %v1672_v25, %v6319_v60  ;;  %v6372_v54 = vrot.slane %v1477_v33, %v6311_v45 }
 0x461   : > { %v6375_v55 = vrot.slane %v4432_v36, %v6311_v45  ;;  %v1721_v56 = vcombine.high %v1705_v38, %v5538_v43  ;;  %v1838_v57 = vcombine.low %v1664_v48, %v1671_v37  ;;  %v1493_v58 = vcombine.low %v6356_v39, %v6359_v41 }
 0x462   : > { %v1713_v59 = vrot.slane %v1698_v22, %v6319_v60  ;;  %v1720_v61 = vrot.slane %v1706_v42, %v6319_v60  ;;  %v1636_v62 = vpack.i.b16 %v1625_v23, %v6292_v34  ;;  %v6384_v63 = vrot.slane %v1705_v38, %v6319_v60 }
 0x463   : > { %v4437_v0 = vcombine.high %v1664_v48, %v1671_v37  ;;  %v1639_v1 = vshrl.u32 %v1625_v23, 16  ;;  %v1210_v2 = vpack.i.b16 %v1193_v53, %v6290_v32  ;;  %v1854_v3 = vcombine.low %v1679_v51, %v1686_v52 }
 0x464   : > { %v4438_v4 = vcombine.high %v1679_v51, %v1686_v52  ;;  %v1740_v5 = vcombine.high %v1636_v62, %v6308_v44  ;;  %v1747_v6 = vrot.slane %v1636_v62, %v6311_v45  ;;  %v6390_v7 = vrot.slane %v1721_v56, %v6319_v60 }
 0x465   : > { %v1845_v8 = vrot.slane %v1838_v57, %v6311_v45  ;;  %v1640_v9 = vpack.i.b16 %v1639_v1, %v1638_v47  ;;  %v1314_v34 = vcombine.high %v1210_v2, %v6308_v44  ;;  %v1887_v10 = vcombine.low %v1713_v59, %v1720_v61 }
 0x466   : > { %v1754_v11 = vrot.slane %v1740_v5, %v6311_v45  ;;  %v1755_v12 = vcombine.high %v1747_v6, %v5538_v43  ;;  %v1213_v32 = vshrl.u32 %v1193_v53, 16  ;;  %v1853_v13 = vrot.slane %v4437_v0, %v6311_v45 }
 0x467   : > { %v1789_v14 = vcombine.high %v1640_v9, %v6308_v44  ;;  %v1796_v15 = vrot.slane %v1640_v9, %v6311_v45  ;;  %v1328_v16 = vrot.slane %v1314_v34, %v6311_v45  ;;  %v6401_v18 = vrot.slane %v1854_v3, %v6311_v45 }
 0x468   : > { %v6404_v17 = vrot.slane %v4438_v4, %v6311_v45  ;;  %v4439_v19 = vcombine.high %v1713_v59, %v1720_v61  ;;  %v1770_v20 = vcombine.high %v1754_v11, %v5538_v43  ;;  %v1501_v21 = vcombine.low %v6372_v54, %v6375_v55 }
 0x469   : > { %v1803_v22 = vrot.slane %v1789_v14, %v6311_v45  ;;  %v1804_v23 = vcombine.high %v1796_v15, %v5538_v43  ;;  %v1321_v24 = vrot.slane %v1210_v2, %v6311_v45  ;;  %v6413_v25 = vrot.slane %v1887_v10, %v6311_v45 }
 0x46a   : > { %v1903_v33 = vcombine.low %v6384_v63, %v6390_v7  ;;  %v1769_v36 = vrot.slane %v1755_v12, %v6319_v60  ;;  %v1214_v37 = vpack.i.b16 %v1213_v32, %v1212_v46  ;;  %v4440_v38 = vcombine.high %v6384_v63, %v6390_v7 }
 0x46b   : > { %v1784_v42 = vrot.slane %v1770_v20, %v6319_v60  ;;  %v1818_v47 = vrot.slane %v1804_v23, %v6319_v60  ;;  %v1344_v48 = vcombine.high %v1328_v16, %v5538_v43  ;;  %v1902_v51 = vrot.slane %v4439_v19, %v6311_v45 }
 0x46c   : > { %v1762_v52 = vrot.slane %v1747_v6, %v6319_v60  ;;  %v1870_v53 = vcombine.low %v1845_v8, %v1853_v13  ;;  %v1878_v56 = vcombine.low %v6401_v18, %v6404_v17  ;;  %v1777_v57 = vrot.slane %v1754_v11, %v6319_v60 }
 0x46d   : > { %v1811_v46 = vrot.slane %v1796_v15, %v6319_v60  ;;  %v1819_v59 = vcombine.high %v1803_v22, %v5538_v43  ;;  %v1329_v61 = vcombine.high %v1321_v24, %v5538_v43  ;;  %v1363_v0 = vcombine.high %v1214_v37, %v6308_v44 }
 0x46e   : > { %v1936_v62 = vcombine.low %v1762_v52, %v1769_v36  ;;  %v4441_v63 = vcombine.high %v1762_v52, %v1769_v36  ;;  %v1370_v1 = vrot.slane %v1214_v37, %v6311_v45  ;;  %v1952_v2 = vcombine.low %v1777_v57, %v1784_v42 }
 0x46f   : > { %v4442_v3 = vcombine.high %v1777_v57, %v1784_v42  ;;  %v1985_v4 = vcombine.low %v1811_v46, %v1818_v47  ;;  %v1358_v5 = vrot.slane %v1344_v48, %v6319_v60  ;;  %v1336_v6 = vrot.slane %v1321_v24, %v6319_v60 }
 0x470   : > { %v1377_v7 = vrot.slane %v1363_v0, %v6311_v45  ;;  %v1378_v8 = vcombine.high %v1370_v1, %v5538_v43  ;;  %v1877_v9 = vrot.slane %v1870_v53, %v6319_v60  ;;  %v1833_v34 = vrot.slane %v1819_v59, %v6319_v60 }
 0x471   : > { %v4443_v10 = vcombine.high %v1811_v46, %v1818_v47  ;;  %v1343_v11 = vrot.slane %v1329_v61, %v6319_v60  ;;  %v1351_v12 = vrot.slane %v1328_v16, %v6319_v60  ;;  %v1826_v32 = vrot.slane %v1803_v22, %v6319_v60 }
 0x472   : > { %v1943_v13 = vrot.slane %v1936_v62, %v6311_v45  ;;  %v1951_v14 = vrot.slane %v4441_v63, %v6311_v45  ;;  %v1393_v15 = vcombine.high %v1377_v7, %v5538_v43  ;;  %v1959_v18 = vrot.slane %v1952_v2, %v6311_v45 }
 0x473   : > { %v1967_v17 = vrot.slane %v4442_v3, %v6311_v45  ;;  %v1992_v19 = vrot.slane %v1985_v4, %v6311_v45  ;;  %v1526_v20 = vcombine.low %v1351_v12, %v1358_v5  ;;  %v1392_v23 = vrot.slane %v1378_v8, %v6319_v60 }
 0x474   : > { %v1400_v24 = vrot.slane %v1377_v7, %v6319_v60  ;;  %v1407_v16 = vrot.slane %v1393_v15, %v6319_v60  ;;  %v1910_v22 = vrot.slane %v1903_v33, %v6311_v45  ;;  %v2000_v36 = vrot.slane %v4443_v10, %v6311_v45 }
 0x475   : > { %v2001_v37 = vcombine.low %v1826_v32, %v1833_v34  ;;  %v1918_v42 = vrot.slane %v4440_v38, %v6311_v45  ;;  %v1919_v47 = vcombine.low %v6413_v25, %v1902_v51  ;;  %v4444_v48 = vcombine.high %v1826_v32, %v1833_v34 }
 0x476   : > { %v1385_v52 = vrot.slane %v1370_v1, %v6319_v60  ;;  %v1575_v53 = vcombine.low %v1400_v24, %v1407_v16  ;;  %v4436_v57 = vcombine.high %v1400_v24, %v1407_v16  ;;  %v1510_v46 = vcombine.low %v1336_v6, %v1343_v11 }
 0x477   : > { %v4434_v59 = vcombine.high %v1351_v12, %v1358_v5  ;;  %v1885_v61 = vrot.slane %v1878_v56, %v6319_v60  ;;  %v1927_v62 = vcombine.low %v1910_v22, %v1918_v42  ;;  %v4433_v63 = vcombine.high %v1336_v6, %v1343_v11 }
 0x478   : > { %v1533_v33 = vrot.slane %v1526_v20, %v6311_v45  ;;  %v1559_v0 = vcombine.low %v1385_v52, %v1392_v23  ;;  %v4435_v2 = vcombine.high %v1385_v52, %v1392_v23  ;;  %v1582_v3 = vrot.slane %v1575_v53, %v6311_v45 }
 0x479   : > { %v1926_v38 = vrot.slane %v1919_v47, %v6319_v60  ;;  %v1934_v25 = vrot.slane %v1927_v62, %v6319_v60  ;;  %v1976_v51 = vcombine.low %v1959_v18, %v1967_v17  ;;  %v1590_v1 = vrot.slane %v4436_v57, %v6311_v45 }
 0x47a   : > { %v1968_v4 = vcombine.low %v1943_v13, %v1951_v14  ;;  %v2008_v5 = vrot.slane %v2001_v37, %v6311_v45  ;;  %v2016_v56 = vrot.slane %v4444_v48, %v6311_v45  ;;  %v1541_v6 = vrot.slane %v4434_v59, %v6311_v45 }
 0x47b   : > { %v1886_v7 = vcombine.low %v1877_v9, %v1885_v61  ;;  %v1935_v8 = vcombine.low %v1926_v38, %v1934_v25  ;;  %v2017_v34 = vcombine.low %v1992_v19, %v2000_v36  ;;  %v1566_v10 = vrot.slane %v1559_v0, %v6311_v45 }
 0x47c   : > { %v1574_v11 = vrot.slane %v4435_v2, %v6311_v45  ;;  %v1983_v12 = vrot.slane %v1976_v51, %v6319_v60  ;;  %v2025_v32 = vcombine.low %v2008_v5, %v2016_v56  ;;  %v1508_v13 = vrot.slane %v1501_v21, %v6319_v60 }
 0x47d   : > { %v1517_v14 = vrot.slane %v1510_v46, %v6311_v45  ;;  %v1525_v15 = vrot.slane %v4433_v63, %v6311_v45  ;;  %v2036_v18 = vpack.i.b16 %v1935_v8, %v1886_v7  ;;  %v1599_v9 = vcombine.low %v1582_v3, %v1590_v1 }
 0x47e   : > { %v1975_v17 = vrot.slane %v1968_v4, %v6319_v60  ;;  %v2024_v19 = vrot.slane %v2017_v34, %v6319_v60  ;;  %v2032_v20 = vrot.slane %v2025_v32, %v6319_v60  ;;  %v1459_v23 = vrot.slane %v1452_v50, %v6319_v60 }
 0x47f   : > { %v1500_v54 = vrot.slane %v1493_v58, %v6319_v60  ;;  %v2481_v55 = vsel %vm2476_vm1, %v2036_v18, 0  ;;  %v2038_v21 = vshrl.u32 %v1935_v8, 16  ;;  %v1550_v24 = vcombine.low %v1533_v33, %v1541_v6 }
 0x480   : > { %v1591_v16 = vcombine.low %v1566_v10, %v1574_v11  ;;  %4613 = vmatpush3.bf16.xpose.msra.mxu0 %v2481_v55  ;;  %v1984_v22 = vcombine.low %v1975_v17, %v1983_v12  ;;  %v2033_v36 = vcombine.low %v2024_v19, %v2032_v20  ;;  %v1451_v37 = vrot.slane %v1444_v49, %v6319_v60 }
 0x481   : > { %v1509_v30 = vcombine.low %v1500_v54, %v1508_v13  ;;  %4618 = vmatprep.subr.bf16.mxu0 %v5540_v35  ;;  %v2037_v31 = vshrl.u32 %v1886_v7, 16  ;;  %v1542_v50 = vcombine.low %v1517_v14, %v1525_v15  ;;  %v1606_v41 = vrot.slane %v1599_v9, %v6319_v60 }
 0x482   : > { %v2042_v39 = vpack.i.b16 %v2033_v36, %v1984_v22  ;;  %v1460_v58 = vcombine.low %v1451_v37, %v1459_v23  ;;  %v1557_v47 = vrot.slane %v1550_v24, %v6319_v60  ;;  %v1598_v48 = vrot.slane %v1591_v16, %v6319_v60 }
 0x483   : > { %v2039_v42 = vpack.i.b16 %v2038_v21, %v2037_v31  ;;  %v1549_v27 = vrot.slane %v1542_v50, %v6319_v60  ;;  %v2044_v57 = vshrl.u32 %v2033_v36, 16  ;;  %v1612_v59 = vshrl.u32 %v1509_v30, 16 }
 0x484   : > { %v2575_v52 = vsel %vm2476_vm1, %v2042_v39, 0  ;;  %v1610_v53 = vpack.i.b16 %v1509_v30, %v1460_v58  ;;  %v1607_v29 = vcombine.low %v1598_v48, %v1606_v41  ;;  %v2043_v61 = vshrl.u32 %v1984_v22, 16 }
 0x485   : > { %4625 = vmatpush3.bf16.xpose.msra.mxu1 %v2575_v52  ;;  %v2528_v49 = vsel %vm2476_vm1, %v2039_v42, 0  ;;  %v1558_v46 = vcombine.low %v1549_v27, %v1557_v47  ;;  %v1611_v63 = vshrl.u32 %v1460_v58, 16 }
 0x486   : > { %4636 = vmatprep.subr.bf16.mxu1 %v5540_v35  ;;  %v2045_v33 = vpack.i.b16 %v2044_v57, %v2043_v61  ;;  %v1618_v3 = vshrl.u32 %v1607_v29, 16 }
 0x487   : > { %4615 = vmatmul.mubr.msk.bf16.vlgmr.msra.gmra.mrb[8].mxu0 %vm2476_vm1, %v1610_v53  ;;  %v1616_v62 = vpack.i.b16 %v1607_v29, %v1558_v46  ;;  %v1613_v0 = vpack.i.b16 %v1612_v59, %v1611_v63  ;;  %v1617_v38 = vshrl.u32 %v1558_v46, 16 }
 0x488   : > { %4619 = vmatpush3.bf16.xpose.msra.mxu0 %v2528_v49  ;;  %4620 = vmatprep.mubr.msk.bf16.mxu0 %vm5541_vm0, %v5540_v35  ;;  %v2622_v2 = vsel %vm2476_vm1, %v2045_v33, 0 }
 0x489   : > { %4630 = vmatprep.subr.bf16.mxu0 %v5540_v35  ;;  %v1619_v25 = vpack.i.b16 %v1618_v3, %v1617_v38  ;;  %v2056_v3 = vshrl.u32 %v6288_v28, 16 }
 0x48c   : > { %4627 = vmatmul.mubr.msk.bf16.vlgmr.msra.gmra.mrb[4].mxu1 %vm2476_vm1, %v1616_v62 }
 0x48d   : > { %4638 = vmatprep.mubr.msk.bf16.mxu1 %vm5541_vm0, %v5540_v35 }
 0x48f   : > { %4621 = vmatmul.mubr.msk.bf16.vlgmr.msra.gmra.mrb[12].mxu0 %vm2476_vm1, %v1613_v0 }
 0x490   : > { %4631 = vmatpush3.bf16.xpose.msra.mxu0 %v2622_v2  ;;  %4632 = vmatprep.mubr.msk.bf16.mxu0 %vm5541_vm0, %v5540_v35 }
 0x491   : > { %4642 = vmatprep.subr.bf16.mxu0 %v5540_v35 }
 0x497   : > { %4633 = vmatmul.mubr.msk.bf16.vlgmr.msra.gmra.mrb[16].mxu0 %vm2476_vm1, %v1619_v25 }
 0x498   : > { %4644 = vmatprep.mubr.msk.bf16.mxu0 %vm5541_vm0, %v5540_v35 }
 0x55a   : > { %v2517_v51 = vpop.f32.mrb[8].mxu0 }
 0x55b   : > { %v4616_v1 = vpop.f32.mrb[9].mxu0  ;;  %v2666_v4 = vsel %vm2665_vm2, %v2517_v51, -inf }
 0x55c   : > { %2667 = vmax.xlane.f32.xlu0 %v2666_v4  ;;  %v2520_v5 = vpop.f32.mrb[10].mxu0 }
 0x55d   : > { %v4617_v56 = vpop.f32.mrb[11].mxu0  ;;  %v2669_v6 = vsel %vm2665_vm2, %v2520_v5, -inf }
 0x55e   : > { %2670 = vmax.xlane.f32.xlu1 %v2669_v6 }
 0x55f   : > { %v2611_v7 = vpop.f32.mrb[4].mxu1 }
 0x560   : > { %v4628_v8 = vpop.f32.mrb[5].mxu1  ;;  %v2678_v19 = vsel %vm2665_vm2, %v2611_v7, -inf }
 0x561   : > { %v6515_v34 = vpop.f32.mrb[6].mxu1 }
 0x562   : > { %v2564_v10 = vpop.f32.mrb[12].mxu0  ;;  %v4629_v11 = vpop.f32.mrb[7].mxu1  ;;  %v2681_v12 = vsel %vm2665_vm2, %v6515_v34, -inf }
 0x563   : > { %v4622_v32 = vpop.f32.mrb[13].mxu0  ;;  %v2672_v13 = vsel %vm2665_vm2, %v2564_v10, -inf  ;;  %2682 = vmax.xlane.f32.xlu1 %v2681_v12 }
 0x564   : > { %2673 = vmax.xlane.f32.xlu0 %v2672_v13  ;;  %v2567_v14 = vpop.f32.mrb[14].mxu0 }
 0x565   : > { %v4623_v15 = vpop.f32.mrb[15].mxu0  ;;  %v2675_v18 = vsel %vm2665_vm2, %v2567_v14, -inf }
 0x568   : > { %2676 = vmax.xlane.f32.xlu0 %v2675_v18 }
 0x56a   : > { %v2658_v9 = vpop.f32.mrb[16].mxu0 }
 0x56b   : > { %v4634_v17 = vpop.f32.mrb[17].mxu0  ;;  %v2684_v55 = vsel %vm2665_vm2, %v2658_v9, -inf }
 0x56c   : > { %2679 = vmax.xlane.f32.xlu0 %v2678_v19  ;;  %v2661_v20 = vpop.f32.mrb[18].mxu0 }
 0x56d   : > { %v4635_v23 = vpop.f32.mrb[19].mxu0  ;;  %v2687_v54 = vsel %vm2665_vm2, %v2661_v20, -inf }
 0x56e   : > { %2688 = vmax.xlane.f32.xlu1 %v2687_v54 }
 0x570   : > { %2685 = vmax.xlane.f32.xlu0 %v2684_v55 }
 0x586   : > { %2048 = vrot.lane.b32.xlu0 %v6288_v28, %s5539_s6 }
 0x5e9   : > { %v2668_v21 = vpop.xlane.xlu0 %2667 }
 0x5ea   : > { %v2690_v24 = vsub.f32 %v2517_v51, %v2668_v21 }
 0x5eb   : > { %v2671_v16 = vpop.xlane.xlu1 %2670 }
 0x5ec   : > { %v2698_v22 = vmul.f32 1.442695, %v2690_v24  ;;  %v2691_v36 = vsub.f32 %v2520_v5, %v2671_v16 }
 0x5ee   : > { %4952 = vpow2.f32 %v2698_v22  ;;  %v2700_v37 = vmul.f32 1.442695, %v2691_v36 }
 0x5f0   : > { %4954 = vpow2.f32 %v2700_v37  ;;  %v6526_v58 = vpop.xlane.xlu1 %2682 }
 0x5f1   : > { %v2674_v30 = vpop.xlane.xlu0 %2673 }
 0x5f2   : > { %v2692_v31 = vsub.f32 %v2564_v10, %v2674_v30 }
 0x5f4   : > { %v2702_v50 = vmul.f32 1.442695, %v2692_v31 }
 0x5f5   : > { %v2677_v39 = vpop.xlane.xlu0 %2676 }
 0x5f6   : > { %4956 = vpow2.f32 %v2702_v50  ;;  %v2693_v41 = vsub.f32 %v2567_v14, %v2677_v39 }
 0x5f8   : > { %v6528_v42 = vpop.eup %4952  ;;  %v2704_v47 = vmul.f32 1.442695, %v2693_v41 }
 0x5f9   : > { %v2680_v48 = vpop.xlane.xlu0 %2679  ;;  %v2714_v52 = vsel %vm2665_vm2, %v6528_v42, 0.0 }
 0x5fa   : > { %v6532_v53 = vpop.eup %4954  ;;  %4958 = vpow2.f32 %v2704_v47  ;;  %v2694_v27 = vsub.f32 %v2611_v7, %v2680_v48  ;;  %2715 = vadd.xlane.f32.xlu1 %v2714_v52 }
 0x5fb   : > { %v2689_v29 = vpop.xlane.xlu1 %2688  ;;  %v2717_v59 = vsel %vm2665_vm2, %v6532_v53, 0.0 }
 0x5fc   : > { %v2706_v49 = vmul.f32 1.442695, %v2694_v27  ;;  %v2697_v57 = vsub.f32 %v2661_v20, %v2689_v29 }
 0x5fd   : > { %v2686_v46 = vpop.xlane.xlu0 %2685 }
 0x5fe   : > { %4960 = vpow2.f32 %v2706_v49  ;;  %v2696_v61 = vsub.f32 %v2658_v9, %v2686_v46  ;;  %2718 = vadd.xlane.f32.xlu1 %v2717_v59  ;;  %v2712_v63 = vmul.f32 1.442695, %v2697_v57 }
 0x600   : > { %v6536_v62 = vpop.eup %4956  ;;  %v2710_v33 = vmul.f32 1.442695, %v2696_v61 }
 0x601   : > { %v2049_v0 = vpop.permute.xlu0 %2048  ;;  %v2720_v2 = vsel %vm2665_vm2, %v6536_v62, 0.0 }
 0x602   : > { %4962 = vpow2.f32 %v2710_v33  ;;  %v2054_v38 = vpack.i.b16 %v2049_v0, %v6288_v28  ;;  %v2057_v25 = vshrl.u32 %v2049_v0, 16  ;;  %2721 = vadd.xlane.f32.xlu1 %v2720_v2 }
 0x603   : > { %4964 = vpow2.f32 %v2712_v63 }
 0x604   : > { %v6542_v51 = vpop.eup %4958  ;;  %v2058_v1 = vpack.i.b16 %v2057_v25, %v2056_v3  ;;  %v2068_v4 = vcombine.high %v2054_v38, %v6308_v44  ;;  %v2075_v5 = vrot.slane %v2054_v38, %v6311_v45 }
 0x605   : > { %v2723_v56 = vsel %vm2665_vm2, %v6542_v51, 0.0 }
 0x606   : > { %v2082_v6 = vrot.slane %v2068_v4, %v6311_v45  ;;  %v2083_v7 = vcombine.high %v2075_v5, %v5538_v43  ;;  %v2117_v8 = vcombine.high %v2058_v1, %v6308_v44  ;;  %2724 = vadd.xlane.f32.xlu1 %v2723_v56  ;;  %v2124_v28 = vrot.slane %v2058_v1, %v6311_v45 }
 0x607   : > { %v2090_v11 = vrot.slane %v2075_v5, %v6319_v60 }
 0x608   : > { %v6552_v10 = vpop.eup %4960  ;;  %v2097_v12 = vrot.slane %v2083_v7, %v6319_v60  ;;  %v2098_v32 = vcombine.high %v2082_v6, %v5538_v43  ;;  %v2131_v13 = vrot.slane %v2117_v8, %v6311_v45  ;;  %v2132_v14 = vcombine.high %v2124_v28, %v5538_v43 }
 0x609   : > { %v2726_v15 = vsel %vm2665_vm2, %v6552_v10, 0.0  ;;  %v2105_v18 = vrot.slane %v2082_v6, %v6319_v60  ;;  %v2139_v20 = vrot.slane %v2124_v28, %v6319_v60  ;;  %v2695_v7 = vsub.f32 %v6515_v34, %v6526_v58 }
 0x60a   : > { %v2112_v9 = vrot.slane %v2098_v32, %v6319_v60  ;;  %v2147_v17 = vcombine.high %v2131_v13, %v5538_v43  ;;  %v2264_v19 = vcombine.low %v2090_v11, %v2097_v12  ;;  %2727 = vadd.xlane.f32.xlu0 %v2726_v15  ;;  %v2146_v23 = vrot.slane %v2132_v14, %v6319_v60 }
 0x60b   : > { %v2154_v54 = vrot.slane %v2131_v13, %v6319_v60  ;;  %v4445_v55 = vcombine.high %v2090_v11, %v2097_v12  ;;  %v2708_v8 = vmul.f32 1.442695, %v2695_v7 }
 0x60c   : > { %v6567_v21 = vpop.eup %4962  ;;  %v2161_v24 = vrot.slane %v2147_v17, %v6319_v60  ;;  %v2271_v16 = vrot.slane %v2264_v19, %v6311_v45  ;;  %v2280_v22 = vcombine.low %v2105_v18, %v2112_v9  ;;  %v4446_v36 = vcombine.high %v2105_v18, %v2112_v9 }
 0x60d   : > { %v2279_v37 = vrot.slane %v4445_v55, %v6311_v45  ;;  %v2313_v30 = vcombine.low %v2139_v20, %v2146_v23  ;;  %v4447_v31 = vcombine.high %v2139_v20, %v2146_v23  ;;  %v2732_v50 = vsel %vm2665_vm2, %v6567_v21, 0.0  ;;  %v6574_v39 = vpop.eup %4964 }
 0x60e   : > { %v2287_v41 = vrot.slane %v2280_v22, %v6311_v45  ;;  %v2295_v47 = vrot.slane %v4446_v36, %v6311_v45  ;;  %v2329_v48 = vcombine.low %v2154_v54, %v2161_v24  ;;  %v4448_v52 = vcombine.high %v2154_v54, %v2161_v24  ;;  %2733 = vadd.xlane.f32.xlu0 %v2732_v50 }
 0x60f   : > { %v2296_v27 = vcombine.low %v2271_v16, %v2279_v37  ;;  %v2320_v29 = vrot.slane %v2313_v30, %v6311_v45  ;;  %v2328_v49 = vrot.slane %v4447_v31, %v6311_v45  ;;  %v2735_v61 = vsel %vm2665_vm2, %v6574_v39, 0.0 }
 0x610   : > { %v2336_v57 = vrot.slane %v2329_v48, %v6311_v45  ;;  %v2344_v46 = vrot.slane %v4448_v52, %v6311_v45  ;;  %v2304_v59 = vcombine.low %v2287_v41, %v2295_v47  ;;  %4966 = vpow2.f32 %v2708_v8 }
 0x611   : > { %v2345_v63 = vcombine.low %v2320_v29, %v2328_v49  ;;  %v2303_v33 = vrot.slane %v2296_v27, %v6319_v60  ;;  %v2064_v19 = vshrl.u32 %v6286_v26, 16 }
 0x612   : > { %2736 = vadd.xlane.f32.xlu0 %v2735_v61  ;;  %v2311_v0 = vrot.slane %v2304_v59, %v6319_v60  ;;  %v2353_v2 = vcombine.low %v2336_v57, %v2344_v46 }
 0x613   : > { %v2352_v38 = vrot.slane %v2345_v63, %v6319_v60 }
 0x614   : > { %v2312_v3 = vcombine.low %v2303_v33, %v2311_v0  ;;  %v2360_v25 = vrot.slane %v2353_v2, %v6319_v60 }
 0x616   : > { %v2361_v1 = vcombine.low %v2352_v38, %v2360_v25  ;;  %v2464_v5 = vshrl.u32 %v2312_v3, 16 }
 0x617   : > { %2050 = vrot.lane.b32.xlu1 %v6286_v26, %s5539_s6 }
 0x618   : > { %v2462_v4 = vpack.i.b16 %v2361_v1, %v2312_v3  ;;  %v2465_v56 = vshrl.u32 %v2361_v1, 16 }
 0x61a   : > { %4637 = vmatpush3.bf16.msra.mxu1 %v2462_v4  ;;  %v2466_v6 = vpack.i.b16 %v2465_v56, %v2464_v5  ;;  %v6594_v28 = vpop.eup %4966 }
 0x61b   : > { %4648 = vmatprep.subr.bf16.mxu1 %v5540_v35  ;;  %v2729_v11 = vsel %vm2665_vm2, %v6594_v28, 0.0 }
 0x61c   : > { %4643 = vmatpush3.bf16.msra.mxu0 %v2466_v6 }
 0x61d   : > { %4654 = vmatprep.subr.bf16.mxu0 %v5540_v35 }
 0x63b   : > { %2730 = vadd.xlane.f32.xlu1 %v2729_v11 }
 0x687   : > { %v2716_v12 = vpop.xlane.xlu1 %2715 }
 0x688   : > { %4968 = vrcp.f32 %v2716_v12 }
 0x68b   : > { %v2719_v32 = vpop.xlane.xlu1 %2718 }
 0x68c   : > { %4970 = vrcp.f32 %v2719_v32 }
 0x68f   : > { %v2722_v13 = vpop.xlane.xlu1 %2721 }
 0x690   : > { %4972 = vrcp.f32 %v2722_v13 }
 0x692   : > { %v4969_v15 = vpop.eup %4968 }
 0x693   : > { %v2725_v14 = vpop.xlane.xlu1 %2724  ;;  %v2746_v34 = vmul.f32 %v4969_v15, %v6528_v42 }
 0x694   : > { %4974 = vrcp.f32 %v2725_v14 }
 0x696   : > { %v4971_v18 = vpop.eup %4970 }
 0x697   : > { %v2747_v58 = vmul.f32 %v4971_v18, %v6532_v53  ;;  %v6600_v9 = vpop.xlane.xlu0 %2727  ;;  %v2051_v17 = vpop.permute.xlu1 %2050 }
 0x698   : > { %v2062_v20 = vpack.i.b16 %v2051_v17, %v6286_v26  ;;  %v2065_v23 = vshrl.u32 %v2051_v17, 16 }
 0x699   : > { %v2754_v54 = vpack.c.bf16 %v2747_v58, %v2746_v34 }
 0x69a   : > { %v4973_v55 = vpop.eup %4972  ;;  %v2066_v24 = vpack.i.b16 %v2065_v23, %v2064_v19  ;;  %v2166_v16 = vcombine.high %v2062_v20, %v6308_v44  ;;  %v2173_v22 = vrot.slane %v2062_v20, %v6311_v45 }
 0x69b   : > { %v2734_v36 = vpop.xlane.xlu0 %2733  ;;  %4639 = vmatmul.mubr.msk.bf16.vlgmr.msra.gmra.mrb[8].mxu1 %vm2665_vm2, %v2754_v54  ;;  %v2748_v26 = vmul.f32 %v4973_v55, %v6536_v62 }
 0x69c   : > { %v2180_v42 = vrot.slane %v2166_v16, %v6311_v45  ;;  %v2181_v53 = vcombine.high %v2173_v22, %v5538_v43  ;;  %v2215_v37 = vcombine.high %v2066_v24, %v6308_v44  ;;  %4650 = vmatprep.mubr.msk.bf16.mxu1 %vm5541_vm0, %v5540_v35  ;;  %v2222_v30 = vrot.slane %v2066_v24, %v6311_v45 }
 0x69d   : > { %v2188_v50 = vrot.slane %v2173_v22, %v6319_v60 }
 0x69e   : > { %v4975_v31 = vpop.eup %4974  ;;  %v2195_v41 = vrot.slane %v2181_v53, %v6319_v60  ;;  %v2196_v47 = vcombine.high %v2180_v42, %v5538_v43  ;;  %v2229_v48 = vrot.slane %v2215_v37, %v6311_v45  ;;  %v2203_v44 = vrot.slane %v2180_v42, %v6319_v60 }
 0x69f   : > { %v2749_v52 = vmul.f32 %v4975_v31, %v6542_v51  ;;  %v2230_v27 = vcombine.high %v2222_v30, %v5538_v43  ;;  %v2237_v29 = vrot.slane %v2222_v30, %v6319_v60  ;;  %v2737_v62 = vpop.xlane.xlu0 %2736 }
 0x6a0   : > { %v2210_v49 = vrot.slane %v2196_v47, %v6319_v60  ;;  %v2245_v57 = vcombine.high %v2229_v48, %v5538_v43  ;;  %v2252_v46 = vrot.slane %v2229_v48, %v6319_v60  ;;  %v2362_v59 = vcombine.low %v2188_v50, %v2195_v41 }
 0x6a1   : > { %v2244_v61 = vrot.slane %v2230_v27, %v6319_v60  ;;  %v4449_v63 = vcombine.high %v2188_v50, %v2195_v41  ;;  %4976 = vrcp.f32 %v2737_v62  ;;  %v2755_v33 = vpack.c.bf16 %v2749_v52, %v2748_v26 }
 0x6a2   : > { %v2259_v51 = vrot.slane %v2245_v57, %v6319_v60  ;;  %v2369_v0 = vrot.slane %v2362_v59, %v6311_v45  ;;  %v2378_v2 = vcombine.low %v2203_v44, %v2210_v49  ;;  %v4450_v3 = vcombine.high %v2203_v44, %v2210_v49 }
 0x6a3   : > { %v2377_v38 = vrot.slane %v4449_v63, %v6311_v45  ;;  %v2411_v25 = vcombine.low %v2237_v29, %v2244_v61  ;;  %v4451_v1 = vcombine.high %v2237_v29, %v2244_v61  ;;  %4978 = vrcp.f32 %v2734_v36  ;;  %4645 = vmatmul.mubr.msk.bf16.vlgmr.msra.gmra.mrb[20].mxu0 %vm2665_vm2, %v2755_v33 }
 0x6a4   : > { %v2385_v4 = vrot.slane %v2378_v2, %v6311_v45  ;;  %v2393_v5 = vrot.slane %v4450_v3, %v6311_v45  ;;  %v2427_v56 = vcombine.low %v2252_v46, %v2259_v51  ;;  %v4452_v6 = vcombine.high %v2252_v46, %v2259_v51  ;;  %4656 = vmatprep.mubr.msk.bf16.mxu0 %vm5541_vm0, %v5540_v35 }
 0x6a5   : > { %v2394_v7 = vcombine.low %v2369_v0, %v2377_v38  ;;  %v2418_v8 = vrot.slane %v2411_v25, %v6311_v45  ;;  %v2426_v11 = vrot.slane %v4451_v1, %v6311_v45  ;;  %4980 = vrcp.f32 %v6600_v9 }
 0x6a6   : > { %v2434_v12 = vrot.slane %v2427_v56, %v6311_v45  ;;  %v2442_v32 = vrot.slane %v4452_v6, %v6311_v45  ;;  %v2402_v13 = vcombine.low %v2385_v4, %v2393_v5 }
 0x6a7   : > { %v2443_v14 = vcombine.low %v2418_v8, %v2426_v11  ;;  %v2401_v15 = vrot.slane %v2394_v7, %v6319_v60 }
 0x6a8   : > { %v2409_v18 = vrot.slane %v2402_v13, %v6319_v60  ;;  %v2451_v34 = vcombine.low %v2434_v12, %v2442_v32 }
 0x6a9   : > { %v2450_v17 = vrot.slane %v2443_v14, %v6319_v60 }
 0x6aa   : > { %v2410_v58 = vcombine.low %v2401_v15, %v2409_v18  ;;  %v2458_v19 = vrot.slane %v2451_v34, %v6319_v60 }
 0x6ab   : > { %v4977_v20 = vpop.eup %4976 }
 0x6ac   : > { %v2459_v23 = vcombine.low %v2450_v17, %v2458_v19  ;;  %v2472_v24 = vshrl.u32 %v2410_v58, 16  ;;  %v2753_v22 = vmul.f32 %v4977_v20, %v6574_v39 }
 0x6ad   : > { %v4979_v54 = vpop.eup %4978 }
 0x6ae   : > { %v2470_v55 = vpack.i.b16 %v2459_v23, %v2410_v58  ;;  %v2473_v16 = vshrl.u32 %v2459_v23, 16  ;;  %v2752_v42 = vmul.f32 %v4979_v54, %v6567_v21 }
 0x6af   : > { %v4981_v26 = vpop.eup %4980 }
 0x6b0   : > { %4649 = vmatpush3.bf16.msra.mxu1 %v2470_v55  ;;  %v2474_v36 = vpack.i.b16 %v2473_v16, %v2472_v24  ;;  %v2757_v53 = vpack.c.bf16 %v2753_v22, %v2752_v42  ;;  %v2750_v31 = vmul.f32 %v4981_v26, %v6552_v10 }
 0x6b2   : > { %4655 = vmatpush3.bf16.msra.mxu0 %v2474_v36 }
 0x6b5   : > { %4657 = vmatmul.mubr.msk.bf16.vlgmr.msra.gmra.mrb[24].mxu0 %vm2665_vm2, %v2757_v53 }
 0x6b6   : > { %3752 = vmatprep.mubr.bf16.mxu0 %v5538_v43 }
 0x6c8   : > { %v2731_v37 = vpop.xlane.xlu1 %2730 }
 0x6c9   : > { %4982 = vrcp.f32 %v2731_v37 }
 0x6d3   : > { %v4983_v30 = vpop.eup %4982 }
 0x6d4   : > { %v2751_v39 = vmul.f32 %v4983_v30, %v6594_v28 }
 0x6d6   : > { %v2756_v50 = vpack.c.bf16 %v2751_v39, %v2750_v31 }
 0x6d8   : > { %4651 = vmatmul.mubr.msk.bf16.vlgmr.msra.gmra.mrb[12].mxu1 %vm2665_vm2, %v2756_v50  ;;  %v4896_v50 = vld [vmem:[%s6191_s0] sm:$0xff]  }
 0x6d9   : > { %4660 = vmatprep.subr.bf16.mxu1 %v4896_v50 }
 0x6da   : > { %4661 = vmatpush3.bf16.msra.mxu1 %v4896_v50 }
 0x76e   : > { %v2795_v21 = vpop.f32.mrb[8].mxu1 }
 0x76f   : > { %v4640_v41 = vpop.f32.mrb[9].mxu1  ;;  %v2934_v52 = vcombine.high %v2795_v21, %v5540_v35  ;;  %v2941_v9 = vrot.slane %v2795_v21, %v6311_v45  ;;  %v4897_v21 = vld [vmem:[%s6191_s0 + $0x8] sm:$0xff]  }
 0x770   : > { %v2798_v47 = vpop.f32.mrb[10].mxu1  ;;  %4662 = vmatprep.subr.bf16.mxu1 %v4897_v21 }
 0x771   : > { %v4641_v48 = vpop.f32.mrb[11].mxu1  ;;  %v2948_v10 = vrot.slane %v2934_v52, %v6311_v45  ;;  %v3000_v28 = vcombine.high %v2798_v47, %v5540_v35  ;;  %v3007_v33 = vrot.slane %v2798_v47, %v6311_v45  ;;  %4663 = vmatpush3.bf16.msra.mxu1 %v4897_v21 }
 0x773   : > { %v3014_v25 = vrot.slane %v3000_v28, %v6311_v45 }
 0x776   : > { %v2839_v44 = vpop.f32.mrb[20].mxu0 }
 0x777   : > { %v2949_v27 = vcombine.high %v2839_v44, %v5540_v35  ;;  %v2956_v29 = vrot.slane %v2839_v44, %v6311_v45  ;;  %v4646_v62 = vpop.f32.mrb[21].mxu0 }
 0x778   : > { %v2842_v49 = vpop.f32.mrb[22].mxu0 }
 0x779   : > { %v2963_v57 = vrot.slane %v2949_v27, %v6311_v45  ;;  %v2964_v46 = vcombine.low %v2941_v9, %v2956_v29  ;;  %v2965_v59 = vcombine.high %v2941_v9, %v2956_v29  ;;  %v3015_v61 = vcombine.high %v2842_v49, %v5540_v35  ;;  %v4647_v63 = vpop.f32.mrb[23].mxu0 }
 0x77a   : > { %v3022_v51 = vrot.slane %v2842_v49, %v6311_v45 }
 0x77b   : > { %v2972_v0 = vrot.slane %v2964_v46, %v6319_v60  ;;  %v2979_v2 = vrot.slane %v2965_v59, %v6319_v60  ;;  %v2980_v3 = vcombine.low %v2948_v10, %v2963_v57  ;;  %v2981_v38 = vcombine.high %v2948_v10, %v2963_v57  ;;  %v4898_v10 = vld [vmem:[%s6191_s0 + $0x10] sm:$0xff]   ;;  %v4899_v57 = vld [vmem:[%s6191_s0 + $0x18] sm:$0xff]   ;;  %v4900_v46 = vld [vmem:[%s6191_s0 + $0x20] sm:$0xff]  }
 0x77c   : > { %v3029_v1 = vrot.slane %v3015_v61, %v6311_v45  ;;  %v3030_v4 = vcombine.low %v3007_v33, %v3022_v51  ;;  %v3031_v5 = vcombine.high %v3007_v33, %v3022_v51  ;;  %4664 = vmatprep.subr.bf16.mxu1 %v4898_v10  ;;  %v4901_v59 = vld [vmem:[%s6191_s0 + $0x28] sm:$0xff]   ;;  %v4902_v61 = vld [vmem:[%s6191_s0 + $0x30] sm:$0xff]  }
 0x77d   : > { %v2988_v56 = vrot.slane %v2980_v3, %v6319_v60  ;;  %v2995_v6 = vrot.slane %v2981_v38, %v6319_v60  ;;  %v3198_v7 = vcombine.low %v2972_v0, %v2979_v2  ;;  %v4461_v8 = vcombine.high %v2972_v0, %v2979_v2  ;;  %4665 = vmatpush3.bf16.msra.mxu1 %v4898_v10 }
 0x77e   : > { %v3038_v11 = vrot.slane %v3030_v4, %v6319_v60  ;;  %v3045_v12 = vrot.slane %v3031_v5, %v6319_v60  ;;  %v3046_v32 = vcombine.low %v3014_v25, %v3029_v1  ;;  %v3047_v13 = vcombine.high %v3014_v25, %v3029_v1  ;;  %4666 = vmatprep.subr.bf16.mxu1 %v4899_v57 }
 0x77f   : > { %v3205_v14 = vrot.slane %v3198_v7, %v6311_v45  ;;  %v3213_v15 = vrot.slane %v4461_v8, %v6311_v45  ;;  %v3214_v18 = vcombine.low %v2988_v56, %v2995_v6  ;;  %v4462_v34 = vcombine.high %v2988_v56, %v2995_v6 }
 0x780   : > { %v3054_v58 = vrot.slane %v3046_v32, %v6319_v60  ;;  %v3061_v17 = vrot.slane %v3047_v13, %v6319_v60  ;;  %v3248_v19 = vcombine.low %v3038_v11, %v3045_v12  ;;  %v4463_v20 = vcombine.high %v3038_v11, %v3045_v12 }
 0x781   : > { %v3221_v23 = vrot.slane %v3214_v18, %v6311_v45  ;;  %v3229_v54 = vrot.slane %v4462_v34, %v6311_v45  ;;  %v3230_v55 = vcombine.low %v3205_v14, %v3213_v15  ;;  %4667 = vmatpush3.bf16.msra.mxu1 %v4899_v57 }
 0x782   : > { %v3255_v24 = vrot.slane %v3248_v19, %v6311_v45  ;;  %v3263_v16 = vrot.slane %v4463_v20, %v6311_v45  ;;  %v3264_v22 = vcombine.low %v3054_v58, %v3061_v17  ;;  %v4464_v36 = vcombine.high %v3054_v58, %v3061_v17  ;;  %4668 = vmatprep.subr.bf16.mxu1 %v4900_v46 }
 0x783   : > { %v3238_v42 = vcombine.low %v3221_v23, %v3229_v54  ;;  %v6679_v30 = vrot.slane %v3230_v55, %v6319_v60 }
 0x784   : > { %v3271_v53 = vrot.slane %v3264_v22, %v6311_v45  ;;  %v3279_v37 = vrot.slane %v4464_v36, %v6311_v45  ;;  %v3280_v26 = vcombine.low %v3255_v24, %v3263_v16 }
 0x785   : > { %v6682_v31 = vrot.slane %v3238_v42, %v6319_v60  ;;  %4669 = vmatpush3.bf16.msra.mxu1 %v4900_v46 }
 0x786   : > { %v3288_v39 = vcombine.low %v3271_v53, %v3279_v37  ;;  %v6691_v52 = vrot.slane %v3280_v26, %v6319_v60  ;;  %4670 = vmatprep.subr.bf16.mxu1 %v4901_v59 }
 0x787   : > { %v3247_v41 = vcombine.high %v6679_v30, %v6682_v31  ;;  %v3246_v47 = vcombine.low %v6679_v30, %v6682_v31  ;;  %v4469_v30 = vld [vmem:[%s691_s15] ss:$0 sm:$0xff] }
 0x788   : > { %v2927_v48 = vpop.f32.mrb[24].mxu0  ;;  %v6694_v44 = vrot.slane %v3288_v39, %v6319_v60 }
 0x789   : > { %v4658_v9 = vpop.f32.mrb[25].mxu0  ;;  %4671 = vmatpush3.bf16.msra.mxu1 %v4901_v59  ;;  %v3081_v63 = vcombine.high %v2927_v48, %v5540_v35  ;;  %v3088_v51 = vrot.slane %v2927_v48, %v6311_v45  ;;  %v4903_v48 = vld [vmem:[%s6191_s0 + $0x38] sm:$0xff]  }
 0x78a   : > { %v2930_v27 = vpop.f32.mrb[26].mxu0  ;;  %v3297_v29 = vcombine.high %v6691_v52, %v6694_v44  ;;  %v3296_v62 = vcombine.low %v6691_v52, %v6694_v44  ;;  %4672 = vmatprep.subr.bf16.mxu1 %v4902_v61 }
 0x78b   : > { %v4659_v28 = vpop.f32.mrb[27].mxu0  ;;  %v3095_v38 = vrot.slane %v3081_v63, %v6311_v45  ;;  %v3147_v25 = vcombine.high %v2930_v27, %v5540_v35  ;;  %v3154_v8 = vrot.slane %v2930_v27, %v6311_v45 }
 0x78c   : > { %v4854_v49 = vpack.i.bf16 %v3297_v29, %v3247_v41 }
 0x78d   : > { %4673 = vmatpush3.bf16.msra.mxu1 %v4902_v61  ;;  %v3161_v15 = vrot.slane %v3147_v25, %v6311_v45 }
 0x78e   : > { %4855 = vrot.lane.b32.xlu0 %v4854_v49, %s5539_s6  ;;  %4674 = vmatprep.subr.bf16.mxu1 %v4903_v48 }
 0x791   : > { %4675 = vmatpush3.bf16.msra.mxu1 %v4903_v48 }
 0x7ab   : > { %v2883_v33 = vpop.f32.mrb[12].mxu1 }
 0x7ac   : > { %v3066_v0 = vcombine.high %v2883_v33, %v5540_v35  ;;  %v3073_v2 = vrot.slane %v2883_v33, %v6311_v45  ;;  %v4652_v3 = vpop.f32.mrb[13].mxu1 }
 0x7ad   : > { %v2886_v1 = vpop.f32.mrb[14].mxu1 }
 0x7ae   : > { %v3080_v4 = vrot.slane %v3066_v0, %v6311_v45  ;;  %v3096_v5 = vcombine.low %v3073_v2, %v3088_v51  ;;  %v3097_v56 = vcombine.high %v3073_v2, %v3088_v51  ;;  %v3132_v6 = vcombine.high %v2886_v1, %v5540_v35  ;;  %v4653_v7 = vpop.f32.mrb[15].mxu1 }
 0x7af   : > { %v3139_v11 = vrot.slane %v2886_v1, %v6311_v45 }
 0x7b0   : > { %v3104_v12 = vrot.slane %v3096_v5, %v6319_v60  ;;  %v3111_v32 = vrot.slane %v3097_v56, %v6319_v60  ;;  %v3112_v13 = vcombine.low %v3080_v4, %v3095_v38  ;;  %v3113_v14 = vcombine.high %v3080_v4, %v3095_v38 }
 0x7b1   : > { %v3146_v18 = vrot.slane %v3132_v6, %v6311_v45  ;;  %v3162_v34 = vcombine.low %v3139_v11, %v3154_v8  ;;  %v3163_v58 = vcombine.high %v3139_v11, %v3154_v8 }
 0x7b2   : > { %v3120_v17 = vrot.slane %v3112_v13, %v6319_v60  ;;  %v3127_v35 = vrot.slane %v3113_v14, %v6319_v60  ;;  %v3298_v19 = vcombine.low %v3104_v12, %v3111_v32  ;;  %v4465_v20 = vcombine.high %v3104_v12, %v3111_v32 }
 0x7b3   : > { %v3170_v23 = vrot.slane %v3162_v34, %v6319_v60  ;;  %v3177_v54 = vrot.slane %v3163_v58, %v6319_v60  ;;  %v3178_v55 = vcombine.low %v3146_v18, %v3161_v15  ;;  %v3179_v24 = vcombine.high %v3146_v18, %v3161_v15  ;;  %v5009_v34 = vld [vmem:[#allocation2 + $0x8] sm:$0xff] }
 0x7b4   : > { %v3305_v16 = vrot.slane %v3298_v19, %v6311_v45  ;;  %v3313_v22 = vrot.slane %v4465_v20, %v6311_v45  ;;  %v3314_v36 = vcombine.low %v3120_v17, %v3127_v35  ;;  %v4466_v42 = vcombine.high %v3120_v17, %v3127_v35  ;;  %v5010_v17 = vld [vmem:[#allocation2 + $0x10] sm:$0xff]  ;;  %v5011_v20 = vld [vmem:[#allocation2 + $0x18] sm:$0xff] }
 0x7b5   : > { %v3186_v53 = vrot.slane %v3178_v55, %v6319_v60  ;;  %v3193_v37 = vrot.slane %v3179_v24, %v6319_v60  ;;  %v3348_v26 = vcombine.low %v3170_v23, %v3177_v54  ;;  %v4467_v39 = vcombine.high %v3170_v23, %v3177_v54  ;;  %v4904_v54 = vld [vmem:[%s6208_s8] ss:$8 sps:$4 sm:$0xff]   ;;  %v4906_v55 = vld [vmem:[%s6208_s8 + $0x4] ss:$8 sps:$4 sm:$0xff]   ;;  %v4909_v24 = vld [vmem:[%s6208_s8 + $0x14] ss:$8 sps:$4 sm:$0xff]  }
 0x7b6   : > { %v3321_v50 = vrot.slane %v3314_v36, %v6311_v45  ;;  %v3329_v21 = vrot.slane %v4466_v42, %v6311_v45  ;;  %v3330_v41 = vcombine.low %v3305_v16, %v3313_v22  ;;  %3720 = vmatprep.subr.bf16.mxu0 %v4906_v55  ;;  %v4907_v16 = vld [vmem:[%s6208_s8 + $0x10] ss:$8 sps:$4 sm:$0xff]  }
 0x7b7   : > { %v3355_v9 = vrot.slane %v3348_v26, %v6311_v45  ;;  %v3363_v27 = vrot.slane %v4467_v39, %v6311_v45  ;;  %v3364_v29 = vcombine.low %v3186_v53, %v3193_v37  ;;  %v4468_v10 = vcombine.high %v3186_v53, %v3193_v37  ;;  %3721 = vmatpush1.bf16.msra.mxu0 %v4904_v54 }
 0x7b8   : > { %v3338_v28 = vcombine.low %v3321_v50, %v3329_v21  ;;  %v3337_v59 = vrot.slane %v3330_v41, %v6319_v60  ;;  %3722 = vmatprep.subr.bf16.mxu0 %v4909_v24 }
 0x7b9   : > { %v3371_v49 = vrot.slane %v3364_v29, %v6311_v45  ;;  %v3379_v57 = vrot.slane %v4468_v10, %v6311_v45  ;;  %v3380_v46 = vcombine.low %v3355_v9, %v3363_v27 }
 0x7ba   : > { %v3345_v61 = vrot.slane %v3338_v28, %v6319_v60 }
 0x7bb   : > { %v3388_v63 = vcombine.low %v3371_v49, %v3379_v57  ;;  %v3387_v0 = vrot.slane %v3380_v46, %v6319_v60  ;;  %3723 = vmatpush1.bf16.msra.mxu0 %v4907_v16  ;;  %v4912_v49 = vld [vmem:[%s6208_s8 + $0x24] ss:$8 sps:$4 sm:$0xff]   ;;  %v4910_v57 = vld [vmem:[%s6208_s8 + $0x20] ss:$8 sps:$4 sm:$0xff]   ;;  %v4915_v46 = vld [vmem:[%s6208_s8 + $0x34] ss:$8 sps:$4 sm:$0xff]  }
 0x7bc   : > { %v3346_v33 = vcombine.low %v3337_v59, %v3345_v61  ;;  %v3347_v51 = vcombine.high %v3337_v59, %v3345_v61  ;;  %3724 = vmatprep.subr.bf16.mxu0 %v4912_v49  ;;  %v4913_v59 = vld [vmem:[%s6208_s8 + $0x30] ss:$8 sps:$4 sm:$0xff]   ;;  %v4918_v61 = vld [vmem:[%s6208_s8 + $0x44] ss:$8 sps:$4 sm:$0xff]   ;;  %v4943_v49 = vld [vmem:[%s6217_s12 + $0x38] sm:$0xff]  }
 0x7bd   : > { %v3395_v2 = vrot.slane %v3388_v63, %v6319_v60  ;;  %v4916_v63 = vld [vmem:[%s6208_s8 + $0x40] ss:$8 sps:$4 sm:$0xff]  }
 0x7bf   : > { %v3397_v3 = vcombine.high %v3387_v0, %v3395_v2  ;;  %v3396_v38 = vcombine.low %v3387_v0, %v3395_v2  ;;  %3725 = vmatpush1.bf16.msra.mxu0 %v4910_v57  ;;  %v4924_v0 = vld [vmem:[%s6208_s8 + $0x64] ss:$8 sps:$4 sm:$0xff]   ;;  %v4922_v2 = vld [vmem:[%s6208_s8 + $0x60] ss:$8 sps:$4 sm:$0xff]   ;;  %v3632_v57 = vsub.s32 0, %v6304_v40 }
 0x7c0   : > { %3726 = vmatprep.subr.bf16.mxu0 %v4915_v46  ;;  %v3628_v46 = vld [vmem:[%s6211_s2] sm:$0x3] }
 0x7c1   : > { %v4859_v25 = vpack.i.bf16 %v3397_v3, %v3347_v51  ;;  %v4919_v51 = vld [vmem:[%s6208_s8 + $0x50] ss:$8 sps:$4 sm:$0xff]   ;;  %v4927_v3 = vld [vmem:[%s6208_s8 + $0x74] ss:$8 sps:$4 sm:$0xff]  }
 0x7c3   : > { %4860 = vrot.lane.b32.xlu1 %v4859_v25, %s5539_s6  ;;  %3727 = vmatpush1.bf16.msra.mxu0 %v4913_v59  ;;  %v3636_v59 = vsub.s32 1, %v6304_v40 }
 0x7c4   : > { %3728 = vmatprep.subr.bf16.mxu0 %v4918_v61  ;;  %v3633_v61 = vrot.slane %v3628_v46, %v3632_v57 }
 0x7c7   : > { %3729 = vmatpush1.bf16.msra.mxu0 %v4916_v63  ;;  %v3637_v63 = vrot.slane %v3628_v46, %v3636_v59 }
 0x800   : > { %v4856_v45 = vpop.permute.xlu0 %4855 }
 0x801   : > { %v4858_v1 = vunpack.i.h.bf16 %v4856_v45  ;;  %v4857_v4 = vunpack.i.l.bf16 %v4856_v45 }
 0x803   : > { %v3414_v5 = vsel %vm2476_vm1, %v3246_v47, %v4857_v4  ;;  %v3415_v56 = vsel %vm2476_vm1, %v3296_v62, %v4858_v1  ;;  %v5008_v62 = vld [vmem:[#allocation2] sm:$0xff] }
 0x804   : > { %v3418_v60 = vpack.c.bf16 %v3415_v56, %v3414_v5 }
 0x806   : > { %4676 = vmatprep.mubr.bf16.mxu1 %v3418_v60 }
 0x835   : > { %v4861_v6 = vpop.permute.xlu1 %4860 }
 0x836   : > { %v4863_v7 = vunpack.i.h.bf16 %v4861_v6  ;;  %v4862_v8 = vunpack.i.l.bf16 %v4861_v6 }
 0x838   : > { %v3416_v11 = vsel %vm2476_vm1, %v3346_v33, %v4862_v8  ;;  %v3417_v12 = vsel %vm2476_vm1, %v3396_v38, %v4863_v7  ;;  %v4921_v33 = vld [vmem:[%s6208_s8 + $0x54] ss:$8 sps:$4 sm:$0xff]   ;;  %v4925_v38 = vld [vmem:[%s6208_s8 + $0x70] ss:$8 sps:$4 sm:$0xff]  }
 0x839   : > { %v3419_v32 = vpack.c.bf16 %v3417_v12, %v3416_v11  ;;  %3730 = vmatprep.subr.bf16.mxu0 %v4921_v33 }
 0x83a   : > { %3731 = vmatpush1.bf16.msra.mxu0 %v4919_v51 }
 0x83b   : > { %4677 = vmatmul.mubr.bf16.vlgmr.msra.gmra.mrb[16].mxu1 %v3419_v32  ;;  %3732 = vmatprep.subr.bf16.mxu0 %v4924_v0 }
 0x83e   : > { %3733 = vmatpush1.bf16.msra.mxu0 %v4922_v2 }
 0x83f   : > { %3734 = vmatprep.subr.bf16.mxu0 %v4927_v3 }
 0x842   : > { %3735 = vmatpush1.bf16.msra.mxu0 %v4925_v38 }
 0x90e   : > { %v4678_v31 = vpop.f32.mrb[16].mxu1 }
 0x90f   : > { %v3525_v47 = vpop.f32.mrb[17].mxu1  ;;  %v3534_v44 = vadd.f32 %v4678_v31, %v4469_v30 }
 0x910   : > { %v3526_v13 = vadd.f32 %v4469_v30, %v3525_v47  ;;  %v4679_v14 = vpop.f32.mrb[18].mxu1 }
 0x911   : > { %v3528_v52 = vpop.f32.mrb[19].mxu1  ;;  %v6757_v35 = vadd.f32 %v5010_v17, %v3534_v44  ;;  %v3537_v19 = vadd.f32 %v4679_v14, %v4469_v30  ;;  %v4479_v44 = vld [vmem:[%s707_s30] ss:$0 sm:$0xff] }
 0x912   : > { %v6752_v15 = vadd.f32 %v5008_v62, %v3526_v13  ;;  %v3529_v18 = vadd.f32 %v4469_v30, %v3528_v52  ;;  %v4478_v30 = vld [vmem:[%s699_s10] ss:$0 sm:$0xff] }
 0x913   : > { %v6761_v23 = vadd.f32 %v5011_v20, %v3537_v19 }
 0x914   : > { %v6754_v58 = vadd.f32 %v5009_v34, %v3529_v18  ;;  %3546 = vadd.xlane.f32.xlu0 %v6752_v15 }
 0x916   : > { %3548 = vadd.xlane.f32.xlu1 %v6754_v58 }
 0x918   : > { %3550 = vadd.xlane.f32.xlu0 %v6757_v35 }
 0x91c   : > { %3552 = vadd.xlane.f32.xlu0 %v6761_v23 }
 0x9a1   : > { %v3547_v22 = vpop.xlane.xlu0 %3546 }
 0x9a2   : > { %v3554_v36 = vmul.f32 0.0078125, %v3547_v22 }
 0x9a3   : > { %v3549_v42 = vpop.xlane.xlu1 %3548 }
 0x9a4   : > { %v3558_v53 = vsub.f32 %v6752_v15, %v3554_v36  ;;  %v3555_v37 = vmul.f32 0.0078125, %v3549_v42  ;;  %v4928_v42 = vld [vmem:[%s6217_s12 + $0x40] sm:$0xff]  }
 0x9a5   : > { %v3551_v26 = vpop.xlane.xlu0 %3550  ;;  %4564 = vmatprep.subr.bf16.mxu1 %v4928_v42 }
 0x9a6   : > { %v3559_v39 = vsub.f32 %v6754_v58, %v3555_v37  ;;  %v3556_v50 = vmul.f32 0.0078125, %v3551_v26  ;;  %v3562_v21 = vmul.f32 %v3558_v53, %v3558_v53  ;;  %v4930_v37 = vld [vmem:[%s6217_s12 + $0x48] sm:$0xff]  }
 0x9a7   : > { %v4931_v26 = vld [vmem:[%s6217_s12 + $0x8] sm:$0xff]  }
 0x9a8   : > { %v3560_v41 = vsub.f32 %v6757_v35, %v3556_v50  ;;  %3566 = vadd.xlane.f32.xlu0 %v3562_v21  ;;  %v3563_v48 = vmul.f32 %v3559_v39, %v3559_v39  ;;  %v4934_v50 = vld [vmem:[%s6217_s12 + $0x58] sm:$0xff]  }
 0x9a9   : > { %v3553_v9 = vpop.xlane.xlu0 %3552  ;;  %v4935_v21 = vld [vmem:[%s6217_s12 + $0x18] sm:$0xff]  }
 0x9aa   : > { %v3557_v27 = vmul.f32 0.0078125, %v3553_v9  ;;  %3568 = vadd.xlane.f32.xlu1 %v3563_v48  ;;  %v3564_v29 = vmul.f32 %v3560_v41, %v3560_v41  ;;  %v4937_v48 = vld [vmem:[%s6217_s12 + $0x20] sm:$0xff]   ;;  %v4938_v9 = vld [vmem:[%s6217_s12 + $0x68] sm:$0xff]  }
 0x9ac   : > { %v3561_v10 = vsub.f32 %v6761_v23, %v3557_v27  ;;  %3570 = vadd.xlane.f32.xlu0 %v3564_v29  ;;  %v4939_v27 = vld [vmem:[%s6217_s12 + $0x28] sm:$0xff]   ;;  %v4940_v29 = vld [vmem:[%s6217_s12 + $0x70] sm:$0xff]  }
 0x9ae   : > { %v3565_v28 = vmul.f32 %v3561_v10, %v3561_v10 }
 0x9b0   : > { %3572 = vadd.xlane.f32.xlu1 %v3565_v28  ;;  %v4942_v28 = vld [vmem:[%s6217_s12 + $0x78] sm:$0xff]  }
 0xa35   : > { %v3567_v25 = vpop.xlane.xlu0 %3566 }
 0xa36   : > { %v3574_v45 = vmul.f32 0.0078125, %v3567_v25 }
 0xa37   : > { %v3569_v1 = vpop.xlane.xlu1 %3568 }
 0xa38   : > { %v3578_v4 = vadd.f32 1e-05, %v3574_v45  ;;  %v3575_v5 = vmul.f32 0.0078125, %v3569_v1 }
 0xa39   : > { %v3571_v56 = vpop.xlane.xlu0 %3570 }
 0xa3a   : > { %4984 = vrsqrt.f32 %v3578_v4  ;;  %v3579_v60 = vadd.f32 1e-05, %v3575_v5  ;;  %v3576_v6 = vmul.f32 0.0078125, %v3571_v56 }
 0xa3c   : > { %4986 = vrsqrt.f32 %v3579_v60  ;;  %v3580_v7 = vadd.f32 1e-05, %v3576_v6 }
 0xa3d   : > { %v3573_v8 = vpop.xlane.xlu1 %3572 }
 0xa3e   : > { %4988 = vrsqrt.f32 %v3580_v7  ;;  %v3577_v11 = vmul.f32 0.0078125, %v3573_v8 }
 0xa40   : > { %v3581_v12 = vadd.f32 1e-05, %v3577_v11 }
 0xa42   : > { %4990 = vrsqrt.f32 %v3581_v12 }
 0xa44   : > { %v4985_v32 = vpop.eup %4984 }
 0xa45   : > { %v3586_v31 = vmul.f32 %v4985_v32, %v3558_v53  ;;  %v4929_v53 = vld [vmem:[%s6217_s12] sm:$0xff]  }
 0xa46   : > { %v4987_v47 = vpop.eup %4986  ;;  %4565 = vmatpush3.bf16.msra.mxu1 %v4929_v53 }
 0xa47   : > { %v3587_v13 = vmul.f32 %v4987_v47, %v3559_v39  ;;  %v3596_v14 = vmul.f32 %v4478_v30, %v3586_v31  ;;  %4566 = vmatprep.subr.bf16.mxu1 %v4930_v37  ;;  %v4932_v39 = vld [vmem:[%s6217_s12 + $0x50] sm:$0xff]  }
 0xa48   : > { %v4989_v52 = vpop.eup %4988 }
 0xa49   : > { %v3597_v62 = vmul.f32 %v4478_v30, %v3587_v13  ;;  %v3606_v18 = vadd.f32 %v4479_v44, %v3596_v14  ;;  %v3588_v17 = vmul.f32 %v4989_v52, %v3560_v41  ;;  %v4936_v41 = vld [vmem:[%s6217_s12 + $0x60] sm:$0xff]  }
 0xa4a   : > { %4567 = vmatpush3.bf16.msra.mxu1 %v4931_v26 }
 0xa4b   : > { %v3607_v34 = vadd.f32 %v4479_v44, %v3597_v62  ;;  %v3598_v55 = vmul.f32 %v4478_v30, %v3588_v17  ;;  %4568 = vmatprep.subr.bf16.mxu1 %v4932_v39 }
 0xa4c   : > { %v4991_v19 = vpop.eup %4990 }
 0xa4d   : > { %v3610_v20 = vpack.c.bf16 %v3607_v34, %v3606_v18  ;;  %v3589_v54 = vmul.f32 %v4991_v19, %v3561_v10  ;;  %v3608_v22 = vadd.f32 %v4479_v44, %v3598_v55  ;;  %v4941_v10 = vld [vmem:[%s6217_s12 + $0x30] sm:$0xff]  }
 0xa4f   : > { %3753 = vmatmul.mubr.bf16.vlgmr.msra.gmra.mrb[28].mxu0 %v3610_v20  ;;  %v3599_v24 = vmul.f32 %v4478_v30, %v3589_v54 }
 0xa50   : > { %3762 = vmatprep.mubr.bf16.mxu0 %v5538_v43  ;;  %v4933_v43 = vld [vmem:[%s6217_s12 + $0x10] sm:$0xff]  }
 0xa51   : > { %v3609_v16 = vadd.f32 %v4479_v44, %v3599_v24  ;;  %4569 = vmatpush3.bf16.msra.mxu1 %v4933_v43 }
 0xa52   : > { %4570 = vmatprep.subr.bf16.mxu1 %v4934_v50 }
 0xa53   : > { %v3611_v36 = vpack.c.bf16 %v3609_v16, %v3608_v22 }
 0xa55   : > { %4571 = vmatpush3.bf16.msra.mxu1 %v4935_v21 }
 0xa56   : > { %4572 = vmatprep.subr.bf16.mxu1 %v4936_v41 }
 0xa57   : > { %3763 = vmatmul.mubr.bf16.gmra.mrb[32].mxu0 %v3611_v36 }
 0xa59   : > { %4573 = vmatpush3.bf16.msra.mxu1 %v4937_v48 }
 0xa5a   : > { %4574 = vmatprep.subr.bf16.mxu1 %v4938_v9 }
 0xa5d   : > { %4575 = vmatpush3.bf16.msra.mxu1 %v4939_v27 }
 0xa5e   : > { %4576 = vmatprep.subr.bf16.mxu1 %v4940_v29 }
 0xa61   : > { %4577 = vmatpush3.bf16.msra.mxu1 %v4941_v10 }
 0xa62   : > { %4578 = vmatprep.subr.bf16.mxu1 %v4942_v28 }
 0xa65   : > { %4579 = vmatpush3.bf16.msra.mxu1 %v4943_v49 }
 0xb22   : > { %v3754_v33 = vpop.f32.mrb[28].mxu0 }
 0xb23   : > { %v6808_v51 = vadd.f32 %v3754_v33, %v3633_v61  ;;  %v3756_v0 = vpop.f32.mrb[29].mxu0 }
 0xb24   : > { %v6810_v2 = vadd.f32 %v3756_v0, %v3637_v63  ;;  %v3758_v3 = vpop.f32.mrb[30].mxu0 }
 0xb25   : > { %v3773_v38 = vmul.f32 %v6808_v51, %v6808_v51  ;;  %v6814_v25 = vadd.f32 %v3758_v3, %v3633_v61  ;;  %v3760_v45 = vpop.f32.mrb[31].mxu0 }
 0xb26   : > { %v3774_v1 = vmul.f32 %v6810_v2, %v6810_v2  ;;  %v6818_v4 = vadd.f32 %v3760_v45, %v3637_v63 }
 0xb27   : > { %v3781_v40 = vmul.f32 %v3773_v38, %v6808_v51  ;;  %v3775_v5 = vmul.f32 %v6814_v25, %v6814_v25 }
 0xb28   : > { %v3782_v56 = vmul.f32 %v3774_v1, %v6810_v2  ;;  %v3776_v60 = vmul.f32 %v6818_v4, %v6818_v4 }
 0xb29   : > { %v3789_v6 = vmul.f32 0.044715, %v3781_v40  ;;  %v3783_v7 = vmul.f32 %v3775_v5, %v6814_v25 }
 0xb2a   : > { %v3790_v8 = vmul.f32 0.044715, %v3782_v56  ;;  %v3784_v11 = vmul.f32 %v3776_v60, %v6818_v4  ;;  %v3764_v12 = vpop.f32.mrb[32].mxu0 }
 0xb2b   : > { %v3797_v32 = vadd.f32 %v3789_v6, %v6808_v51  ;;  %v3791_v30 = vmul.f32 0.044715, %v3783_v7  ;;  %v6829_v31 = vadd.f32 %v3764_v12, %v3633_v61  ;;  %v3766_v47 = vpop.f32.mrb[33].mxu0 }
 0xb2c   : > { %v3798_v13 = vadd.f32 %v3790_v8, %v6810_v2  ;;  %v3792_v14 = vmul.f32 0.044715, %v3784_v11  ;;  %v6832_v52 = vadd.f32 %v3766_v47, %v3637_v63  ;;  %v3768_v44 = vpop.f32.mrb[34].mxu0 }
 0xb2d   : > { %v3805_v62 = vmul.f32 0.7978846, %v3797_v32  ;;  %v3799_v18 = vadd.f32 %v3791_v30, %v6814_v25  ;;  %v3777_v34 = vmul.f32 %v6829_v31, %v6829_v31  ;;  %v6837_v17 = vadd.f32 %v3768_v44, %v3633_v61  ;;  %v3770_v19 = vpop.f32.mrb[35].mxu0 }
 0xb2e   : > { %v3806_v20 = vmul.f32 0.7978846, %v3798_v13  ;;  %v3800_v54 = vadd.f32 %v3792_v14, %v6818_v4  ;;  %v3778_v55 = vmul.f32 %v6832_v52, %v6832_v52  ;;  %v6842_v24 = vadd.f32 %v3770_v19, %v3637_v63 }
 0xb2f   : > { %4992 = vtanh.f32 %v3805_v62  ;;  %v3807_v16 = vmul.f32 0.7978846, %v3799_v18  ;;  %v3785_v22 = vmul.f32 %v3777_v34, %v6829_v31  ;;  %v3779_v36 = vmul.f32 %v6837_v17, %v6837_v17 }
 0xb30   : > { %4994 = vtanh.f32 %v3806_v20  ;;  %v3808_v42 = vmul.f32 0.7978846, %v3800_v54  ;;  %v3786_v53 = vmul.f32 %v3778_v55, %v6832_v52  ;;  %v3780_v37 = vmul.f32 %v6842_v24, %v6842_v24 }
 0xb31   : > { %4996 = vtanh.f32 %v3807_v16  ;;  %v3793_v26 = vmul.f32 0.044715, %v3785_v22  ;;  %v3787_v39 = vmul.f32 %v3779_v36, %v6837_v17  ;;  %v4496_v22 = vld [vmem:[%s742_s11] ss:$0 sm:$0xff] }
 0xb32   : > { %4998 = vtanh.f32 %v3808_v42  ;;  %v3794_v43 = vmul.f32 0.044715, %v3786_v53  ;;  %v3788_v50 = vmul.f32 %v3780_v37, %v6842_v24 }
 0xb33   : > { %v3801_v21 = vadd.f32 %v3793_v26, %v6829_v31  ;;  %v3795_v41 = vmul.f32 0.044715, %v3787_v39 }
 0xb34   : > { %v3802_v48 = vadd.f32 %v3794_v43, %v6832_v52  ;;  %v3796_v9 = vmul.f32 0.044715, %v3788_v50 }
 0xb35   : > { %v3809_v27 = vmul.f32 0.7978846, %v3801_v21  ;;  %v3803_v29 = vadd.f32 %v3795_v41, %v6837_v17 }
 0xb36   : > { %v3810_v10 = vmul.f32 0.7978846, %v3802_v48  ;;  %v3804_v28 = vadd.f32 %v3796_v9, %v6842_v24 }
 0xb37   : > { %5000 = vtanh.f32 %v3809_v27  ;;  %v3811_v49 = vmul.f32 0.7978846, %v3803_v29 }
 0xb38   : > { %5002 = vtanh.f32 %v3810_v10  ;;  %v3812_v57 = vmul.f32 0.7978846, %v3804_v28 }
 0xb39   : > { %v4993_v46 = vpop.eup %4992  ;;  %5004 = vtanh.f32 %v3811_v49 }
 0xb3a   : > { %v4995_v59 = vpop.eup %4994  ;;  %v3821_v61 = vadd.f32 1.0, %v4993_v46  ;;  %5006 = vtanh.f32 %v3812_v57 }
 0xb3b   : > { %v4997_v63 = vpop.eup %4996  ;;  %v3822_v33 = vadd.f32 1.0, %v4995_v59 }
 0xb3c   : > { %v4999_v0 = vpop.eup %4998  ;;  %v3829_v3 = vmul.f32 0.5, %v3821_v61  ;;  %v3823_v38 = vadd.f32 1.0, %v4997_v63 }
 0xb3d   : > { %v3824_v45 = vadd.f32 1.0, %v4999_v0  ;;  %v3830_v1 = vmul.f32 0.5, %v3822_v33 }
 0xb3e   : > { %v3831_v40 = vmul.f32 0.5, %v3823_v38  ;;  %v3837_v56 = vmul.f32 %v3829_v3, %v6808_v51 }
 0xb3f   : > { %v3832_v5 = vmul.f32 0.5, %v3824_v45  ;;  %v3838_v7 = vmul.f32 %v3830_v1, %v6810_v2 }
 0xb40   : > { %v3839_v60 = vmul.f32 %v3831_v40, %v6814_v25 }
 0xb41   : > { %v5001_v6 = vpop.eup %5000  ;;  %v3840_v8 = vmul.f32 %v3832_v5, %v6818_v4 }
 0xb42   : > { %v5003_v11 = vpop.eup %5002  ;;  %v3845_v12 = vpack.c.bf16 %v3839_v60, %v3837_v56  ;;  %v3825_v32 = vadd.f32 1.0, %v5001_v6 }
 0xb43   : > { %v5005_v30 = vpop.eup %5004  ;;  %v3846_v47 = vpack.c.bf16 %v3840_v8, %v3838_v7  ;;  %v3826_v13 = vadd.f32 1.0, %v5003_v11 }
 0xb44   : > { %v5007_v14 = vpop.eup %5006  ;;  %v3827_v44 = vadd.f32 1.0, %v5005_v30  ;;  %v3833_v62 = vmul.f32 0.5, %v3825_v32 }
 0xb45   : > { %4016 = vmatprep.mubr.bf16.mxu1 %v3846_v47  ;;  %v3828_v18 = vadd.f32 1.0, %v5007_v14  ;;  %v3834_v51 = vmul.f32 0.5, %v3826_v13 }
 0xb46   : > { %4017 = vmatmul.mubr.bf16.vlgmr.msra.gmra.mrb[20].mxu1 %v3845_v12  ;;  %v3835_v25 = vmul.f32 0.5, %v3827_v44  ;;  %v3841_v2 = vmul.f32 %v3833_v62, %v6829_v31 }
 0xb47   : > { %v3836_v34 = vmul.f32 0.5, %v3828_v18  ;;  %v3842_v19 = vmul.f32 %v3834_v51, %v6832_v52 }
 0xb48   : > { %v3843_v4 = vmul.f32 %v3835_v25, %v6837_v17 }
 0xb49   : > { %v3844_v20 = vmul.f32 %v3836_v34, %v6842_v24 }
 0xb4a   : > { %v3847_v54 = vpack.c.bf16 %v3843_v4, %v3841_v2 }
 0xb4b   : > { %v3848_v55 = vpack.c.bf16 %v3844_v20, %v3842_v19 }
 0xb4d   : > { %4024 = vmatprep.mubr.bf16.mxu1 %v3848_v55 }
 0xb4e   : > { %4025 = vmatmul.mubr.bf16.gmra.mrb[24].mxu1 %v3847_v54 }
 0xc19   : > { %v4580_v16 = vpop.f32.mrb[20].mxu1 }
 0xc1a   : > { %v4581_v36 = vpop.f32.mrb[21].mxu1 }
 0xc1b   : > { %v4582_v42 = vadd.f32 %v4581_v36, %v4580_v16  ;;  %v4583_v53 = vpop.f32.mrb[22].mxu1 }
 0xc1c   : > { %v4584_v37 = vpop.f32.mrb[23].mxu1 }
 0xc1d   : > { %v4019_v26 = vadd.f32 %v4582_v42, %v4496_v22  ;;  %v4585_v39 = vadd.f32 %v4584_v37, %v4583_v53 }
 0xc1f   : > { %v4033_v31 = vadd.f32 %v4019_v26, %v6752_v15  ;;  %v4022_v17 = vadd.f32 %v4585_v39, %v4496_v22 }
 0xc21   : > { %4037 = vst [vmem:[#allocation2] sm:$0xff] %v4033_v31  ;;  %v4034_v52 = vadd.f32 %v4022_v17, %v6754_v58  ;;  %v4586_v24 = vpop.f32.mrb[24].mxu1  ;;  %4045 = vst [vmem:[%s6227_s28] sm:$0xff] (!%p4513_p7), %v4033_v31 }
 0xc22   : > { %v4587_v43 = vpop.f32.mrb[25].mxu1 }
 0xc23   : > { %4038 = vst [vmem:[#allocation2 + $0x8] sm:$0xff] %v4034_v52  ;;  %v4588_v50 = vadd.f32 %v4587_v43, %v4586_v24  ;;  %v4589_v21 = vpop.f32.mrb[26].mxu1  ;;  %4046 = vst [vmem:[%s6227_s28 + $0x8] sm:$0xff] (!%p4513_p7), %v4034_v52 }
 0xc24   : > { %v4590_v41 = vpop.f32.mrb[27].mxu1 }
 0xc25   : > { %v4027_v48 = vadd.f32 %v4588_v50, %v4496_v22  ;;  %v4591_v9 = vadd.f32 %v4590_v41, %v4589_v21  ;;  %4044 = sbr.rel (%p4513_p7) target bundleno = 3116 (0xc2c), region = 124 }
 0xc27   : > { %v4035_v27 = vadd.f32 %v4027_v48, %v6757_v35  ;;  %v4030_v29 = vadd.f32 %v4591_v9, %v4496_v22 }
 0xc29   : > { %4039 = vst [vmem:[#allocation2 + $0x10] sm:$0xff] %v4035_v27  ;;  %v4036_v10 = vadd.f32 %v4030_v29, %v6761_v23  ;;  %4047 = vst [vmem:[%s6227_s28 + $0x10] sm:$0xff] (!%p4513_p7), %v4035_v27 }
 0xc2b   : > { %4040 = vst [vmem:[#allocation2 + $0x18] sm:$0xff] %v4036_v10  ;;  %4048 = vst [vmem:[%s6227_s28 + $0x18] sm:$0xff] (!%p4513_p7), %v4036_v10 }
 0xc2c PF: > { %s7063_s1 = sld [smem:[#allocation34_spill]]  ;;  %s4064_s15 = sshll.u32 %s6227_s28, 4  ;;  %s6882_s15 = int_to_ptr.vmem [resolvable:$true] %s4064_s15 }
 0xc2d   : > { %s7064_s17 = sld [smem:[#allocation53_spill]]  ;;  %s4050_s10 = scalar_lea.sflag [#allocation5], %s6157_s18 }
 0xc2e   : > { %s5372_s30 = scalar_lea.vmem %s6882_s15, 512  ;;  %p7065_p5 = scmp.ne.s32.totalorder %s7031_s4, 0 }
 0xc2f   : > { %p5373_p0 = scmp.ne.s32.totalorder %s6882_s15, %s5372_s30  ;;  %s5544_s26 = smov [#allocation23]  }
 0xc30   : > { %s5376_s8 = sshll.u32 %s5544_s26, 4  ;;  %s5377_s8 = int_to_ptr.vmem [resolvable:$false] %s5376_s8 }
 0xc31   : > { %p5374_p10 = pnand %p5373_p0, %p7065_p5  ;;  %s5378_s20 = scalar_lea.vmem %s5377_s8, 1024 }
 0xc32   : > { %s4527_s3 = sshll.u32 %s7063_s1, 9  ;;  %p5379_p3 = scmp.lt.s32.totalorder %s6882_s15, %s5377_s8 }
 0xc33   : > { %s6879_s0 = scalar_lea.hbm %s7064_s17, %s4527_s3  ;;  %p5375_p9 = pneg %p5374_p10 }
 0xc34   : > { %p5380_p2 = scmp.lt.s32.totalorder %s5378_s20, %s5372_s30 }
 0xc36   : > { %p5381_p12 = por %p5380_p2, %p5379_p3 }
 0xc38   : > { %p5382_p1 = pnand %p5381_p12, %p5375_p9 }
 0xc3a   : > { %5385 = shalt.err (!%p5382_p1)
}
 0xc3b   : > { %s5386_s2 = scalar_lea.hbm %s6879_s0, 512  ;;  %s5390_s11 = scalar_lea.hbm %s7064_s17, 1024 }
 0xc3c   : > { %p5387_p13 = scmp.ne.s32.totalorder %s6879_s0, %s5386_s2  ;;  %p5391_p4 = scmp.lt.u32.totalorder %s6879_s0, %s7064_s17 }
 0xc3d   : > { %p5392_p6 = scmp.lt.u32.totalorder %s5390_s11, %s5386_s2  ;;  %p5394_p0 = scmp.lt.u32.totalorder %s5386_s2, %s6879_s0 }
 0xc3e   : > { %p5388_p11 = pnand %p5387_p13, %p7065_p5 }
 0xc3f   : > { %p5393_p7 = por %p5392_p6, %p5391_p4 }
 0xc40   : > { %p5389_p8 = pneg %p5388_p11 }
 0xc41   : > { %p5395_p10 = por %p5394_p0, %p5393_p7 }
 0xc43   : > { %p5396_p9 = pnand %p5395_p10, %p5389_p8 }
 0xc45   : > { %5399 = shalt.err (!%p5396_p9)
}
 0xc46   : > { %s5545_s6 = smov 128   ;;  %s5546_s5 = smov 8  }
 0xc47   : > { %4707 = dma.vmem_to_hbm [thread:$0]  (%p7065_p5), %s6882_s15, 512, %s6879_s0, %s4050_s10, %s5545_s6, %s5545_s6, %s5546_s5  }
 0xc48 PF: > { %p4751_p3 = scmp.ge.s32.totalorder %s5518_s13, 2  ;;  %s4079_s1 = sand.u32 1, %s5490_s24  }
 0xc49   : > { %p7066_p2 = scmp.ne.s32.totalorder %s7032_s21, 0  ;;  %s4080_s3 = scalar_lea.sflag [#allocation5], %s4079_s1 }
 0xc4b   : > { %p4747_p12 = pnand %p4751_p3, %p7066_p2 }
 0xc4d   : > { %5473 = dma.done.wait (!%p4747_p12), %s4080_s3, 512  }
 0xc4e   : > { %5475 = vsyncadd (!%p4747_p12), %s4080_s3, 4294966784  ;;  %s46_s13 = sadd.s32 1, %s5518_s13   ;;  %s7067_s14 = sld [smem:[#allocation39_spill]] }
 0xc4f   : > { %p43_p1 = scmp.ge.s32.totalorder %s46_s13, 6   ;;  %s7068_s4 = sld [smem:[#allocation32_spill]] }
 0xc50   : > { %s7069_s26 = sld [smem:[#allocation40_spill]]  ;;  %s7070_s28 = sld [smem:[#allocation35_spill]] }
 0xc51   : > { %s7071_s18 = sld [smem:[#allocation37_spill]]  ;;  %s7072_s30 = sld [smem:[#allocation38_spill]] }
 0xc52   : > { %s7073_s21 = smov %s5482_s22  ;;  %s7074_s22 = smov %s5486_s23 }
 0xc53   : > { %s7076_s24 = smov %s5494_s25  ;;  %s7078_s27 = smov %s5510_s29 }
 0xc54   : > { %s7075_s23 = smov %s7067_s14  ;;  %45 = sbr.rel (!%p43_p1) target bundleno = 35 (0x23), region = 254 }
 0xc55   : > { %s7077_s25 = smov %s7068_s4 }
 0xc57   : > { %s7079_s29 = smov %s7071_s18 }
 0xc5b   :  { %4085 = vsyncpa [#allocation4], 1 }
 0xc5c   :  { %4087 = vsyncpa [#allocation4 + $0x1], 1 }
 0xc5d   :  { %4088 = vsyncpa [#allocation7], 1 }
 0xc5e   :  { %4090 = vsyncpa [#allocation7 + $0x1], 1 }
 0xc5f   :  { %4091 = vsyncpa [#allocation10], 1 }
 0xc60   :  { %4093 = vsyncpa [#allocation10 + $0x1], 1 }
 0xc61   :  { %4094 = vsyncpa [#allocation13], 1 }
 0xc62   :  { %4096 = vsyncpa [#allocation13 + $0x1], 1 }
 0xc63   :  { %4097 = vsyncpa [#allocation16], 1 }
 0xc64   :  { %4099 = vsyncpa [#allocation16 + $0x1], 1 }
 0xc65   :  { %4100 = vsyncpa [#allocation19], 1 }
 0xc66   :  { %4102 = vsyncpa [#allocation19 + $0x1], 1 }
 0xc67   :  { %4103 = vsyncpa [#allocation22], 1 }
 0xc68   :  { %4105 = vsyncpa [#allocation22 + $0x1], 1 }
 0xc69   :  { %4106 = vsyncpa [#allocation5], 1 }
 0xc6a   :  { %4108 = vsyncpa [#allocation5 + $0x1], 1 }

</bundles_post_ra>
